<compile_context>
chip_gen: v7x
topology: tpu7x:2x2x1
jax: 0.10.0
libtpu: 0.0.40
codegen_flags: <defaults>
</compile_context>

<pallas_src>
import functools

import jax
import jax.numpy as jnp
from jax.experimental import pallas as pl
from jax.experimental.pallas import tpu as pltpu

K = 12       # kernel_size == stride  (correctness relies on this + padding=0)
COUT = 256   # output channels
CIN = 1      # input channels


def _convt_sigmoid_kernel(x_ref, w_ref, b_ref, o_ref):
    # x_ref: (R, OW)        upsampled-input tile (lane- and sublane-dense)
    # w_ref: (tc, R, OW)    weight pattern pre-tiled to the output block
    # b_ref: (tc, 1, 1)     per-channel bias
    # o_ref: (tc, R, OW)    output tile, already in final (C, OH, OW) order
    acc = x_ref[...][None, :, :] * w_ref[...] + b_ref[...]
    # sigmoid(z) == 0.5 * tanh(0.5 * z) + 0.5  -> one EUP op per element
    o_ref[...] = 0.5 * jnp.tanh(0.5 * acc) + 0.5


@functools.partial(jax.jit, static_argnames=("tc", "tr"))
def conv_transpose_sigmoid(x, weight, bias, *, tc=32, tr=2):
    """x: (1, 1, H, W) NCHW; weight: (Cin=1, Cout, K, K); bias: (Cout,).

    Returns (1, Cout, H*K, W*K) float32, matching
    sigmoid(ConvTranspose2d(1, Cout, K, stride=K, padding=0)(x)).
    """
    B, Cin, H, W = x.shape
    assert B == 1 and Cin == CIN
    Cout = weight.shape[1]
    assert weight.shape == (CIN, Cout, K, K)
    OH, OW = H * K, W * K
    R = tr * K                                   # output rows per block
    assert tr % 2 == 0, "tr must be even so tr*K (=R) is a multiple of 8"
    assert H % tr == 0 and Cout % tc == 0

    f32 = jnp.float32
    x2 = x[0, 0].astype(f32)                                     # (H, W)
    # Nearest-neighbour upsample: x_full[oh, ow] = x[oh//K, ow//K].
    x_full = jnp.repeat(jnp.repeat(x2, K, axis=0), K, axis=1)    # (OH, OW)

    w0 = weight[0].astype(f32)                                   # (Cout, K, K)
    # w_exp[c, r, ow] = w0[c, r % K, ow % K] -> kernel stays pure elementwise.
    w_exp = jnp.tile(w0, (1, tr, W))                             # (Cout, R, OW)
    b3 = bias.astype(f32).reshape(Cout, 1, 1)

    n_out = Cout * OH * OW
    cost = pl.CostEstimate(
        flops=2 * n_out,
        transcendentals=n_out,
        bytes_accessed=4 * (n_out + Cout * R * OW + OH * OW + Cout),
    )

    # out + w tiles (double-buffered) + x tile; leave headroom, never below default.
    tile_bytes = 2 * 4 * (2 * tc * R * OW + R * OW)
    vmem_limit = max(32 * 1024 * 1024, tile_bytes + (4 << 20))

    out3 = pl.pallas_call(
        _convt_sigmoid_kernel,
        out_shape=jax.ShapeDtypeStruct((Cout, OH, OW), f32),
        grid_spec=pltpu.PrefetchScalarGridSpec(
            num_scalar_prefetch=0,
            grid=(Cout // tc, H // tr),
            in_specs=[
                pl.BlockSpec((R, OW), lambda ci, ri: (ri, 0)),        # x_full
                pl.BlockSpec((tc, R, OW), lambda ci, ri: (ci, 0, 0)),  # w_exp (reused over ri)
                pl.BlockSpec((tc, 1, 1), lambda ci, ri: (ci, 0, 0)),   # bias
            ],
            out_specs=pl.BlockSpec((tc, R, OW), lambda ci, ri: (ci, ri, 0)),
        ),
        compiler_params=pltpu.CompilerParams(
            dimension_semantics=("parallel", "parallel"),
            vmem_limit_bytes=int(vmem_limit),
        ),
        cost_estimate=cost,
    )(x_full, w_exp, b3)

    # (Cout, OH, OW) -> (1, Cout, OH, OW): leading unit dim, free view.
    return out3[None]


if __name__ == "__main__":
    # Small shapes consistent with the module (original used 128x128 spatial).
    H = W = 16
    key = jax.random.PRNGKey(0)
    kx, kw, kb = jax.random.split(key, 3)

    x = jax.random.normal(kx, (1, CIN, H, W), dtype=jnp.float32)
    weight = 0.1 * jax.random.normal(kw, (CIN, COUT, K, K), dtype=jnp.float32)
    bias = 0.1 * jax.random.normal(kb, (COUT,), dtype=jnp.float32)

    out = conv_transpose_sigmoid(x, weight, bias)
    out = jax.block_until_ready(out)
    assert out.shape == (1, COUT, H * K, W * K), out.shape

    # Pure-JAX reference of the same math (non-overlapping transposed conv).
    ref = jnp.einsum("ij,ckl->cikjl", x[0, 0], weight[0])
    ref = ref + bias[:, None, None, None, None]
    ref = jax.nn.sigmoid(ref).reshape(1, COUT, H * K, W * K)
    assert jnp.allclose(out, ref, atol=1e-5, rtol=1e-5), float(
        jnp.max(jnp.abs(out - ref)))

    print("KERNEL_OK")
</pallas_src>

<mosaic_0001>
module attributes {stable_mosaic.version = 11 : i64} {
  func.func private @main(%arg0: i32) attributes {dimension_semantics = [#tpu.dimension_semantics<core_parallel>], iteration_bounds = array<i64: 2>, tpu.core_type = #tpu.core_type<sc_scalar_subcore>, window_params = []} {
    return
  }
}

module attributes {stable_mosaic.version = 11 : i64} {
  func.func private @main(%arg0: i32) attributes {dimension_semantics = [#tpu.dimension_semantics<core_parallel>], iteration_bounds = array<i64: 2>, tpu.core_type = #tpu.core_type<sc_scalar_subcore>, window_params = []} {
    return
  }
}

module attributes {stable_mosaic.version = 11 : i64} {
  func.func @_convt_sigmoid_kernel(%arg0: i32, %arg1: i32, %arg2: memref<24x192xf32, #tpu.memory_space<vmem>>, %arg3: memref<32x24x192xf32, #tpu.memory_space<vmem>>, %arg4: memref<32x1x1xf32, #tpu.memory_space<vmem>>, %arg5: memref<32x24x192xf32, #tpu.memory_space<vmem>>) attributes {dimension_semantics = [#tpu.dimension_semantics<parallel>, #tpu.dimension_semantics<parallel>], iteration_bounds = array<i64: 8, 8>, scalar_prefetch = 0 : i64, scratch_operands = 0 : i64, tpu.core_type = #tpu.core_type<tc>, window_params = [{transform_indices = @transform_0, window_bounds = array<i64: 24, 192>}, {transform_indices = @transform_1, window_bounds = array<i64: 32, 24, 192>}, {transform_indices = @transform_2, window_bounds = array<i64: 32, 1, 1>}, {transform_indices = @transform_3, window_bounds = array<i64: 32, 24, 192>}]} {
    %c0 = arith.constant 0 : index
    %c0_0 = arith.constant 0 : index
    %0 = vector.load %arg2[%c0, %c0_0] : memref<24x192xf32, #tpu.memory_space<vmem>>, vector<24x192xf32>
    %1 = vector.shape_cast %0 : vector<24x192xf32> to vector<1x24x192xf32>
    %c0_1 = arith.constant 0 : index
    %c0_2 = arith.constant 0 : index
    %c0_3 = arith.constant 0 : index
    %2 = vector.load %arg3[%c0_1, %c0_2, %c0_3] : memref<32x24x192xf32, #tpu.memory_space<vmem>>, vector<32x24x192xf32>
    %3 = vector.broadcast %1 : vector<1x24x192xf32> to vector<32x24x192xf32>
    %4 = arith.mulf %3, %2 : vector<32x24x192xf32>
    %c0_4 = arith.constant 0 : index
    %c0_5 = arith.constant 0 : index
    %c0_6 = arith.constant 0 : index
    %5 = vector.load %arg4[%c0_4, %c0_5, %c0_6] : memref<32x1x1xf32, #tpu.memory_space<vmem>>, vector<32x1x1xf32>
    %6 = vector.broadcast %5 : vector<32x1x1xf32> to vector<32x24x192xf32>
    %7 = arith.addf %4, %6 : vector<32x24x192xf32>
    %cst = arith.constant 5.000000e-01 : f32
    %8 = vector.broadcast %cst : f32 to vector<32x24x192xf32>
    %9 = arith.mulf %8, %7 : vector<32x24x192xf32>
    %10 = math.tanh %9 : vector<32x24x192xf32>
    %cst_7 = arith.constant 5.000000e-01 : f32
    %11 = vector.broadcast %cst_7 : f32 to vector<32x24x192xf32>
    %12 = arith.mulf %11, %10 : vector<32x24x192xf32>
    %cst_8 = arith.constant 5.000000e-01 : f32
    %13 = vector.broadcast %cst_8 : f32 to vector<32x24x192xf32>
    %14 = arith.addf %12, %13 : vector<32x24x192xf32>
    %c0_9 = arith.constant 0 : index
    %c0_10 = arith.constant 0 : index
    %c0_11 = arith.constant 0 : index
    %15 = vector.load %arg5[%c0_9, %c0_10, %c0_11] : memref<32x24x192xf32, #tpu.memory_space<vmem>>, vector<32x24x192xf32>
    tpu.vector_store %arg5[%c0_9, %c0_10, %c0_11], %14 {strides = array<i32>} : memref<32x24x192xf32, #tpu.memory_space<vmem>>, vector<32x24x192xf32>,
    return
  }
  func.func @transform_0(%arg0: i32, %arg1: i32) -> (i32, i32) {
    %c0_i32 = arith.constant 0 : i32
    %c0_i32_0 = arith.constant 0 : i32
    return %arg1, %c0_i32 : i32, i32
  }
  func.func @transform_1(%arg0: i32, %arg1: i32) -> (i32, i32, i32) {
    %c0_i32 = arith.constant 0 : i32
    %c0_i32_0 = arith.constant 0 : i32
    %c0_i32_1 = arith.constant 0 : i32
    return %arg0, %c0_i32, %c0_i32_0 : i32, i32, i32
  }
  func.func @transform_2(%arg0: i32, %arg1: i32) -> (i32, i32, i32) {
    %c0_i32 = arith.constant 0 : i32
    %c0_i32_0 = arith.constant 0 : i32
    %c0_i32_1 = arith.constant 0 : i32
    return %arg0, %c0_i32, %c0_i32_0 : i32, i32, i32
  }
  func.func @transform_3(%arg0: i32, %arg1: i32) -> (i32, i32, i32) {
    %c0_i32 = arith.constant 0 : i32
    %c0_i32_0 = arith.constant 0 : i32
    return %arg0, %arg1, %c0_i32 : i32, i32, i32
  }
}

</mosaic_0001>

<bundles_post_ra>
// kernel: tile.7
= control target key start
LH: loop header
LB: loop body
LE: loop exit
PB: predicated region body
PF: predicated region fallthrough
CT: control target
= control target key end

     0   :  { %s2700_s6 = smov 0   ;;  %s3585_s0 = inlined_call_operand.vmem [shape: f32[256,2,12,16,12], index: 0, kind: input, shape index: {}]   ;;  %s3586_s1 = inlined_call_operand.vmem [shape: f32[256,24,192], index: 1, kind: output, shape index: {}]  }
   0x1 LB: > { %s1806_s7 = sadd.s32 4294967295, %s2688_s6   ;;  %p1809_p0 = scmp.ge.s32.totalorder %s2688_s6, 1  ;;  %s2688_s6 = sphi %s2700_s6, %s7_s6  }
   0x2   : > { %p28_p1 = scmp.lt.s32.totalorder %s2688_s6, 5 }
   0x4   : > { %p29_p2 = pnand %p1809_p0, %p28_p1 }
   0x5   : > { %s42_s8 = smul.u32 (!%p29_p2), 2304, %s1806_s7 }
   0x6   : > { %32 = sbr.rel (%p29_p2) target bundleno = 256 (0x100), region = 20 }
   0x7   : > { %s47_s9 = smul.u32 (!%p29_p2), 3072, %s1806_s7  ;;  %p43_p3 = scmp.lt.s32.totalorder (!%p29_p2), %s42_s8, 9215 }
   0x9   : > { %p48_p4 = scmp.lt.s32.totalorder (!%p29_p2), %s47_s9, 12287 }
   0xd   : > { %s3588_s8 = smov (!%p43_p3, %s42_s8), 9215  ;;  %s3590_s9 = smov (!%p48_p4, %s47_s9), 12287 }
   0xe   : > { %s2711_s12 = scalar_lea.vmem %s3586_s1, %s3588_s8  ;;  %s2716_s15 = scalar_lea.vmem %s3585_s0, %s3590_s9 }
   0xf   : > { %v54_v0 = vld [vmem:[%s2716_s15] sm:$0xff]   ;;  %v1810_v1 = vld [vmem:[%s2716_s15 + $0x8] sm:$0xff]   ;;  %v1812_v2 = vld [vmem:[%s2716_s15 + $0x10] sm:$0xf]  }
  0x10   : > { %55 = vst [vmem:[%s2711_s12] sm:$0xff] %v54_v0   ;;  %1811 = vst [vmem:[%s2711_s12 + $0x8] sm:$0xff] %v1810_v1   ;;  %v1814_v3 = vld [vmem:[%s2716_s15 + $0x18] sm:$0xf]   ;;  %v1816_v4 = vld [vmem:[%s2716_s15 + $0x20] sm:$0xff]  }
  0x11   : > { %1813 = vst [vmem:[%s2711_s12 + $0x10] sm:$0xf] %v1812_v2   ;;  %v1819_v5 = vld [vmem:[%s2716_s15 + $0x28] sm:$0xff]   ;;  %1815 = vst [vmem:[%s2711_s12 + $0x18] sm:$0xf] %v1814_v3   ;;  %v1826_v8 = vld [vmem:[%s2716_s15 + $0x40] sm:$0xff]  }
  0x12   : > { %1817 = vst [vmem:[%s2711_s12 + $0x14] sm:$0xf] %v1816_v4   ;;  %1818 = vst [vmem:[%s2711_s12 + $0x1c] sm:$0xf0] %v1816_v4   ;;  %v1822_v6 = vld [vmem:[%s2716_s15 + $0x30] sm:$0xf]  }
  0x13   : > { %1820 = vst [vmem:[%s2711_s12 + $0x1c] sm:$0xf] %v1819_v5   ;;  %1821 = vst [vmem:[%s2711_s12 + $0x24] sm:$0xf0] %v1819_v5   ;;  %v1824_v7 = vld [vmem:[%s2716_s15 + $0x38] sm:$0xf]  }
  0x14   : > { %1823 = vst [vmem:[%s2711_s12 + $0x24] sm:$0xf] %v1822_v6   ;;  %1825 = vst [vmem:[%s2711_s12 + $0x2c] sm:$0xf] %v1824_v7   ;;  %v1828_v9 = vld [vmem:[%s2716_s15 + $0x48] sm:$0xff]   ;;  %v1834_v12 = vld [vmem:[%s2716_s15 + $0x60] sm:$0xff]  }
  0x15   : > { %1827 = vst [vmem:[%s2711_s12 + $0x30] sm:$0xff] %v1826_v8   ;;  %v1830_v10 = vld [vmem:[%s2716_s15 + $0x50] sm:$0xf]   ;;  %v1832_v11 = vld [vmem:[%s2716_s15 + $0x58] sm:$0xf]   ;;  %1829 = vst [vmem:[%s2711_s12 + $0x38] sm:$0xff] %v1828_v9  }
  0x16   : > { %1831 = vst [vmem:[%s2711_s12 + $0x40] sm:$0xf] %v1830_v10   ;;  %1833 = vst [vmem:[%s2711_s12 + $0x48] sm:$0xf] %v1832_v11   ;;  %v1837_v13 = vld [vmem:[%s2716_s15 + $0x68] sm:$0xff]   ;;  %v1844_v16 = vld [vmem:[%s2716_s15 + $0x80] sm:$0xff]  }
  0x17   : > { %v1840_v14 = vld [vmem:[%s2716_s15 + $0x70] sm:$0xf]   ;;  %1835 = vst [vmem:[%s2711_s12 + $0x44] sm:$0xf] %v1834_v12   ;;  %1836 = vst [vmem:[%s2711_s12 + $0x4c] sm:$0xf0] %v1834_v12  }
  0x18   : > { %1838 = vst [vmem:[%s2711_s12 + $0x4c] sm:$0xf] %v1837_v13   ;;  %1839 = vst [vmem:[%s2711_s12 + $0x54] sm:$0xf0] %v1837_v13   ;;  %v1842_v15 = vld [vmem:[%s2716_s15 + $0x78] sm:$0xf]  }
  0x19   : > { %1841 = vst [vmem:[%s2711_s12 + $0x54] sm:$0xf] %v1840_v14   ;;  %v1846_v17 = vld [vmem:[%s2716_s15 + $0x88] sm:$0xff]   ;;  %1843 = vst [vmem:[%s2711_s12 + $0x5c] sm:$0xf] %v1842_v15   ;;  %v1852_v20 = vld [vmem:[%s2716_s15 + $0xa0] sm:$0xff]  }
  0x1a   : > { %1845 = vst [vmem:[%s2711_s12 + $0x60] sm:$0xff] %v1844_v16   ;;  %1847 = vst [vmem:[%s2711_s12 + $0x68] sm:$0xff] %v1846_v17   ;;  %v1848_v18 = vld [vmem:[%s2716_s15 + $0x90] sm:$0xf]   ;;  %v1850_v19 = vld [vmem:[%s2716_s15 + $0x98] sm:$0xf]  }
  0x1b   : > { %1849 = vst [vmem:[%s2711_s12 + $0x70] sm:$0xf] %v1848_v18   ;;  %1851 = vst [vmem:[%s2711_s12 + $0x78] sm:$0xf] %v1850_v19   ;;  %v1855_v21 = vld [vmem:[%s2716_s15 + $0xa8] sm:$0xff]   ;;  %v1862_v24 = vld [vmem:[%s2716_s15 + $0xc0] sm:$0xff]  }
  0x1c   : > { %1853 = vst [vmem:[%s2711_s12 + $0x74] sm:$0xf] %v1852_v20   ;;  %1854 = vst [vmem:[%s2711_s12 + $0x7c] sm:$0xf0] %v1852_v20   ;;  %v1858_v22 = vld [vmem:[%s2716_s15 + $0xb0] sm:$0xf]  }
  0x1d   : > { %v1860_v23 = vld [vmem:[%s2716_s15 + $0xb8] sm:$0xf]   ;;  %1856 = vst [vmem:[%s2711_s12 + $0x7c] sm:$0xf] %v1855_v21   ;;  %1857 = vst [vmem:[%s2711_s12 + $0x84] sm:$0xf0] %v1855_v21  }
  0x1e   : > { %1859 = vst [vmem:[%s2711_s12 + $0x84] sm:$0xf] %v1858_v22   ;;  %1861 = vst [vmem:[%s2711_s12 + $0x8c] sm:$0xf] %v1860_v23   ;;  %v1864_v25 = vld [vmem:[%s2716_s15 + $0xc8] sm:$0xff]   ;;  %v1870_v28 = vld [vmem:[%s2716_s15 + $0xe0] sm:$0xff]  }
  0x1f   : > { %v1866_v26 = vld [vmem:[%s2716_s15 + $0xd0] sm:$0xf]   ;;  %1863 = vst [vmem:[%s2711_s12 + $0x90] sm:$0xff] %v1862_v24   ;;  %1865 = vst [vmem:[%s2711_s12 + $0x98] sm:$0xff] %v1864_v25   ;;  %v1868_v27 = vld [vmem:[%s2716_s15 + $0xd8] sm:$0xf]  }
  0x20   : > { %1867 = vst [vmem:[%s2711_s12 + $0xa0] sm:$0xf] %v1866_v26   ;;  %v1873_v29 = vld [vmem:[%s2716_s15 + $0xe8] sm:$0xff]   ;;  %1869 = vst [vmem:[%s2711_s12 + $0xa8] sm:$0xf] %v1868_v27   ;;  %v1880_v32 = vld [vmem:[%s2716_s15 + $0x100] sm:$0xff]  }
  0x21   : > { %1871 = vst [vmem:[%s2711_s12 + $0xa4] sm:$0xf] %v1870_v28   ;;  %1872 = vst [vmem:[%s2711_s12 + $0xac] sm:$0xf0] %v1870_v28   ;;  %v1876_v30 = vld [vmem:[%s2716_s15 + $0xf0] sm:$0xf]  }
  0x22   : > { %1874 = vst [vmem:[%s2711_s12 + $0xac] sm:$0xf] %v1873_v29   ;;  %1875 = vst [vmem:[%s2711_s12 + $0xb4] sm:$0xf0] %v1873_v29   ;;  %v1878_v31 = vld [vmem:[%s2716_s15 + $0xf8] sm:$0xf]  }
  0x23   : > { %1877 = vst [vmem:[%s2711_s12 + $0xb4] sm:$0xf] %v1876_v30   ;;  %1879 = vst [vmem:[%s2711_s12 + $0xbc] sm:$0xf] %v1878_v31   ;;  %v1882_v33 = vld [vmem:[%s2716_s15 + $0x108] sm:$0xff]   ;;  %v1888_v36 = vld [vmem:[%s2716_s15 + $0x120] sm:$0xff]  }
  0x24   : > { %1881 = vst [vmem:[%s2711_s12 + $0xc0] sm:$0xff] %v1880_v32   ;;  %v1884_v34 = vld [vmem:[%s2716_s15 + $0x110] sm:$0xf]   ;;  %v1886_v35 = vld [vmem:[%s2716_s15 + $0x118] sm:$0xf]   ;;  %1883 = vst [vmem:[%s2711_s12 + $0xc8] sm:$0xff] %v1882_v33  }
  0x25   : > { %1885 = vst [vmem:[%s2711_s12 + $0xd0] sm:$0xf] %v1884_v34   ;;  %1887 = vst [vmem:[%s2711_s12 + $0xd8] sm:$0xf] %v1886_v35   ;;  %v1891_v37 = vld [vmem:[%s2716_s15 + $0x128] sm:$0xff]   ;;  %v1898_v40 = vld [vmem:[%s2716_s15 + $0x140] sm:$0xff]  }
  0x26   : > { %v1894_v38 = vld [vmem:[%s2716_s15 + $0x130] sm:$0xf]   ;;  %1889 = vst [vmem:[%s2711_s12 + $0xd4] sm:$0xf] %v1888_v36   ;;  %1890 = vst [vmem:[%s2711_s12 + $0xdc] sm:$0xf0] %v1888_v36  }
  0x27   : > { %1892 = vst [vmem:[%s2711_s12 + $0xdc] sm:$0xf] %v1891_v37   ;;  %1893 = vst [vmem:[%s2711_s12 + $0xe4] sm:$0xf0] %v1891_v37   ;;  %v1896_v39 = vld [vmem:[%s2716_s15 + $0x138] sm:$0xf]  }
  0x28   : > { %1895 = vst [vmem:[%s2711_s12 + $0xe4] sm:$0xf] %v1894_v38   ;;  %v1900_v41 = vld [vmem:[%s2716_s15 + $0x148] sm:$0xff]   ;;  %1897 = vst [vmem:[%s2711_s12 + $0xec] sm:$0xf] %v1896_v39   ;;  %v1906_v44 = vld [vmem:[%s2716_s15 + $0x160] sm:$0xff]  }
  0x29   : > { %1899 = vst [vmem:[%s2711_s12 + $0xf0] sm:$0xff] %v1898_v40   ;;  %1901 = vst [vmem:[%s2711_s12 + $0xf8] sm:$0xff] %v1900_v41   ;;  %v1902_v42 = vld [vmem:[%s2716_s15 + $0x150] sm:$0xf]   ;;  %v1904_v43 = vld [vmem:[%s2716_s15 + $0x158] sm:$0xf]  }
  0x2a   : > { %1903 = vst [vmem:[%s2711_s12 + $0x100] sm:$0xf] %v1902_v42   ;;  %1905 = vst [vmem:[%s2711_s12 + $0x108] sm:$0xf] %v1904_v43   ;;  %v1909_v45 = vld [vmem:[%s2716_s15 + $0x168] sm:$0xff]   ;;  %v1916_v48 = vld [vmem:[%s2716_s15 + $0x180] sm:$0xff]  }
  0x2b   : > { %1907 = vst [vmem:[%s2711_s12 + $0x104] sm:$0xf] %v1906_v44   ;;  %1908 = vst [vmem:[%s2711_s12 + $0x10c] sm:$0xf0] %v1906_v44   ;;  %v1912_v46 = vld [vmem:[%s2716_s15 + $0x170] sm:$0xf]  }
  0x2c   : > { %v1914_v47 = vld [vmem:[%s2716_s15 + $0x178] sm:$0xf]   ;;  %1910 = vst [vmem:[%s2711_s12 + $0x10c] sm:$0xf] %v1909_v45   ;;  %1911 = vst [vmem:[%s2711_s12 + $0x114] sm:$0xf0] %v1909_v45  }
  0x2d   : > { %1913 = vst [vmem:[%s2711_s12 + $0x114] sm:$0xf] %v1912_v46   ;;  %1915 = vst [vmem:[%s2711_s12 + $0x11c] sm:$0xf] %v1914_v47   ;;  %v1918_v49 = vld [vmem:[%s2716_s15 + $0x188] sm:$0xff]   ;;  %v1924_v52 = vld [vmem:[%s2716_s15 + $0x1a0] sm:$0xff]  }
  0x2e   : > { %v1920_v50 = vld [vmem:[%s2716_s15 + $0x190] sm:$0xf]   ;;  %1917 = vst [vmem:[%s2711_s12 + $0x120] sm:$0xff] %v1916_v48   ;;  %1919 = vst [vmem:[%s2711_s12 + $0x128] sm:$0xff] %v1918_v49   ;;  %v1922_v51 = vld [vmem:[%s2716_s15 + $0x198] sm:$0xf]  }
  0x2f   : > { %1921 = vst [vmem:[%s2711_s12 + $0x130] sm:$0xf] %v1920_v50   ;;  %v1927_v53 = vld [vmem:[%s2716_s15 + $0x1a8] sm:$0xff]   ;;  %1923 = vst [vmem:[%s2711_s12 + $0x138] sm:$0xf] %v1922_v51   ;;  %v1934_v56 = vld [vmem:[%s2716_s15 + $0x1c0] sm:$0xff]  }
  0x30   : > { %1925 = vst [vmem:[%s2711_s12 + $0x134] sm:$0xf] %v1924_v52   ;;  %1926 = vst [vmem:[%s2711_s12 + $0x13c] sm:$0xf0] %v1924_v52   ;;  %v1930_v54 = vld [vmem:[%s2716_s15 + $0x1b0] sm:$0xf]  }
  0x31   : > { %1928 = vst [vmem:[%s2711_s12 + $0x13c] sm:$0xf] %v1927_v53   ;;  %1929 = vst [vmem:[%s2711_s12 + $0x144] sm:$0xf0] %v1927_v53   ;;  %v1932_v55 = vld [vmem:[%s2716_s15 + $0x1b8] sm:$0xf]  }
  0x32   : > { %1931 = vst [vmem:[%s2711_s12 + $0x144] sm:$0xf] %v1930_v54   ;;  %1933 = vst [vmem:[%s2711_s12 + $0x14c] sm:$0xf] %v1932_v55   ;;  %v1936_v57 = vld [vmem:[%s2716_s15 + $0x1c8] sm:$0xff]   ;;  %v1942_v60 = vld [vmem:[%s2716_s15 + $0x1e0] sm:$0xff]  }
  0x33   : > { %1935 = vst [vmem:[%s2711_s12 + $0x150] sm:$0xff] %v1934_v56   ;;  %v1938_v58 = vld [vmem:[%s2716_s15 + $0x1d0] sm:$0xf]   ;;  %v1940_v59 = vld [vmem:[%s2716_s15 + $0x1d8] sm:$0xf]   ;;  %1937 = vst [vmem:[%s2711_s12 + $0x158] sm:$0xff] %v1936_v57  }
  0x34   : > { %1939 = vst [vmem:[%s2711_s12 + $0x160] sm:$0xf] %v1938_v58   ;;  %1941 = vst [vmem:[%s2711_s12 + $0x168] sm:$0xf] %v1940_v59   ;;  %v1945_v61 = vld [vmem:[%s2716_s15 + $0x1e8] sm:$0xff]   ;;  %v1952_v0 = vld [vmem:[%s2716_s15 + $0x200] sm:$0xff]  }
  0x35   : > { %v1948_v62 = vld [vmem:[%s2716_s15 + $0x1f0] sm:$0xf]   ;;  %1943 = vst [vmem:[%s2711_s12 + $0x164] sm:$0xf] %v1942_v60   ;;  %1944 = vst [vmem:[%s2711_s12 + $0x16c] sm:$0xf0] %v1942_v60  }
  0x36   : > { %1946 = vst [vmem:[%s2711_s12 + $0x16c] sm:$0xf] %v1945_v61   ;;  %1947 = vst [vmem:[%s2711_s12 + $0x174] sm:$0xf0] %v1945_v61   ;;  %v1950_v63 = vld [vmem:[%s2716_s15 + $0x1f8] sm:$0xf]  }
  0x37   : > { %1949 = vst [vmem:[%s2711_s12 + $0x174] sm:$0xf] %v1948_v62   ;;  %v1954_v1 = vld [vmem:[%s2716_s15 + $0x208] sm:$0xff]   ;;  %1951 = vst [vmem:[%s2711_s12 + $0x17c] sm:$0xf] %v1950_v63   ;;  %v1960_v4 = vld [vmem:[%s2716_s15 + $0x220] sm:$0xff]  }
  0x38   : > { %1953 = vst [vmem:[%s2711_s12 + $0x180] sm:$0xff] %v1952_v0   ;;  %1955 = vst [vmem:[%s2711_s12 + $0x188] sm:$0xff] %v1954_v1   ;;  %v1956_v2 = vld [vmem:[%s2716_s15 + $0x210] sm:$0xf]   ;;  %v1958_v3 = vld [vmem:[%s2716_s15 + $0x218] sm:$0xf]  }
  0x39   : > { %1957 = vst [vmem:[%s2711_s12 + $0x190] sm:$0xf] %v1956_v2   ;;  %1959 = vst [vmem:[%s2711_s12 + $0x198] sm:$0xf] %v1958_v3   ;;  %v1963_v5 = vld [vmem:[%s2716_s15 + $0x228] sm:$0xff]   ;;  %v1970_v8 = vld [vmem:[%s2716_s15 + $0x240] sm:$0xff]  }
  0x3a   : > { %1961 = vst [vmem:[%s2711_s12 + $0x194] sm:$0xf] %v1960_v4   ;;  %1962 = vst [vmem:[%s2711_s12 + $0x19c] sm:$0xf0] %v1960_v4   ;;  %v1966_v6 = vld [vmem:[%s2716_s15 + $0x230] sm:$0xf]  }
  0x3b   : > { %v1968_v7 = vld [vmem:[%s2716_s15 + $0x238] sm:$0xf]   ;;  %1964 = vst [vmem:[%s2711_s12 + $0x19c] sm:$0xf] %v1963_v5   ;;  %1965 = vst [vmem:[%s2711_s12 + $0x1a4] sm:$0xf0] %v1963_v5  }
  0x3c   : > { %1967 = vst [vmem:[%s2711_s12 + $0x1a4] sm:$0xf] %v1966_v6   ;;  %1969 = vst [vmem:[%s2711_s12 + $0x1ac] sm:$0xf] %v1968_v7   ;;  %v1972_v9 = vld [vmem:[%s2716_s15 + $0x248] sm:$0xff]   ;;  %v1978_v12 = vld [vmem:[%s2716_s15 + $0x260] sm:$0xff]  }
  0x3d   : > { %v1974_v10 = vld [vmem:[%s2716_s15 + $0x250] sm:$0xf]   ;;  %1971 = vst [vmem:[%s2711_s12 + $0x1b0] sm:$0xff] %v1970_v8   ;;  %1973 = vst [vmem:[%s2711_s12 + $0x1b8] sm:$0xff] %v1972_v9   ;;  %v1976_v11 = vld [vmem:[%s2716_s15 + $0x258] sm:$0xf]  }
  0x3e   : > { %1975 = vst [vmem:[%s2711_s12 + $0x1c0] sm:$0xf] %v1974_v10   ;;  %v1981_v13 = vld [vmem:[%s2716_s15 + $0x268] sm:$0xff]   ;;  %1977 = vst [vmem:[%s2711_s12 + $0x1c8] sm:$0xf] %v1976_v11   ;;  %v1988_v16 = vld [vmem:[%s2716_s15 + $0x280] sm:$0xff]  }
  0x3f   : > { %1979 = vst [vmem:[%s2711_s12 + $0x1c4] sm:$0xf] %v1978_v12   ;;  %1980 = vst [vmem:[%s2711_s12 + $0x1cc] sm:$0xf0] %v1978_v12   ;;  %v1984_v14 = vld [vmem:[%s2716_s15 + $0x270] sm:$0xf]  }
  0x40   : > { %1982 = vst [vmem:[%s2711_s12 + $0x1cc] sm:$0xf] %v1981_v13   ;;  %1983 = vst [vmem:[%s2711_s12 + $0x1d4] sm:$0xf0] %v1981_v13   ;;  %v1986_v15 = vld [vmem:[%s2716_s15 + $0x278] sm:$0xf]  }
  0x41   : > { %1985 = vst [vmem:[%s2711_s12 + $0x1d4] sm:$0xf] %v1984_v14   ;;  %1987 = vst [vmem:[%s2711_s12 + $0x1dc] sm:$0xf] %v1986_v15   ;;  %v1990_v17 = vld [vmem:[%s2716_s15 + $0x288] sm:$0xff]   ;;  %v1996_v20 = vld [vmem:[%s2716_s15 + $0x2a0] sm:$0xff]  }
  0x42   : > { %1989 = vst [vmem:[%s2711_s12 + $0x1e0] sm:$0xff] %v1988_v16   ;;  %v1992_v18 = vld [vmem:[%s2716_s15 + $0x290] sm:$0xf]   ;;  %v1994_v19 = vld [vmem:[%s2716_s15 + $0x298] sm:$0xf]   ;;  %1991 = vst [vmem:[%s2711_s12 + $0x1e8] sm:$0xff] %v1990_v17  }
  0x43   : > { %1993 = vst [vmem:[%s2711_s12 + $0x1f0] sm:$0xf] %v1992_v18   ;;  %1995 = vst [vmem:[%s2711_s12 + $0x1f8] sm:$0xf] %v1994_v19   ;;  %v1999_v21 = vld [vmem:[%s2716_s15 + $0x2a8] sm:$0xff]   ;;  %v2006_v24 = vld [vmem:[%s2716_s15 + $0x2c0] sm:$0xff]  }
  0x44   : > { %v2002_v22 = vld [vmem:[%s2716_s15 + $0x2b0] sm:$0xf]   ;;  %1997 = vst [vmem:[%s2711_s12 + $0x1f4] sm:$0xf] %v1996_v20   ;;  %1998 = vst [vmem:[%s2711_s12 + $0x1fc] sm:$0xf0] %v1996_v20  }
  0x45   : > { %2000 = vst [vmem:[%s2711_s12 + $0x1fc] sm:$0xf] %v1999_v21   ;;  %2001 = vst [vmem:[%s2711_s12 + $0x204] sm:$0xf0] %v1999_v21   ;;  %v2004_v23 = vld [vmem:[%s2716_s15 + $0x2b8] sm:$0xf]  }
  0x46   : > { %2003 = vst [vmem:[%s2711_s12 + $0x204] sm:$0xf] %v2002_v22   ;;  %v2008_v25 = vld [vmem:[%s2716_s15 + $0x2c8] sm:$0xff]   ;;  %2005 = vst [vmem:[%s2711_s12 + $0x20c] sm:$0xf] %v2004_v23   ;;  %v2014_v28 = vld [vmem:[%s2716_s15 + $0x2e0] sm:$0xff]  }
  0x47   : > { %2007 = vst [vmem:[%s2711_s12 + $0x210] sm:$0xff] %v2006_v24   ;;  %2009 = vst [vmem:[%s2711_s12 + $0x218] sm:$0xff] %v2008_v25   ;;  %v2010_v26 = vld [vmem:[%s2716_s15 + $0x2d0] sm:$0xf]   ;;  %v2012_v27 = vld [vmem:[%s2716_s15 + $0x2d8] sm:$0xf]  }
  0x48   : > { %2011 = vst [vmem:[%s2711_s12 + $0x220] sm:$0xf] %v2010_v26   ;;  %2013 = vst [vmem:[%s2711_s12 + $0x228] sm:$0xf] %v2012_v27   ;;  %v2017_v29 = vld [vmem:[%s2716_s15 + $0x2e8] sm:$0xff]   ;;  %v2024_v32 = vld [vmem:[%s2716_s15 + $0x300] sm:$0xff]  }
  0x49   : > { %2015 = vst [vmem:[%s2711_s12 + $0x224] sm:$0xf] %v2014_v28   ;;  %2016 = vst [vmem:[%s2711_s12 + $0x22c] sm:$0xf0] %v2014_v28   ;;  %v2020_v30 = vld [vmem:[%s2716_s15 + $0x2f0] sm:$0xf]  }
  0x4a   : > { %v2022_v31 = vld [vmem:[%s2716_s15 + $0x2f8] sm:$0xf]   ;;  %2018 = vst [vmem:[%s2711_s12 + $0x22c] sm:$0xf] %v2017_v29   ;;  %2019 = vst [vmem:[%s2711_s12 + $0x234] sm:$0xf0] %v2017_v29  }
  0x4b   : > { %2021 = vst [vmem:[%s2711_s12 + $0x234] sm:$0xf] %v2020_v30   ;;  %2023 = vst [vmem:[%s2711_s12 + $0x23c] sm:$0xf] %v2022_v31   ;;  %v2026_v33 = vld [vmem:[%s2716_s15 + $0x308] sm:$0xff]   ;;  %v2032_v36 = vld [vmem:[%s2716_s15 + $0x320] sm:$0xff]  }
  0x4c   : > { %v2028_v34 = vld [vmem:[%s2716_s15 + $0x310] sm:$0xf]   ;;  %2025 = vst [vmem:[%s2711_s12 + $0x240] sm:$0xff] %v2024_v32   ;;  %2027 = vst [vmem:[%s2711_s12 + $0x248] sm:$0xff] %v2026_v33   ;;  %v2030_v35 = vld [vmem:[%s2716_s15 + $0x318] sm:$0xf]  }
  0x4d   : > { %2029 = vst [vmem:[%s2711_s12 + $0x250] sm:$0xf] %v2028_v34   ;;  %v2035_v37 = vld [vmem:[%s2716_s15 + $0x328] sm:$0xff]   ;;  %2031 = vst [vmem:[%s2711_s12 + $0x258] sm:$0xf] %v2030_v35   ;;  %v2042_v40 = vld [vmem:[%s2716_s15 + $0x340] sm:$0xff]  }
  0x4e   : > { %2033 = vst [vmem:[%s2711_s12 + $0x254] sm:$0xf] %v2032_v36   ;;  %2034 = vst [vmem:[%s2711_s12 + $0x25c] sm:$0xf0] %v2032_v36   ;;  %v2038_v38 = vld [vmem:[%s2716_s15 + $0x330] sm:$0xf]  }
  0x4f   : > { %2036 = vst [vmem:[%s2711_s12 + $0x25c] sm:$0xf] %v2035_v37   ;;  %2037 = vst [vmem:[%s2711_s12 + $0x264] sm:$0xf0] %v2035_v37   ;;  %v2040_v39 = vld [vmem:[%s2716_s15 + $0x338] sm:$0xf]  }
  0x50   : > { %2039 = vst [vmem:[%s2711_s12 + $0x264] sm:$0xf] %v2038_v38   ;;  %2041 = vst [vmem:[%s2711_s12 + $0x26c] sm:$0xf] %v2040_v39   ;;  %v2044_v41 = vld [vmem:[%s2716_s15 + $0x348] sm:$0xff]   ;;  %v2050_v44 = vld [vmem:[%s2716_s15 + $0x360] sm:$0xff]  }
  0x51   : > { %2043 = vst [vmem:[%s2711_s12 + $0x270] sm:$0xff] %v2042_v40   ;;  %v2046_v42 = vld [vmem:[%s2716_s15 + $0x350] sm:$0xf]   ;;  %v2048_v43 = vld [vmem:[%s2716_s15 + $0x358] sm:$0xf]   ;;  %2045 = vst [vmem:[%s2711_s12 + $0x278] sm:$0xff] %v2044_v41  }
  0x52   : > { %2047 = vst [vmem:[%s2711_s12 + $0x280] sm:$0xf] %v2046_v42   ;;  %2049 = vst [vmem:[%s2711_s12 + $0x288] sm:$0xf] %v2048_v43   ;;  %v2053_v45 = vld [vmem:[%s2716_s15 + $0x368] sm:$0xff]   ;;  %v2060_v48 = vld [vmem:[%s2716_s15 + $0x380] sm:$0xff]  }
  0x53   : > { %v2056_v46 = vld [vmem:[%s2716_s15 + $0x370] sm:$0xf]   ;;  %2051 = vst [vmem:[%s2711_s12 + $0x284] sm:$0xf] %v2050_v44   ;;  %2052 = vst [vmem:[%s2711_s12 + $0x28c] sm:$0xf0] %v2050_v44  }
  0x54   : > { %2054 = vst [vmem:[%s2711_s12 + $0x28c] sm:$0xf] %v2053_v45   ;;  %2055 = vst [vmem:[%s2711_s12 + $0x294] sm:$0xf0] %v2053_v45   ;;  %v2058_v47 = vld [vmem:[%s2716_s15 + $0x378] sm:$0xf]  }
  0x55   : > { %2057 = vst [vmem:[%s2711_s12 + $0x294] sm:$0xf] %v2056_v46   ;;  %v2062_v49 = vld [vmem:[%s2716_s15 + $0x388] sm:$0xff]   ;;  %2059 = vst [vmem:[%s2711_s12 + $0x29c] sm:$0xf] %v2058_v47   ;;  %v2068_v52 = vld [vmem:[%s2716_s15 + $0x3a0] sm:$0xff]  }
  0x56   : > { %2061 = vst [vmem:[%s2711_s12 + $0x2a0] sm:$0xff] %v2060_v48   ;;  %2063 = vst [vmem:[%s2711_s12 + $0x2a8] sm:$0xff] %v2062_v49   ;;  %v2064_v50 = vld [vmem:[%s2716_s15 + $0x390] sm:$0xf]   ;;  %v2066_v51 = vld [vmem:[%s2716_s15 + $0x398] sm:$0xf]  }
  0x57   : > { %2065 = vst [vmem:[%s2711_s12 + $0x2b0] sm:$0xf] %v2064_v50   ;;  %2067 = vst [vmem:[%s2711_s12 + $0x2b8] sm:$0xf] %v2066_v51   ;;  %v2071_v53 = vld [vmem:[%s2716_s15 + $0x3a8] sm:$0xff]   ;;  %v2078_v56 = vld [vmem:[%s2716_s15 + $0x3c0] sm:$0xff]  }
  0x58   : > { %2069 = vst [vmem:[%s2711_s12 + $0x2b4] sm:$0xf] %v2068_v52   ;;  %2070 = vst [vmem:[%s2711_s12 + $0x2bc] sm:$0xf0] %v2068_v52   ;;  %v2074_v54 = vld [vmem:[%s2716_s15 + $0x3b0] sm:$0xf]  }
  0x59   : > { %v2076_v55 = vld [vmem:[%s2716_s15 + $0x3b8] sm:$0xf]   ;;  %2072 = vst [vmem:[%s2711_s12 + $0x2bc] sm:$0xf] %v2071_v53   ;;  %2073 = vst [vmem:[%s2711_s12 + $0x2c4] sm:$0xf0] %v2071_v53  }
  0x5a   : > { %2075 = vst [vmem:[%s2711_s12 + $0x2c4] sm:$0xf] %v2074_v54   ;;  %2077 = vst [vmem:[%s2711_s12 + $0x2cc] sm:$0xf] %v2076_v55   ;;  %v2080_v57 = vld [vmem:[%s2716_s15 + $0x3c8] sm:$0xff]   ;;  %v2086_v60 = vld [vmem:[%s2716_s15 + $0x3e0] sm:$0xff]  }
  0x5b   : > { %v2082_v58 = vld [vmem:[%s2716_s15 + $0x3d0] sm:$0xf]   ;;  %2079 = vst [vmem:[%s2711_s12 + $0x2d0] sm:$0xff] %v2078_v56   ;;  %2081 = vst [vmem:[%s2711_s12 + $0x2d8] sm:$0xff] %v2080_v57   ;;  %v2084_v59 = vld [vmem:[%s2716_s15 + $0x3d8] sm:$0xf]  }
  0x5c   : > { %2083 = vst [vmem:[%s2711_s12 + $0x2e0] sm:$0xf] %v2082_v58   ;;  %v2089_v61 = vld [vmem:[%s2716_s15 + $0x3e8] sm:$0xff]   ;;  %2085 = vst [vmem:[%s2711_s12 + $0x2e8] sm:$0xf] %v2084_v59   ;;  %v2096_v0 = vld [vmem:[%s2716_s15 + $0x400] sm:$0xff]  }
  0x5d   : > { %2087 = vst [vmem:[%s2711_s12 + $0x2e4] sm:$0xf] %v2086_v60   ;;  %2088 = vst [vmem:[%s2711_s12 + $0x2ec] sm:$0xf0] %v2086_v60   ;;  %v2092_v62 = vld [vmem:[%s2716_s15 + $0x3f0] sm:$0xf]  }
  0x5e   : > { %2090 = vst [vmem:[%s2711_s12 + $0x2ec] sm:$0xf] %v2089_v61   ;;  %2091 = vst [vmem:[%s2711_s12 + $0x2f4] sm:$0xf0] %v2089_v61   ;;  %v2094_v63 = vld [vmem:[%s2716_s15 + $0x3f8] sm:$0xf]  }
  0x5f   : > { %2093 = vst [vmem:[%s2711_s12 + $0x2f4] sm:$0xf] %v2092_v62   ;;  %2095 = vst [vmem:[%s2711_s12 + $0x2fc] sm:$0xf] %v2094_v63   ;;  %v2098_v1 = vld [vmem:[%s2716_s15 + $0x408] sm:$0xff]   ;;  %v2104_v4 = vld [vmem:[%s2716_s15 + $0x420] sm:$0xff]  }
  0x60   : > { %2097 = vst [vmem:[%s2711_s12 + $0x300] sm:$0xff] %v2096_v0   ;;  %v2100_v2 = vld [vmem:[%s2716_s15 + $0x410] sm:$0xf]   ;;  %v2102_v3 = vld [vmem:[%s2716_s15 + $0x418] sm:$0xf]   ;;  %2099 = vst [vmem:[%s2711_s12 + $0x308] sm:$0xff] %v2098_v1  }
  0x61   : > { %2101 = vst [vmem:[%s2711_s12 + $0x310] sm:$0xf] %v2100_v2   ;;  %2103 = vst [vmem:[%s2711_s12 + $0x318] sm:$0xf] %v2102_v3   ;;  %v2107_v5 = vld [vmem:[%s2716_s15 + $0x428] sm:$0xff]   ;;  %v2114_v8 = vld [vmem:[%s2716_s15 + $0x440] sm:$0xff]  }
  0x62   : > { %v2110_v6 = vld [vmem:[%s2716_s15 + $0x430] sm:$0xf]   ;;  %2105 = vst [vmem:[%s2711_s12 + $0x314] sm:$0xf] %v2104_v4   ;;  %2106 = vst [vmem:[%s2711_s12 + $0x31c] sm:$0xf0] %v2104_v4  }
  0x63   : > { %2108 = vst [vmem:[%s2711_s12 + $0x31c] sm:$0xf] %v2107_v5   ;;  %2109 = vst [vmem:[%s2711_s12 + $0x324] sm:$0xf0] %v2107_v5   ;;  %v2112_v7 = vld [vmem:[%s2716_s15 + $0x438] sm:$0xf]  }
  0x64   : > { %2111 = vst [vmem:[%s2711_s12 + $0x324] sm:$0xf] %v2110_v6   ;;  %v2116_v9 = vld [vmem:[%s2716_s15 + $0x448] sm:$0xff]   ;;  %2113 = vst [vmem:[%s2711_s12 + $0x32c] sm:$0xf] %v2112_v7   ;;  %v2122_v12 = vld [vmem:[%s2716_s15 + $0x460] sm:$0xff]  }
  0x65   : > { %2115 = vst [vmem:[%s2711_s12 + $0x330] sm:$0xff] %v2114_v8   ;;  %2117 = vst [vmem:[%s2711_s12 + $0x338] sm:$0xff] %v2116_v9   ;;  %v2118_v10 = vld [vmem:[%s2716_s15 + $0x450] sm:$0xf]   ;;  %v2120_v11 = vld [vmem:[%s2716_s15 + $0x458] sm:$0xf]  }
  0x66   : > { %2119 = vst [vmem:[%s2711_s12 + $0x340] sm:$0xf] %v2118_v10   ;;  %2121 = vst [vmem:[%s2711_s12 + $0x348] sm:$0xf] %v2120_v11   ;;  %v2125_v13 = vld [vmem:[%s2716_s15 + $0x468] sm:$0xff]   ;;  %v2132_v16 = vld [vmem:[%s2716_s15 + $0x480] sm:$0xff]  }
  0x67   : > { %2123 = vst [vmem:[%s2711_s12 + $0x344] sm:$0xf] %v2122_v12   ;;  %2124 = vst [vmem:[%s2711_s12 + $0x34c] sm:$0xf0] %v2122_v12   ;;  %v2128_v14 = vld [vmem:[%s2716_s15 + $0x470] sm:$0xf]  }
  0x68   : > { %v2130_v15 = vld [vmem:[%s2716_s15 + $0x478] sm:$0xf]   ;;  %2126 = vst [vmem:[%s2711_s12 + $0x34c] sm:$0xf] %v2125_v13   ;;  %2127 = vst [vmem:[%s2711_s12 + $0x354] sm:$0xf0] %v2125_v13  }
  0x69   : > { %2129 = vst [vmem:[%s2711_s12 + $0x354] sm:$0xf] %v2128_v14   ;;  %2131 = vst [vmem:[%s2711_s12 + $0x35c] sm:$0xf] %v2130_v15   ;;  %v2134_v17 = vld [vmem:[%s2716_s15 + $0x488] sm:$0xff]   ;;  %v2140_v20 = vld [vmem:[%s2716_s15 + $0x4a0] sm:$0xff]  }
  0x6a   : > { %v2136_v18 = vld [vmem:[%s2716_s15 + $0x490] sm:$0xf]   ;;  %2133 = vst [vmem:[%s2711_s12 + $0x360] sm:$0xff] %v2132_v16   ;;  %2135 = vst [vmem:[%s2711_s12 + $0x368] sm:$0xff] %v2134_v17   ;;  %v2138_v19 = vld [vmem:[%s2716_s15 + $0x498] sm:$0xf]  }
  0x6b   : > { %2137 = vst [vmem:[%s2711_s12 + $0x370] sm:$0xf] %v2136_v18   ;;  %v2143_v21 = vld [vmem:[%s2716_s15 + $0x4a8] sm:$0xff]   ;;  %2139 = vst [vmem:[%s2711_s12 + $0x378] sm:$0xf] %v2138_v19   ;;  %v2150_v24 = vld [vmem:[%s2716_s15 + $0x4c0] sm:$0xff]  }
  0x6c   : > { %2141 = vst [vmem:[%s2711_s12 + $0x374] sm:$0xf] %v2140_v20   ;;  %2142 = vst [vmem:[%s2711_s12 + $0x37c] sm:$0xf0] %v2140_v20   ;;  %v2146_v22 = vld [vmem:[%s2716_s15 + $0x4b0] sm:$0xf]  }
  0x6d   : > { %2144 = vst [vmem:[%s2711_s12 + $0x37c] sm:$0xf] %v2143_v21   ;;  %2145 = vst [vmem:[%s2711_s12 + $0x384] sm:$0xf0] %v2143_v21   ;;  %v2148_v23 = vld [vmem:[%s2716_s15 + $0x4b8] sm:$0xf]  }
  0x6e   : > { %2147 = vst [vmem:[%s2711_s12 + $0x384] sm:$0xf] %v2146_v22   ;;  %2149 = vst [vmem:[%s2711_s12 + $0x38c] sm:$0xf] %v2148_v23   ;;  %v2152_v25 = vld [vmem:[%s2716_s15 + $0x4c8] sm:$0xff]   ;;  %v2158_v28 = vld [vmem:[%s2716_s15 + $0x4e0] sm:$0xff]  }
  0x6f   : > { %2151 = vst [vmem:[%s2711_s12 + $0x390] sm:$0xff] %v2150_v24   ;;  %v2154_v26 = vld [vmem:[%s2716_s15 + $0x4d0] sm:$0xf]   ;;  %v2156_v27 = vld [vmem:[%s2716_s15 + $0x4d8] sm:$0xf]   ;;  %2153 = vst [vmem:[%s2711_s12 + $0x398] sm:$0xff] %v2152_v25  }
  0x70   : > { %2155 = vst [vmem:[%s2711_s12 + $0x3a0] sm:$0xf] %v2154_v26   ;;  %2157 = vst [vmem:[%s2711_s12 + $0x3a8] sm:$0xf] %v2156_v27   ;;  %v2161_v29 = vld [vmem:[%s2716_s15 + $0x4e8] sm:$0xff]   ;;  %v2168_v32 = vld [vmem:[%s2716_s15 + $0x500] sm:$0xff]  }
  0x71   : > { %v2164_v30 = vld [vmem:[%s2716_s15 + $0x4f0] sm:$0xf]   ;;  %2159 = vst [vmem:[%s2711_s12 + $0x3a4] sm:$0xf] %v2158_v28   ;;  %2160 = vst [vmem:[%s2711_s12 + $0x3ac] sm:$0xf0] %v2158_v28  }
  0x72   : > { %2162 = vst [vmem:[%s2711_s12 + $0x3ac] sm:$0xf] %v2161_v29   ;;  %2163 = vst [vmem:[%s2711_s12 + $0x3b4] sm:$0xf0] %v2161_v29   ;;  %v2166_v31 = vld [vmem:[%s2716_s15 + $0x4f8] sm:$0xf]  }
  0x73   : > { %2165 = vst [vmem:[%s2711_s12 + $0x3b4] sm:$0xf] %v2164_v30   ;;  %v2170_v33 = vld [vmem:[%s2716_s15 + $0x508] sm:$0xff]   ;;  %2167 = vst [vmem:[%s2711_s12 + $0x3bc] sm:$0xf] %v2166_v31   ;;  %v2176_v36 = vld [vmem:[%s2716_s15 + $0x520] sm:$0xff]  }
  0x74   : > { %2169 = vst [vmem:[%s2711_s12 + $0x3c0] sm:$0xff] %v2168_v32   ;;  %2171 = vst [vmem:[%s2711_s12 + $0x3c8] sm:$0xff] %v2170_v33   ;;  %v2172_v34 = vld [vmem:[%s2716_s15 + $0x510] sm:$0xf]   ;;  %v2174_v35 = vld [vmem:[%s2716_s15 + $0x518] sm:$0xf]  }
  0x75   : > { %2173 = vst [vmem:[%s2711_s12 + $0x3d0] sm:$0xf] %v2172_v34   ;;  %2175 = vst [vmem:[%s2711_s12 + $0x3d8] sm:$0xf] %v2174_v35   ;;  %v2179_v37 = vld [vmem:[%s2716_s15 + $0x528] sm:$0xff]   ;;  %v2186_v40 = vld [vmem:[%s2716_s15 + $0x540] sm:$0xff]  }
  0x76   : > { %2177 = vst [vmem:[%s2711_s12 + $0x3d4] sm:$0xf] %v2176_v36   ;;  %2178 = vst [vmem:[%s2711_s12 + $0x3dc] sm:$0xf0] %v2176_v36   ;;  %v2182_v38 = vld [vmem:[%s2716_s15 + $0x530] sm:$0xf]  }
  0x77   : > { %v2184_v39 = vld [vmem:[%s2716_s15 + $0x538] sm:$0xf]   ;;  %2180 = vst [vmem:[%s2711_s12 + $0x3dc] sm:$0xf] %v2179_v37   ;;  %2181 = vst [vmem:[%s2711_s12 + $0x3e4] sm:$0xf0] %v2179_v37  }
  0x78   : > { %2183 = vst [vmem:[%s2711_s12 + $0x3e4] sm:$0xf] %v2182_v38   ;;  %2185 = vst [vmem:[%s2711_s12 + $0x3ec] sm:$0xf] %v2184_v39   ;;  %v2188_v41 = vld [vmem:[%s2716_s15 + $0x548] sm:$0xff]   ;;  %v2194_v44 = vld [vmem:[%s2716_s15 + $0x560] sm:$0xff]  }
  0x79   : > { %v2190_v42 = vld [vmem:[%s2716_s15 + $0x550] sm:$0xf]   ;;  %2187 = vst [vmem:[%s2711_s12 + $0x3f0] sm:$0xff] %v2186_v40   ;;  %2189 = vst [vmem:[%s2711_s12 + $0x3f8] sm:$0xff] %v2188_v41   ;;  %v2192_v43 = vld [vmem:[%s2716_s15 + $0x558] sm:$0xf]  }
  0x7a   : > { %2191 = vst [vmem:[%s2711_s12 + $0x400] sm:$0xf] %v2190_v42   ;;  %v2197_v45 = vld [vmem:[%s2716_s15 + $0x568] sm:$0xff]   ;;  %2193 = vst [vmem:[%s2711_s12 + $0x408] sm:$0xf] %v2192_v43   ;;  %v2204_v48 = vld [vmem:[%s2716_s15 + $0x580] sm:$0xff]  }
  0x7b   : > { %2195 = vst [vmem:[%s2711_s12 + $0x404] sm:$0xf] %v2194_v44   ;;  %2196 = vst [vmem:[%s2711_s12 + $0x40c] sm:$0xf0] %v2194_v44   ;;  %v2200_v46 = vld [vmem:[%s2716_s15 + $0x570] sm:$0xf]  }
  0x7c   : > { %2198 = vst [vmem:[%s2711_s12 + $0x40c] sm:$0xf] %v2197_v45   ;;  %2199 = vst [vmem:[%s2711_s12 + $0x414] sm:$0xf0] %v2197_v45   ;;  %v2202_v47 = vld [vmem:[%s2716_s15 + $0x578] sm:$0xf]  }
  0x7d   : > { %2201 = vst [vmem:[%s2711_s12 + $0x414] sm:$0xf] %v2200_v46   ;;  %2203 = vst [vmem:[%s2711_s12 + $0x41c] sm:$0xf] %v2202_v47   ;;  %v2206_v49 = vld [vmem:[%s2716_s15 + $0x588] sm:$0xff]   ;;  %v2212_v52 = vld [vmem:[%s2716_s15 + $0x5a0] sm:$0xff]  }
  0x7e   : > { %2205 = vst [vmem:[%s2711_s12 + $0x420] sm:$0xff] %v2204_v48   ;;  %v2208_v50 = vld [vmem:[%s2716_s15 + $0x590] sm:$0xf]   ;;  %v2210_v51 = vld [vmem:[%s2716_s15 + $0x598] sm:$0xf]   ;;  %2207 = vst [vmem:[%s2711_s12 + $0x428] sm:$0xff] %v2206_v49  }
  0x7f   : > { %2209 = vst [vmem:[%s2711_s12 + $0x430] sm:$0xf] %v2208_v50   ;;  %2211 = vst [vmem:[%s2711_s12 + $0x438] sm:$0xf] %v2210_v51   ;;  %v2215_v53 = vld [vmem:[%s2716_s15 + $0x5a8] sm:$0xff]   ;;  %v2222_v56 = vld [vmem:[%s2716_s15 + $0x5c0] sm:$0xff]  }
  0x80   : > { %v2218_v54 = vld [vmem:[%s2716_s15 + $0x5b0] sm:$0xf]   ;;  %2213 = vst [vmem:[%s2711_s12 + $0x434] sm:$0xf] %v2212_v52   ;;  %2214 = vst [vmem:[%s2711_s12 + $0x43c] sm:$0xf0] %v2212_v52  }
  0x81   : > { %2216 = vst [vmem:[%s2711_s12 + $0x43c] sm:$0xf] %v2215_v53   ;;  %2217 = vst [vmem:[%s2711_s12 + $0x444] sm:$0xf0] %v2215_v53   ;;  %v2220_v55 = vld [vmem:[%s2716_s15 + $0x5b8] sm:$0xf]  }
  0x82   : > { %2219 = vst [vmem:[%s2711_s12 + $0x444] sm:$0xf] %v2218_v54   ;;  %v2224_v57 = vld [vmem:[%s2716_s15 + $0x5c8] sm:$0xff]   ;;  %2221 = vst [vmem:[%s2711_s12 + $0x44c] sm:$0xf] %v2220_v55   ;;  %v2230_v60 = vld [vmem:[%s2716_s15 + $0x5e0] sm:$0xff]  }
  0x83   : > { %2223 = vst [vmem:[%s2711_s12 + $0x450] sm:$0xff] %v2222_v56   ;;  %2225 = vst [vmem:[%s2711_s12 + $0x458] sm:$0xff] %v2224_v57   ;;  %v2226_v58 = vld [vmem:[%s2716_s15 + $0x5d0] sm:$0xf]   ;;  %v2228_v59 = vld [vmem:[%s2716_s15 + $0x5d8] sm:$0xf]  }
  0x84   : > { %2227 = vst [vmem:[%s2711_s12 + $0x460] sm:$0xf] %v2226_v58   ;;  %2229 = vst [vmem:[%s2711_s12 + $0x468] sm:$0xf] %v2228_v59   ;;  %v2233_v61 = vld [vmem:[%s2716_s15 + $0x5e8] sm:$0xff]   ;;  %v2240_v0 = vld [vmem:[%s2716_s15 + $0x600] sm:$0xff]  }
  0x85   : > { %2231 = vst [vmem:[%s2711_s12 + $0x464] sm:$0xf] %v2230_v60   ;;  %2232 = vst [vmem:[%s2711_s12 + $0x46c] sm:$0xf0] %v2230_v60   ;;  %v2236_v62 = vld [vmem:[%s2716_s15 + $0x5f0] sm:$0xf]  }
  0x86   : > { %v2238_v63 = vld [vmem:[%s2716_s15 + $0x5f8] sm:$0xf]   ;;  %2234 = vst [vmem:[%s2711_s12 + $0x46c] sm:$0xf] %v2233_v61   ;;  %2235 = vst [vmem:[%s2711_s12 + $0x474] sm:$0xf0] %v2233_v61  }
  0x87   : > { %2237 = vst [vmem:[%s2711_s12 + $0x474] sm:$0xf] %v2236_v62   ;;  %2239 = vst [vmem:[%s2711_s12 + $0x47c] sm:$0xf] %v2238_v63   ;;  %v2242_v1 = vld [vmem:[%s2716_s15 + $0x608] sm:$0xff]   ;;  %v2248_v4 = vld [vmem:[%s2716_s15 + $0x620] sm:$0xff]  }
  0x88   : > { %v2244_v2 = vld [vmem:[%s2716_s15 + $0x610] sm:$0xf]   ;;  %2241 = vst [vmem:[%s2711_s12 + $0x480] sm:$0xff] %v2240_v0   ;;  %2243 = vst [vmem:[%s2711_s12 + $0x488] sm:$0xff] %v2242_v1   ;;  %v2246_v3 = vld [vmem:[%s2716_s15 + $0x618] sm:$0xf]  }
  0x89   : > { %2245 = vst [vmem:[%s2711_s12 + $0x490] sm:$0xf] %v2244_v2   ;;  %v2251_v5 = vld [vmem:[%s2716_s15 + $0x628] sm:$0xff]   ;;  %2247 = vst [vmem:[%s2711_s12 + $0x498] sm:$0xf] %v2246_v3   ;;  %v2258_v8 = vld [vmem:[%s2716_s15 + $0x640] sm:$0xff]  }
  0x8a   : > { %2249 = vst [vmem:[%s2711_s12 + $0x494] sm:$0xf] %v2248_v4   ;;  %2250 = vst [vmem:[%s2711_s12 + $0x49c] sm:$0xf0] %v2248_v4   ;;  %v2254_v6 = vld [vmem:[%s2716_s15 + $0x630] sm:$0xf]  }
  0x8b   : > { %2252 = vst [vmem:[%s2711_s12 + $0x49c] sm:$0xf] %v2251_v5   ;;  %2253 = vst [vmem:[%s2711_s12 + $0x4a4] sm:$0xf0] %v2251_v5   ;;  %v2256_v7 = vld [vmem:[%s2716_s15 + $0x638] sm:$0xf]  }
  0x8c   : > { %2255 = vst [vmem:[%s2711_s12 + $0x4a4] sm:$0xf] %v2254_v6   ;;  %2257 = vst [vmem:[%s2711_s12 + $0x4ac] sm:$0xf] %v2256_v7   ;;  %v2260_v9 = vld [vmem:[%s2716_s15 + $0x648] sm:$0xff]   ;;  %v2266_v12 = vld [vmem:[%s2716_s15 + $0x660] sm:$0xff]  }
  0x8d   : > { %2259 = vst [vmem:[%s2711_s12 + $0x4b0] sm:$0xff] %v2258_v8   ;;  %v2262_v10 = vld [vmem:[%s2716_s15 + $0x650] sm:$0xf]   ;;  %v2264_v11 = vld [vmem:[%s2716_s15 + $0x658] sm:$0xf]   ;;  %2261 = vst [vmem:[%s2711_s12 + $0x4b8] sm:$0xff] %v2260_v9  }
  0x8e   : > { %2263 = vst [vmem:[%s2711_s12 + $0x4c0] sm:$0xf] %v2262_v10   ;;  %2265 = vst [vmem:[%s2711_s12 + $0x4c8] sm:$0xf] %v2264_v11   ;;  %v2269_v13 = vld [vmem:[%s2716_s15 + $0x668] sm:$0xff]   ;;  %v2276_v16 = vld [vmem:[%s2716_s15 + $0x680] sm:$0xff]  }
  0x8f   : > { %v2272_v14 = vld [vmem:[%s2716_s15 + $0x670] sm:$0xf]   ;;  %2267 = vst [vmem:[%s2711_s12 + $0x4c4] sm:$0xf] %v2266_v12   ;;  %2268 = vst [vmem:[%s2711_s12 + $0x4cc] sm:$0xf0] %v2266_v12  }
  0x90   : > { %2270 = vst [vmem:[%s2711_s12 + $0x4cc] sm:$0xf] %v2269_v13   ;;  %2271 = vst [vmem:[%s2711_s12 + $0x4d4] sm:$0xf0] %v2269_v13   ;;  %v2274_v15 = vld [vmem:[%s2716_s15 + $0x678] sm:$0xf]  }
  0x91   : > { %2273 = vst [vmem:[%s2711_s12 + $0x4d4] sm:$0xf] %v2272_v14   ;;  %v2278_v17 = vld [vmem:[%s2716_s15 + $0x688] sm:$0xff]   ;;  %2275 = vst [vmem:[%s2711_s12 + $0x4dc] sm:$0xf] %v2274_v15   ;;  %v2284_v20 = vld [vmem:[%s2716_s15 + $0x6a0] sm:$0xff]  }
  0x92   : > { %2277 = vst [vmem:[%s2711_s12 + $0x4e0] sm:$0xff] %v2276_v16   ;;  %2279 = vst [vmem:[%s2711_s12 + $0x4e8] sm:$0xff] %v2278_v17   ;;  %v2280_v18 = vld [vmem:[%s2716_s15 + $0x690] sm:$0xf]   ;;  %v2282_v19 = vld [vmem:[%s2716_s15 + $0x698] sm:$0xf]  }
  0x93   : > { %2281 = vst [vmem:[%s2711_s12 + $0x4f0] sm:$0xf] %v2280_v18   ;;  %2283 = vst [vmem:[%s2711_s12 + $0x4f8] sm:$0xf] %v2282_v19   ;;  %v2287_v21 = vld [vmem:[%s2716_s15 + $0x6a8] sm:$0xff]   ;;  %v2294_v24 = vld [vmem:[%s2716_s15 + $0x6c0] sm:$0xff]  }
  0x94   : > { %2285 = vst [vmem:[%s2711_s12 + $0x4f4] sm:$0xf] %v2284_v20   ;;  %2286 = vst [vmem:[%s2711_s12 + $0x4fc] sm:$0xf0] %v2284_v20   ;;  %v2290_v22 = vld [vmem:[%s2716_s15 + $0x6b0] sm:$0xf]  }
  0x95   : > { %v2292_v23 = vld [vmem:[%s2716_s15 + $0x6b8] sm:$0xf]   ;;  %2288 = vst [vmem:[%s2711_s12 + $0x4fc] sm:$0xf] %v2287_v21   ;;  %2289 = vst [vmem:[%s2711_s12 + $0x504] sm:$0xf0] %v2287_v21  }
  0x96   : > { %2291 = vst [vmem:[%s2711_s12 + $0x504] sm:$0xf] %v2290_v22   ;;  %2293 = vst [vmem:[%s2711_s12 + $0x50c] sm:$0xf] %v2292_v23   ;;  %v2296_v25 = vld [vmem:[%s2716_s15 + $0x6c8] sm:$0xff]   ;;  %v2302_v28 = vld [vmem:[%s2716_s15 + $0x6e0] sm:$0xff]  }
  0x97   : > { %v2298_v26 = vld [vmem:[%s2716_s15 + $0x6d0] sm:$0xf]   ;;  %2295 = vst [vmem:[%s2711_s12 + $0x510] sm:$0xff] %v2294_v24   ;;  %2297 = vst [vmem:[%s2711_s12 + $0x518] sm:$0xff] %v2296_v25   ;;  %v2300_v27 = vld [vmem:[%s2716_s15 + $0x6d8] sm:$0xf]  }
  0x98   : > { %2299 = vst [vmem:[%s2711_s12 + $0x520] sm:$0xf] %v2298_v26   ;;  %v2305_v29 = vld [vmem:[%s2716_s15 + $0x6e8] sm:$0xff]   ;;  %2301 = vst [vmem:[%s2711_s12 + $0x528] sm:$0xf] %v2300_v27   ;;  %v2312_v32 = vld [vmem:[%s2716_s15 + $0x700] sm:$0xff]  }
  0x99   : > { %2303 = vst [vmem:[%s2711_s12 + $0x524] sm:$0xf] %v2302_v28   ;;  %2304 = vst [vmem:[%s2711_s12 + $0x52c] sm:$0xf0] %v2302_v28   ;;  %v2308_v30 = vld [vmem:[%s2716_s15 + $0x6f0] sm:$0xf]  }
  0x9a   : > { %2306 = vst [vmem:[%s2711_s12 + $0x52c] sm:$0xf] %v2305_v29   ;;  %2307 = vst [vmem:[%s2711_s12 + $0x534] sm:$0xf0] %v2305_v29   ;;  %v2310_v31 = vld [vmem:[%s2716_s15 + $0x6f8] sm:$0xf]  }
  0x9b   : > { %2309 = vst [vmem:[%s2711_s12 + $0x534] sm:$0xf] %v2308_v30   ;;  %2311 = vst [vmem:[%s2711_s12 + $0x53c] sm:$0xf] %v2310_v31   ;;  %v2314_v33 = vld [vmem:[%s2716_s15 + $0x708] sm:$0xff]   ;;  %v2320_v36 = vld [vmem:[%s2716_s15 + $0x720] sm:$0xff]  }
  0x9c   : > { %2313 = vst [vmem:[%s2711_s12 + $0x540] sm:$0xff] %v2312_v32   ;;  %v2316_v34 = vld [vmem:[%s2716_s15 + $0x710] sm:$0xf]   ;;  %v2318_v35 = vld [vmem:[%s2716_s15 + $0x718] sm:$0xf]   ;;  %2315 = vst [vmem:[%s2711_s12 + $0x548] sm:$0xff] %v2314_v33  }
  0x9d   : > { %2317 = vst [vmem:[%s2711_s12 + $0x550] sm:$0xf] %v2316_v34   ;;  %2319 = vst [vmem:[%s2711_s12 + $0x558] sm:$0xf] %v2318_v35   ;;  %v2323_v37 = vld [vmem:[%s2716_s15 + $0x728] sm:$0xff]   ;;  %v2330_v40 = vld [vmem:[%s2716_s15 + $0x740] sm:$0xff]  }
  0x9e   : > { %v2326_v38 = vld [vmem:[%s2716_s15 + $0x730] sm:$0xf]   ;;  %2321 = vst [vmem:[%s2711_s12 + $0x554] sm:$0xf] %v2320_v36   ;;  %2322 = vst [vmem:[%s2711_s12 + $0x55c] sm:$0xf0] %v2320_v36  }
  0x9f   : > { %2324 = vst [vmem:[%s2711_s12 + $0x55c] sm:$0xf] %v2323_v37   ;;  %2325 = vst [vmem:[%s2711_s12 + $0x564] sm:$0xf0] %v2323_v37   ;;  %v2328_v39 = vld [vmem:[%s2716_s15 + $0x738] sm:$0xf]  }
  0xa0   : > { %2327 = vst [vmem:[%s2711_s12 + $0x564] sm:$0xf] %v2326_v38   ;;  %v2332_v41 = vld [vmem:[%s2716_s15 + $0x748] sm:$0xff]   ;;  %2329 = vst [vmem:[%s2711_s12 + $0x56c] sm:$0xf] %v2328_v39   ;;  %v2338_v44 = vld [vmem:[%s2716_s15 + $0x760] sm:$0xff]  }
  0xa1   : > { %2331 = vst [vmem:[%s2711_s12 + $0x570] sm:$0xff] %v2330_v40   ;;  %2333 = vst [vmem:[%s2711_s12 + $0x578] sm:$0xff] %v2332_v41   ;;  %v2334_v42 = vld [vmem:[%s2716_s15 + $0x750] sm:$0xf]   ;;  %v2336_v43 = vld [vmem:[%s2716_s15 + $0x758] sm:$0xf]  }
  0xa2   : > { %2335 = vst [vmem:[%s2711_s12 + $0x580] sm:$0xf] %v2334_v42   ;;  %2337 = vst [vmem:[%s2711_s12 + $0x588] sm:$0xf] %v2336_v43   ;;  %v2341_v45 = vld [vmem:[%s2716_s15 + $0x768] sm:$0xff]   ;;  %v2348_v48 = vld [vmem:[%s2716_s15 + $0x780] sm:$0xff]  }
  0xa3   : > { %2339 = vst [vmem:[%s2711_s12 + $0x584] sm:$0xf] %v2338_v44   ;;  %2340 = vst [vmem:[%s2711_s12 + $0x58c] sm:$0xf0] %v2338_v44   ;;  %v2344_v46 = vld [vmem:[%s2716_s15 + $0x770] sm:$0xf]  }
  0xa4   : > { %v2346_v47 = vld [vmem:[%s2716_s15 + $0x778] sm:$0xf]   ;;  %2342 = vst [vmem:[%s2711_s12 + $0x58c] sm:$0xf] %v2341_v45   ;;  %2343 = vst [vmem:[%s2711_s12 + $0x594] sm:$0xf0] %v2341_v45  }
  0xa5   : > { %2345 = vst [vmem:[%s2711_s12 + $0x594] sm:$0xf] %v2344_v46   ;;  %2347 = vst [vmem:[%s2711_s12 + $0x59c] sm:$0xf] %v2346_v47   ;;  %v2350_v49 = vld [vmem:[%s2716_s15 + $0x788] sm:$0xff]   ;;  %v2356_v52 = vld [vmem:[%s2716_s15 + $0x7a0] sm:$0xff]  }
  0xa6   : > { %v2352_v50 = vld [vmem:[%s2716_s15 + $0x790] sm:$0xf]   ;;  %2349 = vst [vmem:[%s2711_s12 + $0x5a0] sm:$0xff] %v2348_v48   ;;  %2351 = vst [vmem:[%s2711_s12 + $0x5a8] sm:$0xff] %v2350_v49   ;;  %v2354_v51 = vld [vmem:[%s2716_s15 + $0x798] sm:$0xf]  }
  0xa7   : > { %2353 = vst [vmem:[%s2711_s12 + $0x5b0] sm:$0xf] %v2352_v50   ;;  %v2359_v53 = vld [vmem:[%s2716_s15 + $0x7a8] sm:$0xff]   ;;  %2355 = vst [vmem:[%s2711_s12 + $0x5b8] sm:$0xf] %v2354_v51   ;;  %v2366_v56 = vld [vmem:[%s2716_s15 + $0x7c0] sm:$0xff]  }
  0xa8   : > { %2357 = vst [vmem:[%s2711_s12 + $0x5b4] sm:$0xf] %v2356_v52   ;;  %2358 = vst [vmem:[%s2711_s12 + $0x5bc] sm:$0xf0] %v2356_v52   ;;  %v2362_v54 = vld [vmem:[%s2716_s15 + $0x7b0] sm:$0xf]  }
  0xa9   : > { %2360 = vst [vmem:[%s2711_s12 + $0x5bc] sm:$0xf] %v2359_v53   ;;  %2361 = vst [vmem:[%s2711_s12 + $0x5c4] sm:$0xf0] %v2359_v53   ;;  %v2364_v55 = vld [vmem:[%s2716_s15 + $0x7b8] sm:$0xf]  }
  0xaa   : > { %2363 = vst [vmem:[%s2711_s12 + $0x5c4] sm:$0xf] %v2362_v54   ;;  %2365 = vst [vmem:[%s2711_s12 + $0x5cc] sm:$0xf] %v2364_v55   ;;  %v2368_v57 = vld [vmem:[%s2716_s15 + $0x7c8] sm:$0xff]   ;;  %v2374_v60 = vld [vmem:[%s2716_s15 + $0x7e0] sm:$0xff]  }
  0xab   : > { %2367 = vst [vmem:[%s2711_s12 + $0x5d0] sm:$0xff] %v2366_v56   ;;  %v2370_v58 = vld [vmem:[%s2716_s15 + $0x7d0] sm:$0xf]   ;;  %v2372_v59 = vld [vmem:[%s2716_s15 + $0x7d8] sm:$0xf]   ;;  %2369 = vst [vmem:[%s2711_s12 + $0x5d8] sm:$0xff] %v2368_v57  }
  0xac   : > { %2371 = vst [vmem:[%s2711_s12 + $0x5e0] sm:$0xf] %v2370_v58   ;;  %2373 = vst [vmem:[%s2711_s12 + $0x5e8] sm:$0xf] %v2372_v59   ;;  %v2377_v61 = vld [vmem:[%s2716_s15 + $0x7e8] sm:$0xff]   ;;  %v2384_v0 = vld [vmem:[%s2716_s15 + $0x800] sm:$0xff]  }
  0xad   : > { %v2380_v62 = vld [vmem:[%s2716_s15 + $0x7f0] sm:$0xf]   ;;  %2375 = vst [vmem:[%s2711_s12 + $0x5e4] sm:$0xf] %v2374_v60   ;;  %2376 = vst [vmem:[%s2711_s12 + $0x5ec] sm:$0xf0] %v2374_v60  }
  0xae   : > { %2378 = vst [vmem:[%s2711_s12 + $0x5ec] sm:$0xf] %v2377_v61   ;;  %2379 = vst [vmem:[%s2711_s12 + $0x5f4] sm:$0xf0] %v2377_v61   ;;  %v2382_v63 = vld [vmem:[%s2716_s15 + $0x7f8] sm:$0xf]  }
  0xaf   : > { %2381 = vst [vmem:[%s2711_s12 + $0x5f4] sm:$0xf] %v2380_v62   ;;  %v2386_v1 = vld [vmem:[%s2716_s15 + $0x808] sm:$0xff]   ;;  %2383 = vst [vmem:[%s2711_s12 + $0x5fc] sm:$0xf] %v2382_v63   ;;  %v2392_v4 = vld [vmem:[%s2716_s15 + $0x820] sm:$0xff]  }
  0xb0   : > { %2385 = vst [vmem:[%s2711_s12 + $0x600] sm:$0xff] %v2384_v0   ;;  %2387 = vst [vmem:[%s2711_s12 + $0x608] sm:$0xff] %v2386_v1   ;;  %v2388_v2 = vld [vmem:[%s2716_s15 + $0x810] sm:$0xf]   ;;  %v2390_v3 = vld [vmem:[%s2716_s15 + $0x818] sm:$0xf]  }
  0xb1   : > { %2389 = vst [vmem:[%s2711_s12 + $0x610] sm:$0xf] %v2388_v2   ;;  %2391 = vst [vmem:[%s2711_s12 + $0x618] sm:$0xf] %v2390_v3   ;;  %v2395_v5 = vld [vmem:[%s2716_s15 + $0x828] sm:$0xff]   ;;  %v2402_v8 = vld [vmem:[%s2716_s15 + $0x840] sm:$0xff]  }
  0xb2   : > { %2393 = vst [vmem:[%s2711_s12 + $0x614] sm:$0xf] %v2392_v4   ;;  %2394 = vst [vmem:[%s2711_s12 + $0x61c] sm:$0xf0] %v2392_v4   ;;  %v2398_v6 = vld [vmem:[%s2716_s15 + $0x830] sm:$0xf]  }
  0xb3   : > { %v2400_v7 = vld [vmem:[%s2716_s15 + $0x838] sm:$0xf]   ;;  %2396 = vst [vmem:[%s2711_s12 + $0x61c] sm:$0xf] %v2395_v5   ;;  %2397 = vst [vmem:[%s2711_s12 + $0x624] sm:$0xf0] %v2395_v5  }
  0xb4   : > { %2399 = vst [vmem:[%s2711_s12 + $0x624] sm:$0xf] %v2398_v6   ;;  %2401 = vst [vmem:[%s2711_s12 + $0x62c] sm:$0xf] %v2400_v7   ;;  %v2404_v9 = vld [vmem:[%s2716_s15 + $0x848] sm:$0xff]   ;;  %v2410_v12 = vld [vmem:[%s2716_s15 + $0x860] sm:$0xff]  }
  0xb5   : > { %v2406_v10 = vld [vmem:[%s2716_s15 + $0x850] sm:$0xf]   ;;  %2403 = vst [vmem:[%s2711_s12 + $0x630] sm:$0xff] %v2402_v8   ;;  %2405 = vst [vmem:[%s2711_s12 + $0x638] sm:$0xff] %v2404_v9   ;;  %v2408_v11 = vld [vmem:[%s2716_s15 + $0x858] sm:$0xf]  }
  0xb6   : > { %2407 = vst [vmem:[%s2711_s12 + $0x640] sm:$0xf] %v2406_v10   ;;  %v2413_v13 = vld [vmem:[%s2716_s15 + $0x868] sm:$0xff]   ;;  %2409 = vst [vmem:[%s2711_s12 + $0x648] sm:$0xf] %v2408_v11   ;;  %v2420_v16 = vld [vmem:[%s2716_s15 + $0x880] sm:$0xff]  }
  0xb7   : > { %2411 = vst [vmem:[%s2711_s12 + $0x644] sm:$0xf] %v2410_v12   ;;  %2412 = vst [vmem:[%s2711_s12 + $0x64c] sm:$0xf0] %v2410_v12   ;;  %v2416_v14 = vld [vmem:[%s2716_s15 + $0x870] sm:$0xf]  }
  0xb8   : > { %2414 = vst [vmem:[%s2711_s12 + $0x64c] sm:$0xf] %v2413_v13   ;;  %2415 = vst [vmem:[%s2711_s12 + $0x654] sm:$0xf0] %v2413_v13   ;;  %v2418_v15 = vld [vmem:[%s2716_s15 + $0x878] sm:$0xf]  }
  0xb9   : > { %2417 = vst [vmem:[%s2711_s12 + $0x654] sm:$0xf] %v2416_v14   ;;  %2419 = vst [vmem:[%s2711_s12 + $0x65c] sm:$0xf] %v2418_v15   ;;  %v2422_v17 = vld [vmem:[%s2716_s15 + $0x888] sm:$0xff]   ;;  %v2428_v20 = vld [vmem:[%s2716_s15 + $0x8a0] sm:$0xff]  }
  0xba   : > { %2421 = vst [vmem:[%s2711_s12 + $0x660] sm:$0xff] %v2420_v16   ;;  %v2424_v18 = vld [vmem:[%s2716_s15 + $0x890] sm:$0xf]   ;;  %v2426_v19 = vld [vmem:[%s2716_s15 + $0x898] sm:$0xf]   ;;  %2423 = vst [vmem:[%s2711_s12 + $0x668] sm:$0xff] %v2422_v17  }
  0xbb   : > { %2425 = vst [vmem:[%s2711_s12 + $0x670] sm:$0xf] %v2424_v18   ;;  %2427 = vst [vmem:[%s2711_s12 + $0x678] sm:$0xf] %v2426_v19   ;;  %v2431_v21 = vld [vmem:[%s2716_s15 + $0x8a8] sm:$0xff]   ;;  %v2438_v24 = vld [vmem:[%s2716_s15 + $0x8c0] sm:$0xff]  }
  0xbc   : > { %v2434_v22 = vld [vmem:[%s2716_s15 + $0x8b0] sm:$0xf]   ;;  %2429 = vst [vmem:[%s2711_s12 + $0x674] sm:$0xf] %v2428_v20   ;;  %2430 = vst [vmem:[%s2711_s12 + $0x67c] sm:$0xf0] %v2428_v20  }
  0xbd   : > { %2432 = vst [vmem:[%s2711_s12 + $0x67c] sm:$0xf] %v2431_v21   ;;  %2433 = vst [vmem:[%s2711_s12 + $0x684] sm:$0xf0] %v2431_v21   ;;  %v2436_v23 = vld [vmem:[%s2716_s15 + $0x8b8] sm:$0xf]  }
  0xbe   : > { %2435 = vst [vmem:[%s2711_s12 + $0x684] sm:$0xf] %v2434_v22   ;;  %v2440_v25 = vld [vmem:[%s2716_s15 + $0x8c8] sm:$0xff]   ;;  %2437 = vst [vmem:[%s2711_s12 + $0x68c] sm:$0xf] %v2436_v23   ;;  %v2446_v28 = vld [vmem:[%s2716_s15 + $0x8e0] sm:$0xff]  }
  0xbf   : > { %2439 = vst [vmem:[%s2711_s12 + $0x690] sm:$0xff] %v2438_v24   ;;  %2441 = vst [vmem:[%s2711_s12 + $0x698] sm:$0xff] %v2440_v25   ;;  %v2442_v26 = vld [vmem:[%s2716_s15 + $0x8d0] sm:$0xf]   ;;  %v2444_v27 = vld [vmem:[%s2716_s15 + $0x8d8] sm:$0xf]  }
  0xc0   : > { %2443 = vst [vmem:[%s2711_s12 + $0x6a0] sm:$0xf] %v2442_v26   ;;  %2445 = vst [vmem:[%s2711_s12 + $0x6a8] sm:$0xf] %v2444_v27   ;;  %v2449_v29 = vld [vmem:[%s2716_s15 + $0x8e8] sm:$0xff]   ;;  %v2456_v32 = vld [vmem:[%s2716_s15 + $0x900] sm:$0xff]  }
  0xc1   : > { %2447 = vst [vmem:[%s2711_s12 + $0x6a4] sm:$0xf] %v2446_v28   ;;  %2448 = vst [vmem:[%s2711_s12 + $0x6ac] sm:$0xf0] %v2446_v28   ;;  %v2452_v30 = vld [vmem:[%s2716_s15 + $0x8f0] sm:$0xf]  }
  0xc2   : > { %v2454_v31 = vld [vmem:[%s2716_s15 + $0x8f8] sm:$0xf]   ;;  %2450 = vst [vmem:[%s2711_s12 + $0x6ac] sm:$0xf] %v2449_v29   ;;  %2451 = vst [vmem:[%s2711_s12 + $0x6b4] sm:$0xf0] %v2449_v29  }
  0xc3   : > { %2453 = vst [vmem:[%s2711_s12 + $0x6b4] sm:$0xf] %v2452_v30   ;;  %2455 = vst [vmem:[%s2711_s12 + $0x6bc] sm:$0xf] %v2454_v31   ;;  %v2458_v33 = vld [vmem:[%s2716_s15 + $0x908] sm:$0xff]   ;;  %v2464_v36 = vld [vmem:[%s2716_s15 + $0x920] sm:$0xff]  }
  0xc4   : > { %v2460_v34 = vld [vmem:[%s2716_s15 + $0x910] sm:$0xf]   ;;  %2457 = vst [vmem:[%s2711_s12 + $0x6c0] sm:$0xff] %v2456_v32   ;;  %2459 = vst [vmem:[%s2711_s12 + $0x6c8] sm:$0xff] %v2458_v33   ;;  %v2462_v35 = vld [vmem:[%s2716_s15 + $0x918] sm:$0xf]  }
  0xc5   : > { %2461 = vst [vmem:[%s2711_s12 + $0x6d0] sm:$0xf] %v2460_v34   ;;  %v2467_v37 = vld [vmem:[%s2716_s15 + $0x928] sm:$0xff]   ;;  %2463 = vst [vmem:[%s2711_s12 + $0x6d8] sm:$0xf] %v2462_v35   ;;  %v2474_v40 = vld [vmem:[%s2716_s15 + $0x940] sm:$0xff]  }
  0xc6   : > { %2465 = vst [vmem:[%s2711_s12 + $0x6d4] sm:$0xf] %v2464_v36   ;;  %2466 = vst [vmem:[%s2711_s12 + $0x6dc] sm:$0xf0] %v2464_v36   ;;  %v2470_v38 = vld [vmem:[%s2716_s15 + $0x930] sm:$0xf]  }
  0xc7   : > { %2468 = vst [vmem:[%s2711_s12 + $0x6dc] sm:$0xf] %v2467_v37   ;;  %2469 = vst [vmem:[%s2711_s12 + $0x6e4] sm:$0xf0] %v2467_v37   ;;  %v2472_v39 = vld [vmem:[%s2716_s15 + $0x938] sm:$0xf]  }
  0xc8   : > { %2471 = vst [vmem:[%s2711_s12 + $0x6e4] sm:$0xf] %v2470_v38   ;;  %2473 = vst [vmem:[%s2711_s12 + $0x6ec] sm:$0xf] %v2472_v39   ;;  %v2476_v41 = vld [vmem:[%s2716_s15 + $0x948] sm:$0xff]   ;;  %v2482_v44 = vld [vmem:[%s2716_s15 + $0x960] sm:$0xff]  }
  0xc9   : > { %2475 = vst [vmem:[%s2711_s12 + $0x6f0] sm:$0xff] %v2474_v40   ;;  %v2478_v42 = vld [vmem:[%s2716_s15 + $0x950] sm:$0xf]   ;;  %v2480_v43 = vld [vmem:[%s2716_s15 + $0x958] sm:$0xf]   ;;  %2477 = vst [vmem:[%s2711_s12 + $0x6f8] sm:$0xff] %v2476_v41  }
  0xca   : > { %2479 = vst [vmem:[%s2711_s12 + $0x700] sm:$0xf] %v2478_v42   ;;  %2481 = vst [vmem:[%s2711_s12 + $0x708] sm:$0xf] %v2480_v43   ;;  %v2485_v45 = vld [vmem:[%s2716_s15 + $0x968] sm:$0xff]   ;;  %v2492_v48 = vld [vmem:[%s2716_s15 + $0x980] sm:$0xff]  }
  0xcb   : > { %v2488_v46 = vld [vmem:[%s2716_s15 + $0x970] sm:$0xf]   ;;  %2483 = vst [vmem:[%s2711_s12 + $0x704] sm:$0xf] %v2482_v44   ;;  %2484 = vst [vmem:[%s2711_s12 + $0x70c] sm:$0xf0] %v2482_v44  }
  0xcc   : > { %2486 = vst [vmem:[%s2711_s12 + $0x70c] sm:$0xf] %v2485_v45   ;;  %2487 = vst [vmem:[%s2711_s12 + $0x714] sm:$0xf0] %v2485_v45   ;;  %v2490_v47 = vld [vmem:[%s2716_s15 + $0x978] sm:$0xf]  }
  0xcd   : > { %2489 = vst [vmem:[%s2711_s12 + $0x714] sm:$0xf] %v2488_v46   ;;  %v2494_v49 = vld [vmem:[%s2716_s15 + $0x988] sm:$0xff]   ;;  %2491 = vst [vmem:[%s2711_s12 + $0x71c] sm:$0xf] %v2490_v47   ;;  %v2500_v52 = vld [vmem:[%s2716_s15 + $0x9a0] sm:$0xff]  }
  0xce   : > { %2493 = vst [vmem:[%s2711_s12 + $0x720] sm:$0xff] %v2492_v48   ;;  %2495 = vst [vmem:[%s2711_s12 + $0x728] sm:$0xff] %v2494_v49   ;;  %v2496_v50 = vld [vmem:[%s2716_s15 + $0x990] sm:$0xf]   ;;  %v2498_v51 = vld [vmem:[%s2716_s15 + $0x998] sm:$0xf]  }
  0xcf   : > { %2497 = vst [vmem:[%s2711_s12 + $0x730] sm:$0xf] %v2496_v50   ;;  %2499 = vst [vmem:[%s2711_s12 + $0x738] sm:$0xf] %v2498_v51   ;;  %v2503_v53 = vld [vmem:[%s2716_s15 + $0x9a8] sm:$0xff]   ;;  %v2510_v56 = vld [vmem:[%s2716_s15 + $0x9c0] sm:$0xff]  }
  0xd0   : > { %2501 = vst [vmem:[%s2711_s12 + $0x734] sm:$0xf] %v2500_v52   ;;  %2502 = vst [vmem:[%s2711_s12 + $0x73c] sm:$0xf0] %v2500_v52   ;;  %v2506_v54 = vld [vmem:[%s2716_s15 + $0x9b0] sm:$0xf]  }
  0xd1   : > { %v2508_v55 = vld [vmem:[%s2716_s15 + $0x9b8] sm:$0xf]   ;;  %2504 = vst [vmem:[%s2711_s12 + $0x73c] sm:$0xf] %v2503_v53   ;;  %2505 = vst [vmem:[%s2711_s12 + $0x744] sm:$0xf0] %v2503_v53  }
  0xd2   : > { %2507 = vst [vmem:[%s2711_s12 + $0x744] sm:$0xf] %v2506_v54   ;;  %2509 = vst [vmem:[%s2711_s12 + $0x74c] sm:$0xf] %v2508_v55   ;;  %v2512_v57 = vld [vmem:[%s2716_s15 + $0x9c8] sm:$0xff]   ;;  %v2518_v60 = vld [vmem:[%s2716_s15 + $0x9e0] sm:$0xff]  }
  0xd3   : > { %v2514_v58 = vld [vmem:[%s2716_s15 + $0x9d0] sm:$0xf]   ;;  %2511 = vst [vmem:[%s2711_s12 + $0x750] sm:$0xff] %v2510_v56   ;;  %2513 = vst [vmem:[%s2711_s12 + $0x758] sm:$0xff] %v2512_v57   ;;  %v2516_v59 = vld [vmem:[%s2716_s15 + $0x9d8] sm:$0xf]  }
  0xd4   : > { %2515 = vst [vmem:[%s2711_s12 + $0x760] sm:$0xf] %v2514_v58   ;;  %v2521_v61 = vld [vmem:[%s2716_s15 + $0x9e8] sm:$0xff]   ;;  %2517 = vst [vmem:[%s2711_s12 + $0x768] sm:$0xf] %v2516_v59   ;;  %v2528_v0 = vld [vmem:[%s2716_s15 + $0xa00] sm:$0xff]  }
  0xd5   : > { %2519 = vst [vmem:[%s2711_s12 + $0x764] sm:$0xf] %v2518_v60   ;;  %2520 = vst [vmem:[%s2711_s12 + $0x76c] sm:$0xf0] %v2518_v60   ;;  %v2524_v62 = vld [vmem:[%s2716_s15 + $0x9f0] sm:$0xf]  }
  0xd6   : > { %2522 = vst [vmem:[%s2711_s12 + $0x76c] sm:$0xf] %v2521_v61   ;;  %2523 = vst [vmem:[%s2711_s12 + $0x774] sm:$0xf0] %v2521_v61   ;;  %v2526_v63 = vld [vmem:[%s2716_s15 + $0x9f8] sm:$0xf]  }
  0xd7   : > { %2525 = vst [vmem:[%s2711_s12 + $0x774] sm:$0xf] %v2524_v62   ;;  %2527 = vst [vmem:[%s2711_s12 + $0x77c] sm:$0xf] %v2526_v63   ;;  %v2530_v1 = vld [vmem:[%s2716_s15 + $0xa08] sm:$0xff]   ;;  %v2536_v4 = vld [vmem:[%s2716_s15 + $0xa20] sm:$0xff]  }
  0xd8   : > { %2529 = vst [vmem:[%s2711_s12 + $0x780] sm:$0xff] %v2528_v0   ;;  %v2532_v2 = vld [vmem:[%s2716_s15 + $0xa10] sm:$0xf]   ;;  %v2534_v3 = vld [vmem:[%s2716_s15 + $0xa18] sm:$0xf]   ;;  %2531 = vst [vmem:[%s2711_s12 + $0x788] sm:$0xff] %v2530_v1  }
  0xd9   : > { %2533 = vst [vmem:[%s2711_s12 + $0x790] sm:$0xf] %v2532_v2   ;;  %2535 = vst [vmem:[%s2711_s12 + $0x798] sm:$0xf] %v2534_v3   ;;  %v2539_v5 = vld [vmem:[%s2716_s15 + $0xa28] sm:$0xff]   ;;  %v2546_v8 = vld [vmem:[%s2716_s15 + $0xa40] sm:$0xff]  }
  0xda   : > { %v2542_v6 = vld [vmem:[%s2716_s15 + $0xa30] sm:$0xf]   ;;  %2537 = vst [vmem:[%s2711_s12 + $0x794] sm:$0xf] %v2536_v4   ;;  %2538 = vst [vmem:[%s2711_s12 + $0x79c] sm:$0xf0] %v2536_v4  }
  0xdb   : > { %2540 = vst [vmem:[%s2711_s12 + $0x79c] sm:$0xf] %v2539_v5   ;;  %2541 = vst [vmem:[%s2711_s12 + $0x7a4] sm:$0xf0] %v2539_v5   ;;  %v2544_v7 = vld [vmem:[%s2716_s15 + $0xa38] sm:$0xf]  }
  0xdc   : > { %2543 = vst [vmem:[%s2711_s12 + $0x7a4] sm:$0xf] %v2542_v6   ;;  %v2548_v9 = vld [vmem:[%s2716_s15 + $0xa48] sm:$0xff]   ;;  %2545 = vst [vmem:[%s2711_s12 + $0x7ac] sm:$0xf] %v2544_v7   ;;  %v2554_v12 = vld [vmem:[%s2716_s15 + $0xa60] sm:$0xff]  }
  0xdd   : > { %2547 = vst [vmem:[%s2711_s12 + $0x7b0] sm:$0xff] %v2546_v8   ;;  %2549 = vst [vmem:[%s2711_s12 + $0x7b8] sm:$0xff] %v2548_v9   ;;  %v2550_v10 = vld [vmem:[%s2716_s15 + $0xa50] sm:$0xf]   ;;  %v2552_v11 = vld [vmem:[%s2716_s15 + $0xa58] sm:$0xf]  }
  0xde   : > { %2551 = vst [vmem:[%s2711_s12 + $0x7c0] sm:$0xf] %v2550_v10   ;;  %2553 = vst [vmem:[%s2711_s12 + $0x7c8] sm:$0xf] %v2552_v11   ;;  %v2557_v13 = vld [vmem:[%s2716_s15 + $0xa68] sm:$0xff]   ;;  %v2564_v16 = vld [vmem:[%s2716_s15 + $0xa80] sm:$0xff]  }
  0xdf   : > { %2555 = vst [vmem:[%s2711_s12 + $0x7c4] sm:$0xf] %v2554_v12   ;;  %2556 = vst [vmem:[%s2711_s12 + $0x7cc] sm:$0xf0] %v2554_v12   ;;  %v2560_v14 = vld [vmem:[%s2716_s15 + $0xa70] sm:$0xf]  }
  0xe0   : > { %v2562_v15 = vld [vmem:[%s2716_s15 + $0xa78] sm:$0xf]   ;;  %2558 = vst [vmem:[%s2711_s12 + $0x7cc] sm:$0xf] %v2557_v13   ;;  %2559 = vst [vmem:[%s2711_s12 + $0x7d4] sm:$0xf0] %v2557_v13  }
  0xe1   : > { %2561 = vst [vmem:[%s2711_s12 + $0x7d4] sm:$0xf] %v2560_v14   ;;  %2563 = vst [vmem:[%s2711_s12 + $0x7dc] sm:$0xf] %v2562_v15   ;;  %v2566_v17 = vld [vmem:[%s2716_s15 + $0xa88] sm:$0xff]   ;;  %v2572_v20 = vld [vmem:[%s2716_s15 + $0xaa0] sm:$0xff]  }
  0xe2   : > { %v2568_v18 = vld [vmem:[%s2716_s15 + $0xa90] sm:$0xf]   ;;  %2565 = vst [vmem:[%s2711_s12 + $0x7e0] sm:$0xff] %v2564_v16   ;;  %2567 = vst [vmem:[%s2711_s12 + $0x7e8] sm:$0xff] %v2566_v17   ;;  %v2570_v19 = vld [vmem:[%s2716_s15 + $0xa98] sm:$0xf]  }
  0xe3   : > { %2569 = vst [vmem:[%s2711_s12 + $0x7f0] sm:$0xf] %v2568_v18   ;;  %v2575_v21 = vld [vmem:[%s2716_s15 + $0xaa8] sm:$0xff]   ;;  %2571 = vst [vmem:[%s2711_s12 + $0x7f8] sm:$0xf] %v2570_v19   ;;  %v2582_v24 = vld [vmem:[%s2716_s15 + $0xac0] sm:$0xff]  }
  0xe4   : > { %2573 = vst [vmem:[%s2711_s12 + $0x7f4] sm:$0xf] %v2572_v20   ;;  %2574 = vst [vmem:[%s2711_s12 + $0x7fc] sm:$0xf0] %v2572_v20   ;;  %v2578_v22 = vld [vmem:[%s2716_s15 + $0xab0] sm:$0xf]  }
  0xe5   : > { %2576 = vst [vmem:[%s2711_s12 + $0x7fc] sm:$0xf] %v2575_v21   ;;  %2577 = vst [vmem:[%s2711_s12 + $0x804] sm:$0xf0] %v2575_v21   ;;  %v2580_v23 = vld [vmem:[%s2716_s15 + $0xab8] sm:$0xf]  }
  0xe6   : > { %2579 = vst [vmem:[%s2711_s12 + $0x804] sm:$0xf] %v2578_v22   ;;  %2581 = vst [vmem:[%s2711_s12 + $0x80c] sm:$0xf] %v2580_v23   ;;  %v2584_v25 = vld [vmem:[%s2716_s15 + $0xac8] sm:$0xff]   ;;  %v2590_v28 = vld [vmem:[%s2716_s15 + $0xae0] sm:$0xff]  }
  0xe7   : > { %2583 = vst [vmem:[%s2711_s12 + $0x810] sm:$0xff] %v2582_v24   ;;  %v2586_v26 = vld [vmem:[%s2716_s15 + $0xad0] sm:$0xf]   ;;  %v2588_v27 = vld [vmem:[%s2716_s15 + $0xad8] sm:$0xf]   ;;  %2585 = vst [vmem:[%s2711_s12 + $0x818] sm:$0xff] %v2584_v25  }
  0xe8   : > { %2587 = vst [vmem:[%s2711_s12 + $0x820] sm:$0xf] %v2586_v26   ;;  %2589 = vst [vmem:[%s2711_s12 + $0x828] sm:$0xf] %v2588_v27   ;;  %v2593_v29 = vld [vmem:[%s2716_s15 + $0xae8] sm:$0xff]   ;;  %v2600_v32 = vld [vmem:[%s2716_s15 + $0xb00] sm:$0xff]  }
  0xe9   : > { %v2596_v30 = vld [vmem:[%s2716_s15 + $0xaf0] sm:$0xf]   ;;  %2591 = vst [vmem:[%s2711_s12 + $0x824] sm:$0xf] %v2590_v28   ;;  %2592 = vst [vmem:[%s2711_s12 + $0x82c] sm:$0xf0] %v2590_v28  }
  0xea   : > { %2594 = vst [vmem:[%s2711_s12 + $0x82c] sm:$0xf] %v2593_v29   ;;  %2595 = vst [vmem:[%s2711_s12 + $0x834] sm:$0xf0] %v2593_v29   ;;  %v2598_v31 = vld [vmem:[%s2716_s15 + $0xaf8] sm:$0xf]  }
  0xeb   : > { %2597 = vst [vmem:[%s2711_s12 + $0x834] sm:$0xf] %v2596_v30   ;;  %v2602_v33 = vld [vmem:[%s2716_s15 + $0xb08] sm:$0xff]   ;;  %2599 = vst [vmem:[%s2711_s12 + $0x83c] sm:$0xf] %v2598_v31   ;;  %v2608_v36 = vld [vmem:[%s2716_s15 + $0xb20] sm:$0xff]  }
  0xec   : > { %2601 = vst [vmem:[%s2711_s12 + $0x840] sm:$0xff] %v2600_v32   ;;  %2603 = vst [vmem:[%s2711_s12 + $0x848] sm:$0xff] %v2602_v33   ;;  %v2604_v34 = vld [vmem:[%s2716_s15 + $0xb10] sm:$0xf]   ;;  %v2606_v35 = vld [vmem:[%s2716_s15 + $0xb18] sm:$0xf]  }
  0xed   : > { %2605 = vst [vmem:[%s2711_s12 + $0x850] sm:$0xf] %v2604_v34   ;;  %2607 = vst [vmem:[%s2711_s12 + $0x858] sm:$0xf] %v2606_v35   ;;  %v2611_v37 = vld [vmem:[%s2716_s15 + $0xb28] sm:$0xff]   ;;  %v2618_v40 = vld [vmem:[%s2716_s15 + $0xb40] sm:$0xff]  }
  0xee   : > { %2609 = vst [vmem:[%s2711_s12 + $0x854] sm:$0xf] %v2608_v36   ;;  %2610 = vst [vmem:[%s2711_s12 + $0x85c] sm:$0xf0] %v2608_v36   ;;  %v2614_v38 = vld [vmem:[%s2716_s15 + $0xb30] sm:$0xf]  }
  0xef   : > { %v2616_v39 = vld [vmem:[%s2716_s15 + $0xb38] sm:$0xf]   ;;  %2612 = vst [vmem:[%s2711_s12 + $0x85c] sm:$0xf] %v2611_v37   ;;  %2613 = vst [vmem:[%s2711_s12 + $0x864] sm:$0xf0] %v2611_v37  }
  0xf0   : > { %2615 = vst [vmem:[%s2711_s12 + $0x864] sm:$0xf] %v2614_v38   ;;  %2617 = vst [vmem:[%s2711_s12 + $0x86c] sm:$0xf] %v2616_v39   ;;  %v2620_v41 = vld [vmem:[%s2716_s15 + $0xb48] sm:$0xff]   ;;  %v2626_v44 = vld [vmem:[%s2716_s15 + $0xb60] sm:$0xff]  }
  0xf1   : > { %v2622_v42 = vld [vmem:[%s2716_s15 + $0xb50] sm:$0xf]   ;;  %2619 = vst [vmem:[%s2711_s12 + $0x870] sm:$0xff] %v2618_v40   ;;  %2621 = vst [vmem:[%s2711_s12 + $0x878] sm:$0xff] %v2620_v41   ;;  %v2624_v43 = vld [vmem:[%s2716_s15 + $0xb58] sm:$0xf]  }
  0xf2   : > { %2623 = vst [vmem:[%s2711_s12 + $0x880] sm:$0xf] %v2622_v42   ;;  %v2629_v45 = vld [vmem:[%s2716_s15 + $0xb68] sm:$0xff]   ;;  %2625 = vst [vmem:[%s2711_s12 + $0x888] sm:$0xf] %v2624_v43   ;;  %v2636_v48 = vld [vmem:[%s2716_s15 + $0xb80] sm:$0xff]  }
  0xf3   : > { %2627 = vst [vmem:[%s2711_s12 + $0x884] sm:$0xf] %v2626_v44   ;;  %2628 = vst [vmem:[%s2711_s12 + $0x88c] sm:$0xf0] %v2626_v44   ;;  %v2632_v46 = vld [vmem:[%s2716_s15 + $0xb70] sm:$0xf]  }
  0xf4   : > { %2630 = vst [vmem:[%s2711_s12 + $0x88c] sm:$0xf] %v2629_v45   ;;  %2631 = vst [vmem:[%s2711_s12 + $0x894] sm:$0xf0] %v2629_v45   ;;  %v2634_v47 = vld [vmem:[%s2716_s15 + $0xb78] sm:$0xf]  }
  0xf5   : > { %2633 = vst [vmem:[%s2711_s12 + $0x894] sm:$0xf] %v2632_v46   ;;  %2635 = vst [vmem:[%s2711_s12 + $0x89c] sm:$0xf] %v2634_v47   ;;  %v2638_v49 = vld [vmem:[%s2716_s15 + $0xb88] sm:$0xff]   ;;  %v2644_v52 = vld [vmem:[%s2716_s15 + $0xba0] sm:$0xff]  }
  0xf6   : > { %2637 = vst [vmem:[%s2711_s12 + $0x8a0] sm:$0xff] %v2636_v48   ;;  %v2640_v50 = vld [vmem:[%s2716_s15 + $0xb90] sm:$0xf]   ;;  %v2642_v51 = vld [vmem:[%s2716_s15 + $0xb98] sm:$0xf]   ;;  %2639 = vst [vmem:[%s2711_s12 + $0x8a8] sm:$0xff] %v2638_v49  }
  0xf7   : > { %2641 = vst [vmem:[%s2711_s12 + $0x8b0] sm:$0xf] %v2640_v50   ;;  %2643 = vst [vmem:[%s2711_s12 + $0x8b8] sm:$0xf] %v2642_v51   ;;  %v2647_v53 = vld [vmem:[%s2716_s15 + $0xba8] sm:$0xff]   ;;  %v2654_v56 = vld [vmem:[%s2716_s15 + $0xbc0] sm:$0xff]  }
  0xf8   : > { %v2650_v54 = vld [vmem:[%s2716_s15 + $0xbb0] sm:$0xf]   ;;  %2645 = vst [vmem:[%s2711_s12 + $0x8b4] sm:$0xf] %v2644_v52   ;;  %2646 = vst [vmem:[%s2711_s12 + $0x8bc] sm:$0xf0] %v2644_v52  }
  0xf9   : > { %2648 = vst [vmem:[%s2711_s12 + $0x8bc] sm:$0xf] %v2647_v53   ;;  %2649 = vst [vmem:[%s2711_s12 + $0x8c4] sm:$0xf0] %v2647_v53   ;;  %v2652_v55 = vld [vmem:[%s2716_s15 + $0xbb8] sm:$0xf]  }
  0xfa   : > { %2651 = vst [vmem:[%s2711_s12 + $0x8c4] sm:$0xf] %v2650_v54   ;;  %v2656_v57 = vld [vmem:[%s2716_s15 + $0xbc8] sm:$0xff]   ;;  %2653 = vst [vmem:[%s2711_s12 + $0x8cc] sm:$0xf] %v2652_v55   ;;  %v2662_v60 = vld [vmem:[%s2716_s15 + $0xbe0] sm:$0xff]  }
  0xfb   : > { %2655 = vst [vmem:[%s2711_s12 + $0x8d0] sm:$0xff] %v2654_v56   ;;  %2657 = vst [vmem:[%s2711_s12 + $0x8d8] sm:$0xff] %v2656_v57   ;;  %v2658_v58 = vld [vmem:[%s2716_s15 + $0xbd0] sm:$0xf]   ;;  %v2660_v59 = vld [vmem:[%s2716_s15 + $0xbd8] sm:$0xf]  }
  0xfc   : > { %2659 = vst [vmem:[%s2711_s12 + $0x8e0] sm:$0xf] %v2658_v58   ;;  %2661 = vst [vmem:[%s2711_s12 + $0x8e8] sm:$0xf] %v2660_v59   ;;  %v2665_v61 = vld [vmem:[%s2716_s15 + $0xbe8] sm:$0xff]  }
  0xfd   : > { %2663 = vst [vmem:[%s2711_s12 + $0x8e4] sm:$0xf] %v2662_v60   ;;  %2664 = vst [vmem:[%s2711_s12 + $0x8ec] sm:$0xf0] %v2662_v60   ;;  %v2668_v62 = vld [vmem:[%s2716_s15 + $0xbf0] sm:$0xf]  }
  0xfe   : > { %v2670_v63 = vld [vmem:[%s2716_s15 + $0xbf8] sm:$0xf]   ;;  %2666 = vst [vmem:[%s2711_s12 + $0x8ec] sm:$0xf] %v2665_v61   ;;  %2667 = vst [vmem:[%s2711_s12 + $0x8f4] sm:$0xf0] %v2665_v61  }
  0xff   : > { %2669 = vst [vmem:[%s2711_s12 + $0x8f4] sm:$0xf] %v2668_v62   ;;  %2671 = vst [vmem:[%s2711_s12 + $0x8fc] sm:$0xf] %v2670_v63  }
 0x100 PF: > { %s7_s6 = sadd.s32 1, %s2688_s6  }
 0x101   : > { %p4_p5 = scmp.ge.s32.totalorder %s7_s6, 6  }
 0x103   :  { %6 = sbr.rel (!%p4_p5) target bundleno = 1 (0x1), region = 903 }

// kernel: conv_transpose_sigmoid.1
= control target key start
LH: loop header
LB: loop body
LE: loop exit
PB: predicated region body
PF: predicated region fallthrough
CT: control target
= control target key end

     0   :  { %8 = vsyncpa [#allocation3], 0  ;;  %s4114_s0 = inlined_call_operand.vmem [shape: f32[192,192], index: 0, kind: input, shape index: {}]   ;;  %s4115_s1 = inlined_call_operand.vmem [shape: f32[256,24,192], index: 1, kind: input, shape index: {}]   ;;  %s4116_s2 = inlined_call_operand.vmem [shape: f32[256,1,1], index: 2, kind: input, shape index: {}]   ;;  %s4117_s3 = inlined_call_operand.hbm [shape: f32[256,192,192], index: 3, kind: output, shape index: {}]  }
   0x1   :  { %10 = vsyncpa [#allocation3 + $0x1], 0  ;;  %s2873_s12 = smov 0   ;;  %s2875_s13 = smov 0  }
   0x2   :  { %s2877_s14 = smov 0   ;;  %s2879_s15 = smov 0  }
   0x3   :  { %s2881_s16 = smov 0   ;;  %s2883_s17 = smov 0  }
   0x4   :  { %s2885_s18 = smov 0   ;;  %s2887_s19 = smov 0  }
   0x5 LB: > { %s2241_s20 = sadd.s32 4294967295, %s2843_s19   ;;  %s2242_s21 = sadd.s32 4294967294, %s2843_s19   ;;  %s2843_s19 = sphi %s2887_s19, %s16_s19   ;;  %s2839_s18 = sphi %s2885_s18, %s4246_s18   ;;  %s2835_s17 = sphi %s2883_s17, %s4245_s17   ;;  %s2831_s16 = sphi %s2881_s16, %s4244_s16   ;;  %s2827_s15 = sphi %s2879_s15, %s4243_s15   ;;  %s2823_s14 = sphi %s2877_s14, %s4242_s14   ;;  %s2819_s13 = sphi %s2875_s13, %s4241_s13   ;;  %s2815_s12 = sphi %s2873_s12, %s4240_s12  }
   0x6   : > { %s25_s22 = sadd.s32 1, %s2835_s17  ;;  %s28_s23 = sadd.s32 1, %s2839_s18 }
   0x7   : > { %p26_p0 = scmp.ge.s32.totalorder %s25_s22, 8  ;;  %p125_p1 = scmp.ne.s32.totalorder %s2823_s14, %s2819_s13 }
   0x8   : > { %p126_p2 = scmp.eq.s32.totalorder %s2241_s20, 63  ;;  %p131_p5 = scmp.ne.s32.totalorder %s2819_s13, %s2815_s12 }
   0x9   : > { %s4248_s22 = smov (%p26_p0, %s25_s22), 0  ;;  %s4250_s23 = smov (!%p26_p0, %s28_s23), %s2839_s18 }
   0xa   : > { %s111_s24 = ssub.s32 %s2835_s17, %s4248_s22  ;;  %p2924_p3 = por %p126_p2, %p125_p1 }
   0xb   : > { %p30_p4 = scmp.ge.s32.totalorder %s4250_s23, 8  ;;  %p132_p6 = scmp.eq.s32.totalorder %s2242_s21, 63 }
   0xc   : > { %p2245_p7 = scmp.ge.s32.totalorder %s2843_s19, 1  ;;  %p178_p9 = scmp.lt.s32.totalorder %s2843_s19, 65 }
   0xd   : > { %s4252_s23 = smov (%p30_p4, %s4250_s23), 0  ;;  %p2933_p8 = por %p132_p6, %p131_p5 }
   0xe   : > { %s110_s27 = ssub.s32 %s2839_s18, %s4252_s23  ;;  %s115_s28 = sadd.s32 1, %s2823_s14 }
   0xf   : > { %s112_s29 = sor.u32 %s111_s24, %s110_s27  ;;  %p179_p10 = pnand %p2245_p7, %p178_p9 }
  0x10   : > { %p113_p11 = scmp.eq.s32.totalorder %s112_s29, 0 }
  0x11   : > { %182 = sbr.rel (%p179_p10) target bundleno = 443 (0x1bb), region = 32 }
  0x12   : > { %s2942_s30 = scalar_select %p113_p11, %s2823_s14, %s115_s28  }
  0x18   : > { %s2248_s4 = sshll.u32 %s2831_s16, 5  ;;  %v2845_v0 = vmov 0   ;;  %s213_s8 = smul.u32 3, %s2827_s15  ;;  %vm1905_vm0 = vcmask 523264  }
  0x19   : > { %2380 = vset.pattern.permute.xlu1 %v2845_v0  ;;  %2379 = vset.pattern.permute.xlu0 %v2845_v0  ;;  %p221_p12 = scmp.lt.s32.totalorder %s2248_s4, 255  ;;  %s210_s29 = sand.u32 1, %s2819_s13  }
  0x1a   : > { %p214_p13 = scmp.lt.s32.totalorder %s213_s8, 23  ;;  %s2098_s6 = scalar_lea.sflag [#allocation3], %s210_s29 }
  0x1b   : > { %s4254_s4 = smov (!%p221_p12, %s2248_s4), 255 }
  0x1c   : > { %s2951_s7 = scalar_lea.vmem %s4116_s2, %s4254_s4  ;;  %s4256_s8 = smov (!%p214_p13, %s213_s8), 23 }
  0x1d   : > { %v2253_v1 = vld [vmem:[%s2951_s7 + $0x2] ss:$0 sm:$0xff]  ;;  %v2251_v2 = vld [vmem:[%s2951_s7] ss:$0 sm:$0xff]  ;;  %v2254_v3 = vld [vmem:[%s2951_s7 + $0x3] ss:$0 sm:$0xff] }
  0x1e   : > { %825 = vperm.xlu1 %2380, %v2253_v1   ;;  %817 = vperm.xlu0 %2379, %v2251_v2   ;;  %v2252_v4 = vld [vmem:[%s2951_s7 + $0x1] ss:$0 sm:$0xff]  ;;  %v2256_v5 = vld [vmem:[%s2951_s7 + $0x5] ss:$0 sm:$0xff]  ;;  %v2255_v6 = vld [vmem:[%s2951_s7 + $0x4] ss:$0 sm:$0xff] }
  0x1f   : > { %v2258_v7 = vld [vmem:[%s2951_s7 + $0x7] ss:$0 sm:$0xff]  ;;  %v2257_v8 = vld [vmem:[%s2951_s7 + $0x6] ss:$0 sm:$0xff]  ;;  %v2260_v9 = vld [vmem:[%s2951_s7 + $0x9] ss:$0 sm:$0xff] }
  0x20   : > { %v2259_v10 = vld [vmem:[%s2951_s7 + $0x8] ss:$0 sm:$0xff]  ;;  %v2262_v11 = vld [vmem:[%s2951_s7 + $0xb] ss:$0 sm:$0xff]  ;;  %v2261_v12 = vld [vmem:[%s2951_s7 + $0xa] ss:$0 sm:$0xff] }
  0x21   : > { %v2264_v13 = vld [vmem:[%s2951_s7 + $0xd] ss:$0 sm:$0xff]  ;;  %v2263_v14 = vld [vmem:[%s2951_s7 + $0xc] ss:$0 sm:$0xff]  ;;  %v2266_v15 = vld [vmem:[%s2951_s7 + $0xf] ss:$0 sm:$0xff] }
  0x22   : > { %829 = vperm.xlu1 %2380, %v2254_v3   ;;  %821 = vperm.xlu0 %2379, %v2252_v4   ;;  %v2265_v16 = vld [vmem:[%s2951_s7 + $0xe] ss:$0 sm:$0xff]  ;;  %v2268_v17 = vld [vmem:[%s2951_s7 + $0x11] ss:$0 sm:$0xff]  ;;  %v2267_v18 = vld [vmem:[%s2951_s7 + $0x10] ss:$0 sm:$0xff] }
  0x23   : > { %v2270_v19 = vld [vmem:[%s2951_s7 + $0x13] ss:$0 sm:$0xff]  ;;  %v2269_v20 = vld [vmem:[%s2951_s7 + $0x12] ss:$0 sm:$0xff]  ;;  %v2272_v21 = vld [vmem:[%s2951_s7 + $0x15] ss:$0 sm:$0xff] }
  0x24   : > { %v2271_v22 = vld [vmem:[%s2951_s7 + $0x14] ss:$0 sm:$0xff]  ;;  %v2274_v23 = vld [vmem:[%s2951_s7 + $0x17] ss:$0 sm:$0xff]  ;;  %v2273_v24 = vld [vmem:[%s2951_s7 + $0x16] ss:$0 sm:$0xff] }
  0x25   : > { %v2276_v25 = vld [vmem:[%s2951_s7 + $0x19] ss:$0 sm:$0xff]  ;;  %v2275_v26 = vld [vmem:[%s2951_s7 + $0x18] ss:$0 sm:$0xff]  ;;  %v2278_v27 = vld [vmem:[%s2951_s7 + $0x1b] ss:$0 sm:$0xff] }
  0x26   : > { %837 = vperm.xlu1 %2380, %v2256_v5   ;;  %833 = vperm.xlu0 %2379, %v2255_v6   ;;  %v2277_v28 = vld [vmem:[%s2951_s7 + $0x1a] ss:$0 sm:$0xff]  ;;  %v2280_v29 = vld [vmem:[%s2951_s7 + $0x1d] ss:$0 sm:$0xff]  ;;  %v2279_v30 = vld [vmem:[%s2951_s7 + $0x1c] ss:$0 sm:$0xff] }
  0x27   : > { %v2282_v31 = vld [vmem:[%s2951_s7 + $0x1f] ss:$0 sm:$0xff]  ;;  %v2281_v32 = vld [vmem:[%s2951_s7 + $0x1e] ss:$0 sm:$0xff]  ;;  %s2292_s9 = smul.u32 48, %s4254_s4  ;;  %s2289_s10 = sshll.u32 %s4256_s8, 4 }
  0x28   : > { %s2995_s28 = scalar_lea.vmem %s4114_s0, %s2289_s10  ;;  %s3472_s4 = smul.u32 1536, %s210_s29 }
  0x29   : > { %s2990_s21 = scalar_lea.vmem %s4115_s1, %s2292_s9  ;;  %v2998_v33 = vld [vmem:[%s2995_s28] sm:$0xff]  ;;  %v3001_v34 = vld [vmem:[%s2995_s28 + $0x8] sm:$0xff]  ;;  %v3004_v35 = vld [vmem:[%s2995_s28 + $0x10] sm:$0xff] }
  0x2a   : > { %845 = vperm.xlu1 %2380, %v2258_v7   ;;  %841 = vperm.xlu0 %2379, %v2257_v8   ;;  %v3007_v36 = vld [vmem:[%s2995_s28 + $0x18] sm:$0xff]  ;;  %v252_v37 = vld [vmem:[%s2990_s21 + $0x60] sm:$0xff]  ;;  %v253_v38 = vld [vmem:[%s2990_s21 + $0x68] sm:$0xff]  ;;  %s3489_s5 = scalar_lea.vmem [#allocation2], %s3472_s4 }
  0x2b   : > { %v254_v39 = vld [vmem:[%s2990_s21 + $0x70] sm:$0xff]  ;;  %v255_v40 = vld [vmem:[%s2990_s21 + $0x78] sm:$0xff]  ;;  %v3014_v41 = vld [vmem:[%s2995_s28 + $0x20] sm:$0xff]  ;;  %v3036_v59 = vmul.f32 %v252_v37, %v2998_v33  ;;  %v3039_v60 = vmul.f32 %v253_v38, %v3001_v34 }
  0x2c   : > { %v3017_v42 = vld [vmem:[%s2995_s28 + $0x28] sm:$0xff]  ;;  %v256_v43 = vld [vmem:[%s2990_s21 + $0x80] sm:$0xff]  ;;  %v242_v47 = vld [vmem:[%s2990_s21 + $0x10] sm:$0xff]  ;;  %v3042_v61 = vmul.f32 %v254_v39, %v3004_v35  ;;  %v3045_v62 = vmul.f32 %v255_v40, %v3007_v36 }
  0x2d   : > { %v257_v44 = vld [vmem:[%s2990_s21 + $0x88] sm:$0xff]  ;;  %v240_v45 = vld [vmem:[%s2990_s21] sm:$0xff]  ;;  %v243_v48 = vld [vmem:[%s2990_s21 + $0x18] sm:$0xff]  ;;  %v3052_v3 = vmul.f32 %v256_v43, %v3014_v41 }
  0x2e   : > { %853 = vperm.xlu1 %2380, %v2260_v9   ;;  %849 = vperm.xlu0 %2379, %v2259_v10   ;;  %v241_v46 = vld [vmem:[%s2990_s21 + $0x8] sm:$0xff]  ;;  %v244_v49 = vld [vmem:[%s2990_s21 + $0x20] sm:$0xff]  ;;  %v258_v51 = vld [vmem:[%s2990_s21 + $0x90] sm:$0xff]  ;;  %v3055_v4 = vmul.f32 %v257_v44, %v3017_v42  ;;  %v3058_v5 = vmul.f32 %v240_v45, %v2998_v33 }
  0x2f   : > { %v245_v50 = vld [vmem:[%s2990_s21 + $0x28] sm:$0xff]  ;;  %v259_v52 = vld [vmem:[%s2990_s21 + $0x98] sm:$0xff]  ;;  %v260_v53 = vld [vmem:[%s2990_s21 + $0xa0] sm:$0xff]  ;;  %v3061_v6 = vmul.f32 %v241_v46, %v3001_v34 }
  0x30   : > { %v261_v54 = vld [vmem:[%s2990_s21 + $0xa8] sm:$0xff]  ;;  %v262_v55 = vld [vmem:[%s2990_s21 + $0xb0] sm:$0xff]  ;;  %v263_v56 = vld [vmem:[%s2990_s21 + $0xb8] sm:$0xff] }
  0x31   : > { %v246_v57 = vld [vmem:[%s2990_s21 + $0x30] sm:$0xff]  ;;  %v247_v58 = vld [vmem:[%s2990_s21 + $0x38] sm:$0xff]  ;;  %v248_v63 = vld [vmem:[%s2990_s21 + $0x40] sm:$0xff] }
  0x32   : > { %861 = vperm.xlu1 %2380, %v2262_v11   ;;  %857 = vperm.xlu0 %2379, %v2261_v12   ;;  %v249_v0 = vld [vmem:[%s2990_s21 + $0x48] sm:$0xff]  ;;  %v250_v1 = vld [vmem:[%s2990_s21 + $0x50] sm:$0xff]  ;;  %v251_v2 = vld [vmem:[%s2990_s21 + $0x58] sm:$0xff]  ;;  %v3068_v11 = vmul.f32 %v242_v47, %v3004_v35  ;;  %v3071_v12 = vmul.f32 %v243_v48, %v3007_v36  ;;  %v3116_v39 = vmul.f32 %v248_v63, %v3004_v35 }
  0x33   : > { %v270_v7 = vld [vmem:[%s2990_s21 + $0xf0] sm:$0xff]  ;;  %v271_v8 = vld [vmem:[%s2990_s21 + $0xf8] sm:$0xff]  ;;  %v272_v9 = vld [vmem:[%s2990_s21 + $0x100] sm:$0xff]  ;;  %v3119_v40 = vmul.f32 %v249_v0, %v3007_v36  ;;  %v3122_v43 = vmul.f32 %v250_v1, %v3014_v41  ;;  %v3125_v44 = vmul.f32 %v251_v2, %v3017_v42 }
  0x34   : > { %v273_v10 = vld [vmem:[%s2990_s21 + $0x108] sm:$0xff]  ;;  %v284_v37 = vld [vmem:[%s2990_s21 + $0x160] sm:$0xff]  ;;  %v286_v45 = vld [vmem:[%s2990_s21 + $0x170] sm:$0xff] }
  0x35   : > { %v285_v38 = vld [vmem:[%s2990_s21 + $0x168] sm:$0xff]  ;;  %v287_v46 = vld [vmem:[%s2990_s21 + $0x178] sm:$0xff]  ;;  %v276_v47 = vld [vmem:[%s2990_s21 + $0x120] sm:$0xff] }
  0x36   : > { %869 = vperm.xlu1 %2380, %v2264_v13   ;;  %865 = vperm.xlu0 %2379, %v2263_v14   ;;  %v3074_v13 = vmul.f32 %v244_v49, %v3014_v41  ;;  %v3077_v14 = vmul.f32 %v245_v50, %v3017_v42  ;;  %v277_v48 = vld [vmem:[%s2990_s21 + $0x128] sm:$0xff]  ;;  %v3132_v49 = vmul.f32 %v270_v7, %v2998_v33  ;;  %v294_v1 = vld [vmem:[%s2990_s21 + $0x1b0] sm:$0xff]  ;;  %v295_v2 = vld [vmem:[%s2990_s21 + $0x1b8] sm:$0xff] }
  0x37   : > { %v3135_v50 = vmul.f32 %v271_v8, %v3001_v34  ;;  %v296_v7 = vld [vmem:[%s2990_s21 + $0x1c0] sm:$0xff]  ;;  %v297_v8 = vld [vmem:[%s2990_s21 + $0x1c8] sm:$0xff] }
  0x3a   : > { %877 = vperm.xlu1 %2380, %v2266_v15   ;;  %873 = vperm.xlu0 %2379, %v2265_v16   ;;  %v274_v15 = vld [vmem:[%s2990_s21 + $0x110] sm:$0xff]  ;;  %v275_v16 = vld [vmem:[%s2990_s21 + $0x118] sm:$0xff] }
  0x3e   : > { %885 = vperm.xlu1 %2380, %v2268_v17   ;;  %881 = vperm.xlu0 %2379, %v2267_v18   ;;  %v264_v17 = vld [vmem:[%s2990_s21 + $0xc0] sm:$0xff]  ;;  %v265_v18 = vld [vmem:[%s2990_s21 + $0xc8] sm:$0xff] }
  0x3f   : > { %v3154_v63 = vmul.f32 %v264_v17, %v2998_v33  ;;  %v3157_v0 = vmul.f32 %v265_v18, %v3001_v34  ;;  %v298_v17 = vld [vmem:[%s2990_s21 + $0x1d0] sm:$0xff]  ;;  %v299_v18 = vld [vmem:[%s2990_s21 + $0x1d8] sm:$0xff] }
  0x41   : > { %4121 = vst [vmem:[#allocation8_spill] sm:$0xff] %v3154_v63  ;;  %4122 = vst [vmem:[#allocation9_spill] sm:$0xff] %v3157_v0  ;;  %v288_v0 = vld [vmem:[%s2990_s21 + $0x180] sm:$0xff]  ;;  %v289_v63 = vld [vmem:[%s2990_s21 + $0x188] sm:$0xff] }
  0x42   : > { %893 = vperm.xlu1 %2380, %v2270_v19   ;;  %889 = vperm.xlu0 %2379, %v2269_v20   ;;  %v3084_v19 = vmul.f32 %v258_v51, %v2998_v33  ;;  %v3087_v20 = vmul.f32 %v259_v52, %v3001_v34  ;;  %v3138_v51 = vmul.f32 %v272_v9, %v3004_v35 }
  0x43   : > { %v3141_v52 = vmul.f32 %v273_v10, %v3007_v36 }
  0x46   : > { %901 = vperm.xlu1 %2380, %v2272_v21   ;;  %897 = vperm.xlu0 %2379, %v2271_v22   ;;  %v3090_v21 = vmul.f32 %v260_v53, %v3004_v35  ;;  %v3093_v22 = vmul.f32 %v261_v54, %v3007_v36  ;;  %v278_v53 = vld [vmem:[%s2990_s21 + $0x130] sm:$0xff]  ;;  %v279_v54 = vld [vmem:[%s2990_s21 + $0x138] sm:$0xff] }
  0x4a   : > { %909 = vperm.xlu1 %2380, %v2274_v23   ;;  %905 = vperm.xlu0 %2379, %v2273_v24   ;;  %v266_v23 = vld [vmem:[%s2990_s21 + $0xd0] sm:$0xff]  ;;  %v267_v24 = vld [vmem:[%s2990_s21 + $0xd8] sm:$0xff] }
  0x4b   : > { %v3164_v9 = vmul.f32 %v266_v23, %v3004_v35  ;;  %v3167_v10 = vmul.f32 %v267_v24, %v3007_v36 }
  0x4d   : > { %4123 = vst [vmem:[#allocation10_spill] sm:$0xff] %v3164_v9  ;;  %4124 = vst [vmem:[#allocation11_spill] sm:$0xff] %v3167_v10  ;;  %v292_v10 = vld [vmem:[%s2990_s21 + $0x1a0] sm:$0xff]  ;;  %v293_v9 = vld [vmem:[%s2990_s21 + $0x1a8] sm:$0xff] }
  0x4e   : > { %917 = vperm.xlu1 %2380, %v2276_v25   ;;  %913 = vperm.xlu0 %2379, %v2275_v26   ;;  %v268_v25 = vld [vmem:[%s2990_s21 + $0xe0] sm:$0xff]  ;;  %v269_v26 = vld [vmem:[%s2990_s21 + $0xe8] sm:$0xff] }
  0x52   : > { %925 = vperm.xlu1 %2380, %v2278_v27   ;;  %921 = vperm.xlu0 %2379, %v2277_v28   ;;  %v3100_v27 = vmul.f32 %v262_v55, %v3014_v41  ;;  %v3103_v28 = vmul.f32 %v263_v56, %v3017_v42  ;;  %v280_v55 = vld [vmem:[%s2990_s21 + $0x140] sm:$0xff]  ;;  %v281_v56 = vld [vmem:[%s2990_s21 + $0x148] sm:$0xff] }
  0x56   : > { %933 = vperm.xlu1 %2380, %v2280_v29   ;;  %929 = vperm.xlu0 %2379, %v2279_v30   ;;  %v3106_v29 = vmul.f32 %v246_v57, %v2998_v33  ;;  %v3109_v30 = vmul.f32 %v247_v58, %v3001_v34  ;;  %v3148_v57 = vmul.f32 %v274_v15, %v3014_v41 }
  0x57   : > { %v3151_v58 = vmul.f32 %v275_v16, %v3017_v42  ;;  %v3170_v15 = vmul.f32 %v268_v25, %v3014_v41  ;;  %v3173_v16 = vmul.f32 %v269_v26, %v3017_v42  ;;  %v3186_v25 = vmul.f32 %v284_v37, %v3004_v35 }
  0x58   : > { %v3189_v26 = vmul.f32 %v285_v38, %v3007_v36  ;;  %v3202_v37 = vmul.f32 %v276_v47, %v2998_v33  ;;  %v3205_v38 = vmul.f32 %v277_v48, %v3001_v34  ;;  %v3218_v47 = vmul.f32 %v280_v55, %v3014_v41 }
  0x59   : > { %4120 = vst [vmem:[#allocation7_spill] sm:$0xff] %v3151_v58  ;;  %4125 = vst [vmem:[#allocation12_spill] sm:$0xff] %v3170_v15  ;;  %v291_v15 = vld [vmem:[%s2990_s21 + $0x198] sm:$0xff]  ;;  %v3221_v48 = vmul.f32 %v281_v56, %v3017_v42  ;;  %v3234_v55 = vmul.f32 %v296_v7, %v3004_v35  ;;  %v3237_v56 = vmul.f32 %v297_v8, %v3007_v36 }
  0x5a   : > { %941 = vperm.xlu1 %2380, %v2282_v31   ;;  %937 = vperm.xlu0 %2379, %v2281_v32   ;;  %v282_v31 = vld [vmem:[%s2990_s21 + $0x150] sm:$0xff]  ;;  %v283_v32 = vld [vmem:[%s2990_s21 + $0x158] sm:$0xff]  ;;  %4126 = vst [vmem:[#allocation13_spill] sm:$0xff] %v3173_v16  ;;  %4129 = vst [vmem:[#allocation16_spill] sm:$0xff] %v3186_v25  ;;  %v3250_v7 = vmul.f32 %v288_v0, %v2998_v33  ;;  %v3253_v8 = vmul.f32 %v289_v63, %v3001_v34 }
  0x5b   : > { %v3180_v23 = vmul.f32 %v282_v31, %v2998_v33  ;;  %v3183_v24 = vmul.f32 %v283_v32, %v3001_v34  ;;  %4130 = vst [vmem:[#allocation17_spill] sm:$0xff] %v3189_v26  ;;  %v290_v16 = vld [vmem:[%s2990_s21 + $0x190] sm:$0xff]  ;;  %v3196_v31 = vmul.f32 %v286_v45, %v3014_v41  ;;  %v3199_v32 = vmul.f32 %v287_v46, %v3017_v42  ;;  %v307_v25 = vld [vmem:[%s2990_s21 + $0x218] sm:$0xff] }
  0x5c   : > { %4133 = vst [vmem:[#allocation20_spill] sm:$0xff] %v3202_v37  ;;  %4134 = vst [vmem:[#allocation21_spill] sm:$0xff] %v3205_v38  ;;  %v306_v26 = vld [vmem:[%s2990_s21 + $0x210] sm:$0xff]  ;;  %v3212_v45 = vmul.f32 %v278_v53, %v3004_v35  ;;  %v3215_v46 = vmul.f32 %v279_v54, %v3007_v36  ;;  %v311_v37 = vld [vmem:[%s2990_s21 + $0x238] sm:$0xff]  ;;  %v3228_v53 = vmul.f32 %v294_v1, %v2998_v33 }
  0x5d   : > { %4127 = vst [vmem:[#allocation14_spill] sm:$0xff] %v3180_v23  ;;  %4128 = vst [vmem:[#allocation15_spill] sm:$0xff] %v3183_v24  ;;  %v308_v24 = vld [vmem:[%s2990_s21 + $0x220] sm:$0xff]  ;;  %v309_v23 = vld [vmem:[%s2990_s21 + $0x228] sm:$0xff]  ;;  %v3231_v54 = vmul.f32 %v295_v2, %v3001_v34  ;;  %v3244_v1 = vmul.f32 %v298_v17, %v3014_v41  ;;  %v3247_v2 = vmul.f32 %v299_v18, %v3017_v42 }
  0x5e   : > { %4131 = vst [vmem:[#allocation18_spill] sm:$0xff] %v3196_v31  ;;  %4132 = vst [vmem:[#allocation19_spill] sm:$0xff] %v3199_v32  ;;  %v310_v38 = vld [vmem:[%s2990_s21 + $0x230] sm:$0xff]  ;;  %v300_v32 = vld [vmem:[%s2990_s21 + $0x1e0] sm:$0xff]  ;;  %v3260_v17 = vmul.f32 %v290_v16, %v3004_v35  ;;  %v3263_v18 = vmul.f32 %v291_v15, %v3007_v36  ;;  %v3266_v0 = vmul.f32 %v292_v10, %v3014_v41 }
  0x5f   : > { %4135 = vst [vmem:[#allocation22_spill] sm:$0xff] %v3212_v45  ;;  %4136 = vst [vmem:[#allocation23_spill] sm:$0xff] %v3215_v46  ;;  %v301_v31 = vld [vmem:[%s2990_s21 + $0x1e8] sm:$0xff]  ;;  %v304_v46 = vld [vmem:[%s2990_s21 + $0x200] sm:$0xff]  ;;  %v3269_v63 = vmul.f32 %v293_v9, %v3017_v42  ;;  %v3276_v58 = vmul.f32 %v306_v26, %v2998_v33  ;;  %v3279_v16 = vmul.f32 %v307_v25, %v3001_v34 }
  0x60   : > { %4137 = vst [vmem:[#allocation24_spill] sm:$0xff] %v3218_v47  ;;  %4138 = vst [vmem:[#allocation25_spill] sm:$0xff] %v3221_v48  ;;  %v302_v48 = vld [vmem:[%s2990_s21 + $0x1f0] sm:$0xff]  ;;  %v303_v47 = vld [vmem:[%s2990_s21 + $0x1f8] sm:$0xff]  ;;  %v3282_v15 = vmul.f32 %v308_v24, %v3004_v35  ;;  %v3285_v10 = vmul.f32 %v309_v23, %v3007_v36  ;;  %v3295_v26 = vmul.f32 %v311_v37, %v3017_v42 }
  0x61   : > { %4139 = vst [vmem:[#allocation26_spill] sm:$0xff] %v3228_v53  ;;  %4140 = vst [vmem:[#allocation27_spill] sm:$0xff] %v3231_v54  ;;  %v305_v45 = vld [vmem:[%s2990_s21 + $0x208] sm:$0xff]  ;;  %v320_v54 = vld [vmem:[%s2990_s21 + $0x280] sm:$0xff]  ;;  %v3298_v25 = vmul.f32 %v300_v32, %v2998_v33  ;;  %v3301_v23 = vmul.f32 %v301_v31, %v3001_v34  ;;  %v3313_v37 = vmul.f32 %v304_v46, %v3014_v41 }
  0x62   : > { %4141 = vst [vmem:[#allocation28_spill] sm:$0xff] %v3234_v55  ;;  %4142 = vst [vmem:[#allocation29_spill] sm:$0xff] %v3237_v56  ;;  %v318_v56 = vld [vmem:[%s2990_s21 + $0x270] sm:$0xff]  ;;  %v319_v55 = vld [vmem:[%s2990_s21 + $0x278] sm:$0xff]  ;;  %v3316_v32 = vmul.f32 %v305_v45, %v3017_v42 }
  0x63   : > { %4143 = vst [vmem:[#allocation30_spill] sm:$0xff] %v3244_v1  ;;  %4144 = vst [vmem:[#allocation31_spill] sm:$0xff] %v3247_v2  ;;  %v321_v53 = vld [vmem:[%s2990_s21 + $0x288] sm:$0xff]  ;;  %v312_v2 = vld [vmem:[%s2990_s21 + $0x240] sm:$0xff] }
  0x64   : > { %4145 = vst [vmem:[#allocation32_spill] sm:$0xff] %v3250_v7  ;;  %4146 = vst [vmem:[#allocation33_spill] sm:$0xff] %v3253_v8  ;;  %v322_v8 = vld [vmem:[%s2990_s21 + $0x290] sm:$0xff]  ;;  %v323_v7 = vld [vmem:[%s2990_s21 + $0x298] sm:$0xff]  ;;  %v3331_v46 = vmul.f32 %v321_v53, %v3007_v36 }
  0x65   : > { %4147 = vst [vmem:[#allocation34_spill] sm:$0xff] %v3260_v17  ;;  %4148 = vst [vmem:[#allocation35_spill] sm:$0xff] %v3263_v18  ;;  %v313_v1 = vld [vmem:[%s2990_s21 + $0x248] sm:$0xff]  ;;  %v314_v9 = vld [vmem:[%s2990_s21 + $0x250] sm:$0xff]  ;;  %v3292_v17 = vmul.f32 %v310_v38, %v3014_v41  ;;  %v3310_v38 = vmul.f32 %v303_v47, %v3007_v36  ;;  %v3328_v47 = vmul.f32 %v320_v54, %v3004_v35 }
  0x66   : > { %4149 = vst [vmem:[#allocation36_spill] sm:$0xff] %v3266_v0  ;;  %4150 = vst [vmem:[#allocation37_spill] sm:$0xff] %v3269_v63  ;;  %v315_v63 = vld [vmem:[%s2990_s21 + $0x258] sm:$0xff]  ;;  %v316_v0 = vld [vmem:[%s2990_s21 + $0x260] sm:$0xff]  ;;  %v3346_v54 = vmul.f32 %v313_v1, %v3001_v34 }
  0x67   : > { %4151 = vst [vmem:[#allocation38_spill] sm:$0xff] %v3279_v16  ;;  %4152 = vst [vmem:[#allocation39_spill] sm:$0xff] %v3282_v15  ;;  %v317_v18 = vld [vmem:[%s2990_s21 + $0x268] sm:$0xff]  ;;  %v330_v24 = vld [vmem:[%s2990_s21 + $0x2d0] sm:$0xff]  ;;  %v3307_v16 = vmul.f32 %v302_v48, %v3004_v35  ;;  %v3325_v48 = vmul.f32 %v319_v55, %v3001_v34  ;;  %v3343_v55 = vmul.f32 %v312_v2, %v2998_v33 }
  0x68   : > { %4153 = vst [vmem:[#allocation40_spill] sm:$0xff] %v3285_v10  ;;  %4154 = vst [vmem:[#allocation41_spill] sm:$0xff] %v3295_v26  ;;  %v331_v10 = vld [vmem:[%s2990_s21 + $0x2d8] sm:$0xff]  ;;  %v332_v15 = vld [vmem:[%s2990_s21 + $0x2e0] sm:$0xff]  ;;  %v3322_v26 = vmul.f32 %v318_v56, %v2998_v33  ;;  %v3340_v56 = vmul.f32 %v323_v7, %v3017_v42  ;;  %v3358_v7 = vmul.f32 %v316_v0, %v3014_v41 }
  0x69   : > { %4155 = vst [vmem:[#allocation42_spill] sm:$0xff] %v3298_v25  ;;  %4156 = vst [vmem:[#allocation43_spill] sm:$0xff] %v3301_v23  ;;  %v333_v31 = vld [vmem:[%s2990_s21 + $0x2e8] sm:$0xff]  ;;  %v334_v23 = vld [vmem:[%s2990_s21 + $0x2f0] sm:$0xff]  ;;  %v3361_v2 = vmul.f32 %v317_v18, %v3017_v42 }
  0x6a   : > { %4157 = vst [vmem:[#allocation44_spill] sm:$0xff] %v3310_v38  ;;  %4158 = vst [vmem:[#allocation45_spill] sm:$0xff] %v3313_v37  ;;  %v335_v25 = vld [vmem:[%s2990_s21 + $0x2f8] sm:$0xff]  ;;  %v324_v45 = vld [vmem:[%s2990_s21 + $0x2a0] sm:$0xff]  ;;  %v3337_v38 = vmul.f32 %v322_v8, %v3014_v41  ;;  %v3355_v8 = vmul.f32 %v315_v63, %v3007_v36  ;;  %v3373_v63 = vmul.f32 %v332_v15, %v3004_v35 }
  0x6b   : > { %4159 = vst [vmem:[#allocation46_spill] sm:$0xff] %v3316_v32  ;;  %4160 = vst [vmem:[#allocation47_spill] sm:$0xff] %v3325_v48  ;;  %v325_v32 = vld [vmem:[%s2990_s21 + $0x2a8] sm:$0xff]  ;;  %v326_v37 = vld [vmem:[%s2990_s21 + $0x2b0] sm:$0xff]  ;;  %v3352_v48 = vmul.f32 %v314_v9, %v3004_v35  ;;  %v3370_v9 = vmul.f32 %v331_v10, %v3001_v34  ;;  %v3376_v0 = vmul.f32 %v333_v31, %v3007_v36 }
  0x6c   : > { %4161 = vst [vmem:[#allocation48_spill] sm:$0xff] %v3328_v47  ;;  %4162 = vst [vmem:[#allocation49_spill] sm:$0xff] %v3331_v46  ;;  %v327_v53 = vld [vmem:[%s2990_s21 + $0x2b8] sm:$0xff]  ;;  %v328_v46 = vld [vmem:[%s2990_s21 + $0x2c0] sm:$0xff]  ;;  %v3388_v10 = vmul.f32 %v324_v45, %v2998_v33  ;;  %v3391_v15 = vmul.f32 %v325_v32, %v3001_v34 }
  0x6d   : > { %4163 = vst [vmem:[#allocation50_spill] sm:$0xff] %v3340_v56  ;;  %4164 = vst [vmem:[#allocation51_spill] sm:$0xff] %v3343_v55  ;;  %v329_v47 = vld [vmem:[%s2990_s21 + $0x2c8] sm:$0xff]  ;;  %v342_v1 = vld [vmem:[%s2990_s21 + $0x330] sm:$0xff]  ;;  %v3367_v56 = vmul.f32 %v330_v24, %v2998_v33  ;;  %v3385_v24 = vmul.f32 %v335_v25, %v3017_v42 }
  0x6e   : > { %4165 = vst [vmem:[#allocation52_spill] sm:$0xff] %v3346_v54  ;;  %4166 = vst [vmem:[#allocation53_spill] sm:$0xff] %v3355_v8  ;;  %v343_v54 = vld [vmem:[%s2990_s21 + $0x338] sm:$0xff]  ;;  %v344_v55 = vld [vmem:[%s2990_s21 + $0x340] sm:$0xff]  ;;  %v3382_v8 = vmul.f32 %v334_v23, %v3014_v41  ;;  %v3403_v23 = vmul.f32 %v328_v46, %v3014_v41  ;;  %v3406_v25 = vmul.f32 %v329_v47, %v3017_v42 }
  0x6f   : > { %4167 = vst [vmem:[#allocation54_spill] sm:$0xff] %v3358_v7  ;;  %4168 = vst [vmem:[#allocation55_spill] sm:$0xff] %v3361_v2  ;;  %v345_v18 = vld [vmem:[%s2990_s21 + $0x348] sm:$0xff]  ;;  %v346_v2 = vld [vmem:[%s2990_s21 + $0x350] sm:$0xff]  ;;  %v3412_v32 = vmul.f32 %v342_v1, %v2998_v33 }
  0x70   : > { %4169 = vst [vmem:[#allocation56_spill] sm:$0xff] %v3367_v56  ;;  %4170 = vst [vmem:[#allocation57_spill] sm:$0xff] %v3370_v9  ;;  %v347_v7 = vld [vmem:[%s2990_s21 + $0x358] sm:$0xff]  ;;  %v337_v31 = vld [vmem:[%s2990_s21 + $0x308] sm:$0xff]  ;;  %v3397_v9 = vmul.f32 %v326_v37, %v3004_v35  ;;  %v3400_v56 = vmul.f32 %v327_v53, %v3007_v36  ;;  %v3418_v37 = vmul.f32 %v344_v55, %v3004_v35 }
  0x71   : > { %4171 = vst [vmem:[#allocation58_spill] sm:$0xff] %v3373_v63  ;;  %4172 = vst [vmem:[#allocation59_spill] sm:$0xff] %v3376_v0  ;;  %v336_v63 = vld [vmem:[%s2990_s21 + $0x300] sm:$0xff]  ;;  %v338_v0 = vld [vmem:[%s2990_s21 + $0x310] sm:$0xff]  ;;  %v3421_v53 = vmul.f32 %v345_v18, %v3007_v36  ;;  %v3424_v46 = vmul.f32 %v346_v2, %v3014_v41  ;;  %v3427_v47 = vmul.f32 %v347_v7, %v3017_v42 }
  0x72   : > { %4173 = vst [vmem:[#allocation60_spill] sm:$0xff] %v3385_v24  ;;  %4174 = vst [vmem:[#allocation61_spill] sm:$0xff] %v3388_v10  ;;  %v339_v45 = vld [vmem:[%s2990_s21 + $0x318] sm:$0xff]  ;;  %v340_v10 = vld [vmem:[%s2990_s21 + $0x320] sm:$0xff]  ;;  %v3433_v1 = vmul.f32 %v337_v31, %v3001_v34  ;;  %v3436_v55 = vmul.f32 %v338_v0, %v3004_v35 }
  0x73   : > { %4175 = vst [vmem:[#allocation62_spill] sm:$0xff] %v3391_v15  ;;  %4176 = vst [vmem:[#allocation63_spill] sm:$0xff] %v3406_v25  ;;  %v341_v24 = vld [vmem:[%s2990_s21 + $0x328] sm:$0xff]  ;;  %v3415_v15 = vmul.f32 %v343_v54, %v3001_v34  ;;  %v3430_v25 = vmul.f32 %v336_v63, %v2998_v33  ;;  %v3439_v18 = vmul.f32 %v339_v45, %v3007_v36 }
  0x74   : > { %v3442_v2 = vmul.f32 %v340_v10, %v3014_v41  ;;  %v3445_v7 = vmul.f32 %v341_v24, %v3017_v42 }
  0x75   : > { %4177 = vst [vmem:[#allocation64_spill] sm:$0xff] %v3415_v15 }
  0x76   : > { %4178 = vst [vmem:[#allocation65_spill] sm:$0xff] %v3442_v2  ;;  %4179 = vst [vmem:[#allocation66_spill] sm:$0xff] %v3445_v7 }
  0x9d   : > { %v826_v54 = vpop.permute.xlu1 %825  ;;  %v818_v15 = vpop.permute.xlu0 %817 }
  0x9e   : > { %v956_v33 = vadd.f32 %v826_v54, %v3036_v59  ;;  %v957_v63 = vadd.f32 %v826_v54, %v3039_v60  ;;  %v958_v34 = vadd.f32 %v826_v54, %v3042_v61  ;;  %v959_v31 = vadd.f32 %v826_v54, %v3045_v62 }
  0x9f   : > { %v960_v35 = vadd.f32 %v826_v54, %v3052_v3  ;;  %v961_v0 = vadd.f32 %v826_v54, %v3055_v4  ;;  %v944_v36 = vadd.f32 %v818_v15, %v3058_v5  ;;  %v945_v41 = vadd.f32 %v818_v15, %v3061_v6 }
  0xa0   : > { %v1148_v10 = vmul.f32 0.5, %v956_v33  ;;  %v1149_v45 = vmul.f32 0.5, %v957_v63  ;;  %v1150_v42 = vmul.f32 0.5, %v958_v34  ;;  %v1151_v24 = vmul.f32 0.5, %v959_v31 }
  0xa1   : > { %v1152_v7 = vmul.f32 0.5, %v960_v35  ;;  %v1153_v59 = vmul.f32 0.5, %v961_v0  ;;  %v946_v60 = vadd.f32 %v818_v15, %v3068_v11  ;;  %v947_v61 = vadd.f32 %v818_v15, %v3071_v12  ;;  %v830_v2 = vpop.permute.xlu1 %829  ;;  %v822_v31 = vpop.permute.xlu0 %821 }
  0xa2   : > { %2381 = vtanh.f32 %v1148_v10  ;;  %v948_v62 = vadd.f32 %v818_v15, %v3074_v13  ;;  %v949_v3 = vadd.f32 %v818_v15, %v3077_v14  ;;  %v1136_v4 = vmul.f32 0.5, %v944_v36 }
  0xa3   : > { %2383 = vtanh.f32 %v1149_v45  ;;  %v1137_v5 = vmul.f32 0.5, %v945_v41  ;;  %v1138_v6 = vmul.f32 0.5, %v946_v60  ;;  %v1139_v54 = vmul.f32 0.5, %v947_v61 }
  0xa4   : > { %2385 = vtanh.f32 %v1150_v42  ;;  %v1140_v33 = vmul.f32 0.5, %v948_v62  ;;  %v1141_v63 = vmul.f32 0.5, %v949_v3  ;;  %v962_v34 = vadd.f32 %v830_v2, %v3084_v19 }
  0xa5   : > { %2387 = vtanh.f32 %v1151_v24  ;;  %v963_v11 = vadd.f32 %v830_v2, %v3087_v20  ;;  %v964_v12 = vadd.f32 %v830_v2, %v3090_v21  ;;  %v965_v13 = vadd.f32 %v830_v2, %v3093_v22 }
  0xa6   : > { %2389 = vtanh.f32 %v1152_v7  ;;  %v966_v14 = vadd.f32 %v830_v2, %v3100_v27  ;;  %v967_v15 = vadd.f32 %v830_v2, %v3103_v28  ;;  %v1154_v35 = vmul.f32 0.5, %v962_v34  ;;  %v838_v2 = vpop.permute.xlu1 %837 }
  0xa7   : > { %2391 = vtanh.f32 %v1153_v59  ;;  %v1155_v0 = vmul.f32 0.5, %v963_v11  ;;  %v1156_v19 = vmul.f32 0.5, %v964_v12  ;;  %v1157_v36 = vmul.f32 0.5, %v965_v13 }
  0xa8   : > { %2393 = vtanh.f32 %v1136_v4  ;;  %v1158_v20 = vmul.f32 0.5, %v966_v14  ;;  %v1159_v41 = vmul.f32 0.5, %v967_v15  ;;  %v950_v21 = vadd.f32 %v822_v31, %v3106_v29 }
  0xa9   : > { %2395 = vtanh.f32 %v1137_v5  ;;  %v951_v22 = vadd.f32 %v822_v31, %v3109_v30  ;;  %v952_v27 = vadd.f32 %v822_v31, %v3116_v39  ;;  %v953_v28 = vadd.f32 %v822_v31, %v3119_v40 }
  0xaa   : > { %2397 = vtanh.f32 %v1138_v6  ;;  %v954_v7 = vadd.f32 %v822_v31, %v3122_v43  ;;  %v955_v10 = vadd.f32 %v822_v31, %v3125_v44  ;;  %v1142_v45 = vmul.f32 0.5, %v950_v21 }
  0xab   : > { %2399 = vtanh.f32 %v1139_v54  ;;  %v1143_v42 = vmul.f32 0.5, %v951_v22  ;;  %v1144_v29 = vmul.f32 0.5, %v952_v27  ;;  %v3476_v24 = vmul.f32 0.5, %v953_v28  ;;  %v834_v27 = vpop.permute.xlu0 %833 }
  0xac   : > { %v2382_v30 = vpop.eup %2381  ;;  %2401 = vtanh.f32 %v1140_v33  ;;  %v3478_v39 = vmul.f32 0.5, %v954_v7  ;;  %v3480_v40 = vmul.f32 0.5, %v955_v10  ;;  %v974_v59 = vadd.f32 %v838_v2, %v3132_v49  ;;  %v4180_v49 = vld [vmem:[#allocation7_spill] sm:$0xff] }
  0xad   : > { %v2384_v60 = vpop.eup %2383  ;;  %v1532_v61 = vmul.f32 0.5, %v2382_v30  ;;  %2403 = vtanh.f32 %v1141_v63  ;;  %v975_v43 = vadd.f32 %v838_v2, %v3135_v50  ;;  %v976_v44 = vadd.f32 %v838_v2, %v3138_v51 }
  0xae   : > { %v2386_v62 = vpop.eup %2385  ;;  %v1533_v3 = vmul.f32 0.5, %v2384_v60  ;;  %2405 = vtanh.f32 %v1154_v35  ;;  %v977_v4 = vadd.f32 %v838_v2, %v3141_v52  ;;  %v978_v5 = vadd.f32 %v838_v2, %v3148_v57 }
  0xaf   : > { %v2388_v6 = vpop.eup %2387  ;;  %v1534_v54 = vmul.f32 0.5, %v2386_v62  ;;  %v1724_v33 = vadd.f32 0.5, %v1532_v61  ;;  %2407 = vtanh.f32 %v1155_v0  ;;  %v979_v34 = vadd.f32 %v838_v2, %v4180_v49 }
  0xb0   : > { %v2390_v11 = vpop.eup %2389  ;;  %v1535_v63 = vmul.f32 0.5, %v2388_v6  ;;  %v1725_v12 = vadd.f32 0.5, %v1533_v3  ;;  %2409 = vtanh.f32 %v1156_v19  ;;  %v1166_v50 = vmul.f32 0.5, %v974_v59 }
  0xb1   : > { %v2392_v51 = vpop.eup %2391  ;;  %v1536_v13 = vmul.f32 0.5, %v2390_v11  ;;  %v1726_v31 = vadd.f32 0.5, %v1534_v54  ;;  %1917 = vst [vmem:[%s3489_s5 + $0x60] sm:$0xff] %v1724_v33  ;;  %2411 = vtanh.f32 %v1157_v36  ;;  %v1167_v52 = vmul.f32 0.5, %v975_v43  ;;  %v4181_v43 = vld [vmem:[#allocation8_spill] sm:$0xff] }
  0xb2   : > { %v2394_v57 = vpop.eup %2393  ;;  %v1537_v14 = vmul.f32 0.5, %v2392_v51  ;;  %v1727_v15 = vadd.f32 0.5, %v1535_v63  ;;  %1918 = vst.msk [vmem:[%s3489_s5 + $0x68] sm:$0xff] %vm1905_vm0, %v1725_v12  ;;  %2413 = vtanh.f32 %v1158_v20  ;;  %v1168_v35 = vmul.f32 0.5, %v976_v44 }
  0xb3   : > { %v2396_v0 = vpop.eup %2395  ;;  %v1728_v19 = vadd.f32 0.5, %v1536_v13  ;;  %1919 = vst [vmem:[%s3489_s5 + $0x70] sm:$0xff] %v1726_v31  ;;  %v1520_v21 = vmul.f32 0.5, %v2394_v57  ;;  %2415 = vtanh.f32 %v1159_v41  ;;  %v1169_v22 = vmul.f32 0.5, %v977_v4  ;;  %v4182_v4 = vld [vmem:[#allocation9_spill] sm:$0xff]  ;;  %v4185_v31 = vld [vmem:[#allocation12_spill] sm:$0xff] }
  0xb4   : > { %v2398_v28 = vpop.eup %2397  ;;  %v1729_v36 = vadd.f32 0.5, %v1537_v14  ;;  %1920 = vst.msk [vmem:[%s3489_s5 + $0x78] sm:$0xff] %vm1905_vm0, %v1727_v15  ;;  %v1521_v2 = vmul.f32 0.5, %v2396_v0  ;;  %2417 = vtanh.f32 %v1142_v45  ;;  %v1170_v7 = vmul.f32 0.5, %v978_v5  ;;  %v4186_v0 = vld [vmem:[#allocation13_spill] sm:$0xff] }
  0xb5   : > { %v2400_v10 = vpop.eup %2399  ;;  %1921 = vst [vmem:[%s3489_s5 + $0x80] sm:$0xff] %v1728_v19  ;;  %v1522_v20 = vmul.f32 0.5, %v2398_v28  ;;  %v1712_v30 = vadd.f32 0.5, %v1520_v21  ;;  %2419 = vtanh.f32 %v1143_v42  ;;  %v1171_v59 = vmul.f32 0.5, %v979_v34 }
  0xb6   : > { %v2402_v60 = vpop.eup %2401  ;;  %1922 = vst.msk [vmem:[%s3489_s5 + $0x88] sm:$0xff] %vm1905_vm0, %v1729_v36  ;;  %v1523_v41 = vmul.f32 0.5, %v2400_v10  ;;  %v1713_v61 = vadd.f32 0.5, %v1521_v2  ;;  %2421 = vtanh.f32 %v1144_v29  ;;  %v968_v44 = vadd.f32 %v834_v27, %v4181_v43  ;;  %v4183_v29 = vld [vmem:[#allocation10_spill] sm:$0xff] }
  0xb7   : > { %v2404_v62 = vpop.eup %2403  ;;  %v1524_v45 = vmul.f32 0.5, %v2402_v60  ;;  %v1714_v3 = vadd.f32 0.5, %v1522_v20  ;;  %1904 = vst [vmem:[%s3489_s5] sm:$0xff] %v1712_v30  ;;  %2423 = vtanh.f32 %v3476_v24  ;;  %v969_v42 = vadd.f32 %v834_v27, %v4182_v4  ;;  %v4184_v24 = vld [vmem:[#allocation11_spill] sm:$0xff] }
  0xb8   : > { %v2406_v5 = vpop.eup %2405  ;;  %v1525_v6 = vmul.f32 0.5, %v2404_v62  ;;  %v1715_v54 = vadd.f32 0.5, %v1523_v41  ;;  %1906 = vst.msk [vmem:[%s3489_s5 + $0x8] sm:$0xff] %vm1905_vm0, %v1713_v61  ;;  %2425 = vtanh.f32 %v3478_v39  ;;  %v970_v33 = vadd.f32 %v834_v27, %v4183_v29  ;;  %v846_v41 = vpop.permute.xlu1 %845 }
  0xb9   : > { %v2408_v49 = vpop.eup %2407  ;;  %v1716_v34 = vadd.f32 0.5, %v1524_v45  ;;  %1907 = vst [vmem:[%s3489_s5 + $0x10] sm:$0xff] %v1714_v3  ;;  %v1538_v11 = vmul.f32 0.5, %v2406_v5  ;;  %2427 = vtanh.f32 %v3480_v40  ;;  %v971_v63 = vadd.f32 %v834_v27, %v4184_v24 }
  0xba   : > { %v2410_v12 = vpop.eup %2409  ;;  %v1717_v51 = vadd.f32 0.5, %v1525_v6  ;;  %1908 = vst.msk [vmem:[%s3489_s5 + $0x18] sm:$0xff] %vm1905_vm0, %v1715_v54  ;;  %v1539_v13 = vmul.f32 0.5, %v2408_v49  ;;  %2429 = vtanh.f32 %v1166_v50  ;;  %v972_v57 = vadd.f32 %v834_v27, %v4185_v31  ;;  %v4187_v6 = vld [vmem:[#allocation14_spill] sm:$0xff]  ;;  %v4188_v49 = vld [vmem:[#allocation15_spill] sm:$0xff] }
  0xbb   : > { %v2412_v39 = vpop.eup %2411  ;;  %1909 = vst [vmem:[%s3489_s5 + $0x20] sm:$0xff] %v1716_v34  ;;  %v1540_v14 = vmul.f32 0.5, %v2410_v12  ;;  %v1730_v15 = vadd.f32 0.5, %v1538_v11  ;;  %2431 = vtanh.f32 %v1167_v52  ;;  %v973_v19 = vadd.f32 %v834_v27, %v4186_v0  ;;  %v4189_v12 = vld [vmem:[#allocation16_spill] sm:$0xff] }
  0xbc   : > { %v2414_v40 = vpop.eup %2413  ;;  %1910 = vst.msk [vmem:[%s3489_s5 + $0x28] sm:$0xff] %vm1905_vm0, %v1717_v51  ;;  %v1541_v21 = vmul.f32 0.5, %v2412_v39  ;;  %v1731_v28 = vadd.f32 0.5, %v1539_v13  ;;  %2433 = vtanh.f32 %v1168_v35  ;;  %v1160_v36 = vmul.f32 0.5, %v968_v44  ;;  %v4190_v39 = vld [vmem:[#allocation17_spill] sm:$0xff] }
  0xbd   : > { %v2416_v50 = vpop.eup %2415  ;;  %v1542_v2 = vmul.f32 0.5, %v2414_v40  ;;  %v1732_v10 = vadd.f32 0.5, %v1540_v14  ;;  %1923 = vst [vmem:[%s3489_s5 + $0x90] sm:$0xff] %v1730_v15  ;;  %2435 = vtanh.f32 %v1169_v22  ;;  %v1161_v20 = vmul.f32 0.5, %v969_v42  ;;  %v4191_v40 = vld [vmem:[#allocation18_spill] sm:$0xff] }
  0xbe   : > { %v2418_v30 = vpop.eup %2417  ;;  %v1543_v52 = vmul.f32 0.5, %v2416_v50  ;;  %v1733_v60 = vadd.f32 0.5, %v1541_v21  ;;  %1924 = vst.msk [vmem:[%s3489_s5 + $0x98] sm:$0xff] %vm1905_vm0, %v1731_v28  ;;  %2437 = vtanh.f32 %v1170_v7  ;;  %v1162_v27 = vmul.f32 0.5, %v970_v33 }
  0xbf   : > { %v2420_v61 = vpop.eup %2419  ;;  %v1734_v35 = vadd.f32 0.5, %v1542_v2  ;;  %1925 = vst [vmem:[%s3489_s5 + $0xa0] sm:$0xff] %v1732_v10  ;;  %v1526_v43 = vmul.f32 0.5, %v2418_v30  ;;  %2439 = vtanh.f32 %v1171_v59  ;;  %v1163_v44 = vmul.f32 0.5, %v971_v63  ;;  %v4192_v2 = vld [vmem:[#allocation19_spill] sm:$0xff] }
  0xc0   : > { %v2422_v62 = vpop.eup %2421  ;;  %v1735_v22 = vadd.f32 0.5, %v1543_v52  ;;  %1926 = vst.msk [vmem:[%s3489_s5 + $0xa8] sm:$0xff] %vm1905_vm0, %v1733_v60  ;;  %v1527_v45 = vmul.f32 0.5, %v2420_v61  ;;  %v1164_v3 = vmul.f32 0.5, %v972_v57  ;;  %v1165_v4 = vmul.f32 0.5, %v973_v19  ;;  %v842_v61 = vpop.permute.xlu0 %841 }
  0xc1   : > { %v2424_v42 = vpop.eup %2423  ;;  %1927 = vst [vmem:[%s3489_s5 + $0xb0] sm:$0xff] %v1734_v35  ;;  %v1528_v7 = vmul.f32 0.5, %v2422_v62  ;;  %v1718_v5 = vadd.f32 0.5, %v1526_v43  ;;  %2441 = vtanh.f32 %v1160_v36  ;;  %v986_v54 = vadd.f32 %v846_v41, %v4187_v6  ;;  %v4193_v6 = vld [vmem:[#allocation20_spill] sm:$0xff] }
  0xc2   : > { %v2426_v29 = vpop.eup %2425  ;;  %1928 = vst.msk [vmem:[%s3489_s5 + $0xb8] sm:$0xff] %vm1905_vm0, %v1735_v22  ;;  %v1529_v59 = vmul.f32 0.5, %v2424_v42  ;;  %v1719_v33 = vadd.f32 0.5, %v1527_v45  ;;  %2443 = vtanh.f32 %v1161_v20  ;;  %v987_v34 = vadd.f32 %v846_v41, %v4188_v49 }
  0xc3   : > { %v2428_v11 = vpop.eup %2427  ;;  %v1530_v24 = vmul.f32 0.5, %v2426_v29  ;;  %v1720_v63 = vadd.f32 0.5, %v1528_v7  ;;  %1911 = vst [vmem:[%s3489_s5 + $0x30] sm:$0xff] %v1718_v5  ;;  %2445 = vtanh.f32 %v1162_v27  ;;  %v988_v51 = vadd.f32 %v846_v41, %v4189_v12 }
  0xc4   : > { %v2430_v13 = vpop.eup %2429  ;;  %v1531_v31 = vmul.f32 0.5, %v2428_v11  ;;  %v1721_v57 = vadd.f32 0.5, %v1529_v59  ;;  %1912 = vst.msk [vmem:[%s3489_s5 + $0x38] sm:$0xff] %vm1905_vm0, %v1719_v33  ;;  %2447 = vtanh.f32 %v1163_v44  ;;  %v989_v14 = vadd.f32 %v846_v41, %v4190_v39  ;;  %v4194_v33 = vld [vmem:[#allocation21_spill] sm:$0xff]  ;;  %v4197_v39 = vld [vmem:[#allocation24_spill] sm:$0xff] }
  0xc5   : > { %v2432_v15 = vpop.eup %2431  ;;  %v1722_v0 = vadd.f32 0.5, %v1530_v24  ;;  %1913 = vst [vmem:[%s3489_s5 + $0x40] sm:$0xff] %v1720_v63  ;;  %v1550_v19 = vmul.f32 0.5, %v2430_v13  ;;  %2449 = vtanh.f32 %v1164_v3  ;;  %v990_v21 = vadd.f32 %v846_v41, %v4191_v40 }
  0xc6   : > { %v2434_v28 = vpop.eup %2433  ;;  %v1723_v36 = vadd.f32 0.5, %v1531_v31  ;;  %1914 = vst.msk [vmem:[%s3489_s5 + $0x48] sm:$0xff] %vm1905_vm0, %v1721_v57  ;;  %v1551_v50 = vmul.f32 0.5, %v2432_v15  ;;  %2451 = vtanh.f32 %v1165_v4  ;;  %v991_v10 = vadd.f32 %v846_v41, %v4192_v2  ;;  %v4198_v15 = vld [vmem:[#allocation25_spill] sm:$0xff] }
  0xc7   : > { %v2436_v20 = vpop.eup %2435  ;;  %1915 = vst [vmem:[%s3489_s5 + $0x50] sm:$0xff] %v1722_v0  ;;  %v1552_v30 = vmul.f32 0.5, %v2434_v28  ;;  %v1742_v52 = vadd.f32 0.5, %v1550_v19  ;;  %v1178_v60 = vmul.f32 0.5, %v986_v54  ;;  %v1179_v27 = vmul.f32 0.5, %v987_v34  ;;  %v4195_v34 = vld [vmem:[#allocation22_spill] sm:$0xff] }
  0xc8   : > { %v2438_v35 = vpop.eup %2437  ;;  %1916 = vst.msk [vmem:[%s3489_s5 + $0x58] sm:$0xff] %vm1905_vm0, %v1723_v36  ;;  %v1553_v43 = vmul.f32 0.5, %v2436_v20  ;;  %v1743_v44 = vadd.f32 0.5, %v1551_v50  ;;  %v1180_v62 = vmul.f32 0.5, %v988_v51  ;;  %v1181_v22 = vmul.f32 0.5, %v989_v14  ;;  %v4196_v51 = vld [vmem:[#allocation23_spill] sm:$0xff]  ;;  %v854_v20 = vpop.permute.xlu1 %853 }
  0xc9   : > { %v2440_v45 = vpop.eup %2439  ;;  %v1554_v3 = vmul.f32 0.5, %v2438_v35  ;;  %v1744_v41 = vadd.f32 0.5, %v1552_v30  ;;  %1935 = vst [vmem:[%s3489_s5 + $0xf0] sm:$0xff] %v1742_v52  ;;  %v1182_v4 = vmul.f32 0.5, %v990_v21  ;;  %v1183_v42 = vmul.f32 0.5, %v991_v10 }
  0xca   : > { %v1555_v7 = vmul.f32 0.5, %v2440_v45  ;;  %v1745_v5 = vadd.f32 0.5, %v1553_v43  ;;  %1936 = vst.msk [vmem:[%s3489_s5 + $0xf8] sm:$0xff] %vm1905_vm0, %v1743_v44  ;;  %2453 = vtanh.f32 %v1178_v60  ;;  %v980_v54 = vadd.f32 %v842_v61, %v4193_v6  ;;  %v4199_v45 = vld [vmem:[#allocation26_spill] sm:$0xff]  ;;  %v4202_v6 = vld [vmem:[#allocation29_spill] sm:$0xff] }
  0xcb   : > { %v2442_v29 = vpop.eup %2441  ;;  %v1746_v59 = vadd.f32 0.5, %v1554_v3  ;;  %1937 = vst [vmem:[%s3489_s5 + $0x100] sm:$0xff] %v1744_v41  ;;  %2455 = vtanh.f32 %v1179_v27  ;;  %v981_v49 = vadd.f32 %v842_v61, %v4194_v33  ;;  %v982_v11 = vadd.f32 %v842_v61, %v4195_v34  ;;  %v4200_v41 = vld [vmem:[#allocation27_spill] sm:$0xff] }
  0xcc   : > { %v2444_v24 = vpop.eup %2443  ;;  %v1747_v63 = vadd.f32 0.5, %v1555_v7  ;;  %1938 = vst.msk [vmem:[%s3489_s5 + $0x108] sm:$0xff] %vm1905_vm0, %v1745_v5  ;;  %v1544_v12 = vmul.f32 0.5, %v2442_v29  ;;  %2457 = vtanh.f32 %v1180_v62  ;;  %v983_v13 = vadd.f32 %v842_v61, %v4196_v51  ;;  %v4201_v7 = vld [vmem:[#allocation28_spill] sm:$0xff] }
  0xcd   : > { %v2446_v31 = vpop.eup %2445  ;;  %1939 = vst [vmem:[%s3489_s5 + $0x110] sm:$0xff] %v1746_v59  ;;  %v1545_v57 = vmul.f32 0.5, %v2444_v24  ;;  %2459 = vtanh.f32 %v1181_v22  ;;  %v984_v14 = vadd.f32 %v842_v61, %v4197_v39  ;;  %v985_v0 = vadd.f32 %v842_v61, %v4198_v15  ;;  %v4203_v59 = vld [vmem:[#allocation30_spill] sm:$0xff] }
  0xce   : > { %v2448_v19 = vpop.eup %2447  ;;  %1940 = vst.msk [vmem:[%s3489_s5 + $0x118] sm:$0xff] %vm1905_vm0, %v1747_v63  ;;  %v1546_v40 = vmul.f32 0.5, %v2446_v31  ;;  %v1736_v21 = vadd.f32 0.5, %v1544_v12  ;;  %2461 = vtanh.f32 %v1182_v4  ;;  %v1172_v28 = vmul.f32 0.5, %v980_v54 }
  0xcf   : > { %v2450_v36 = vpop.eup %2449  ;;  %v1547_v50 = vmul.f32 0.5, %v2448_v19  ;;  %v1737_v2 = vadd.f32 0.5, %v1545_v57  ;;  %2463 = vtanh.f32 %v1183_v42  ;;  %v1173_v10 = vmul.f32 0.5, %v981_v49  ;;  %v4204_v49 = vld [vmem:[#allocation31_spill] sm:$0xff] }
  0xd0   : > { %v2452_v30 = vpop.eup %2451  ;;  %v1548_v52 = vmul.f32 0.5, %v2450_v36  ;;  %v1738_v60 = vadd.f32 0.5, %v1546_v40  ;;  %1929 = vst [vmem:[%s3489_s5 + $0xc0] sm:$0xff] %v1736_v21  ;;  %v1174_v27 = vmul.f32 0.5, %v982_v11  ;;  %v1175_v61 = vmul.f32 0.5, %v983_v13  ;;  %v850_v13 = vpop.permute.xlu0 %849 }
  0xd1   : > { %v1549_v35 = vmul.f32 0.5, %v2452_v30  ;;  %v1739_v43 = vadd.f32 0.5, %v1547_v50  ;;  %1930 = vst.msk [vmem:[%s3489_s5 + $0xc8] sm:$0xff] %vm1905_vm0, %v1737_v2  ;;  %v1176_v44 = vmul.f32 0.5, %v984_v14  ;;  %v1177_v62 = vmul.f32 0.5, %v985_v0  ;;  %v4205_v50 = vld [vmem:[#allocation32_spill] sm:$0xff] }
  0xd2   : > { %v1740_v22 = vadd.f32 0.5, %v1548_v52  ;;  %1931 = vst [vmem:[%s3489_s5 + $0xd0] sm:$0xff] %v1738_v60  ;;  %2465 = vtanh.f32 %v1172_v28  ;;  %v998_v3 = vadd.f32 %v854_v20, %v4199_v45  ;;  %v999_v4 = vadd.f32 %v854_v20, %v4200_v41  ;;  %v4206_v52 = vld [vmem:[#allocation33_spill] sm:$0xff]  ;;  %v4209_v45 = vld [vmem:[#allocation36_spill] sm:$0xff] }
  0xd3   : > { %v1741_v42 = vadd.f32 0.5, %v1549_v35  ;;  %1932 = vst.msk [vmem:[%s3489_s5 + $0xd8] sm:$0xff] %vm1905_vm0, %v1739_v43  ;;  %2467 = vtanh.f32 %v1173_v10  ;;  %v1000_v5 = vadd.f32 %v854_v20, %v4201_v7  ;;  %v1001_v54 = vadd.f32 %v854_v20, %v4202_v6  ;;  %v4207_v35 = vld [vmem:[#allocation34_spill] sm:$0xff]  ;;  %v862_v6 = vpop.permute.xlu1 %861 }
  0xd4   : > { %v2454_v29 = vpop.eup %2453  ;;  %1933 = vst [vmem:[%s3489_s5 + $0xe0] sm:$0xff] %v1740_v22  ;;  %2469 = vtanh.f32 %v1174_v27  ;;  %v1002_v33 = vadd.f32 %v854_v20, %v4203_v59  ;;  %v1003_v34 = vadd.f32 %v854_v20, %v4204_v49  ;;  %v1190_v11 = vmul.f32 0.5, %v998_v3 }
  0xd5   : > { %v2456_v24 = vpop.eup %2455  ;;  %1934 = vst.msk [vmem:[%s3489_s5 + $0xe8] sm:$0xff] %vm1905_vm0, %v1741_v42  ;;  %v1562_v63 = vmul.f32 0.5, %v2454_v29  ;;  %2471 = vtanh.f32 %v1175_v61  ;;  %v1191_v12 = vmul.f32 0.5, %v999_v4  ;;  %v1192_v51 = vmul.f32 0.5, %v1000_v5  ;;  %v4210_v42 = vld [vmem:[#allocation37_spill] sm:$0xff] }
  0xd6   : > { %v2458_v31 = vpop.eup %2457  ;;  %v1563_v57 = vmul.f32 0.5, %v2456_v24  ;;  %2473 = vtanh.f32 %v1176_v44  ;;  %v1193_v39 = vmul.f32 0.5, %v1001_v54  ;;  %v1194_v14 = vmul.f32 0.5, %v1002_v33 }
  0xd7   : > { %v2460_v15 = vpop.eup %2459  ;;  %v1564_v0 = vmul.f32 0.5, %v2458_v31  ;;  %v1754_v19 = vadd.f32 0.5, %v1562_v63  ;;  %2475 = vtanh.f32 %v1177_v62  ;;  %v1195_v40 = vmul.f32 0.5, %v1003_v34  ;;  %v4208_v62 = vld [vmem:[#allocation35_spill] sm:$0xff] }
  0xd8   : > { %v2462_v21 = vpop.eup %2461  ;;  %v1565_v28 = vmul.f32 0.5, %v2460_v15  ;;  %v1755_v36 = vadd.f32 0.5, %v1563_v57  ;;  %2477 = vtanh.f32 %v1190_v11  ;;  %v992_v2 = vadd.f32 %v850_v13, %v4205_v50  ;;  %v4211_v15 = vld [vmem:[#allocation38_spill] sm:$0xff] }
  0xd9   : > { %v2464_v10 = vpop.eup %2463  ;;  %v1566_v20 = vmul.f32 0.5, %v2462_v21  ;;  %v1756_v30 = vadd.f32 0.5, %v1564_v0  ;;  %1947 = vst [vmem:[%s3489_s5 + $0x150] sm:$0xff] %v1754_v19  ;;  %2479 = vtanh.f32 %v1191_v12  ;;  %v993_v60 = vadd.f32 %v850_v13, %v4206_v52 }
  0xda   : > { %v1567_v27 = vmul.f32 0.5, %v2464_v10  ;;  %v1757_v61 = vadd.f32 0.5, %v1565_v28  ;;  %1948 = vst.msk [vmem:[%s3489_s5 + $0x158] sm:$0xff] %vm1905_vm0, %v1755_v36  ;;  %2481 = vtanh.f32 %v1192_v51  ;;  %v994_v43 = vadd.f32 %v850_v13, %v4207_v35  ;;  %v4212_v28 = vld [vmem:[#allocation39_spill] sm:$0xff] }
  0xdb   : > { %v1758_v44 = vadd.f32 0.5, %v1566_v20  ;;  %1949 = vst [vmem:[%s3489_s5 + $0x160] sm:$0xff] %v1756_v30  ;;  %2483 = vtanh.f32 %v1193_v39  ;;  %v995_v22 = vadd.f32 %v850_v13, %v4208_v62  ;;  %v996_v3 = vadd.f32 %v850_v13, %v4209_v45 }
  0xdc   : > { %v2466_v41 = vpop.eup %2465  ;;  %v1759_v4 = vadd.f32 0.5, %v1567_v27  ;;  %1950 = vst.msk [vmem:[%s3489_s5 + $0x168] sm:$0xff] %vm1905_vm0, %v1757_v61  ;;  %2485 = vtanh.f32 %v1194_v14  ;;  %v997_v7 = vadd.f32 %v850_v13, %v4210_v42  ;;  %v1184_v5 = vmul.f32 0.5, %v992_v2  ;;  %v858_v42 = vpop.permute.xlu0 %857 }
  0xdd   : > { %v2468_v54 = vpop.eup %2467  ;;  %1951 = vst [vmem:[%s3489_s5 + $0x170] sm:$0xff] %v1758_v44  ;;  %v1556_v29 = vmul.f32 0.5, %v2466_v41  ;;  %2487 = vtanh.f32 %v1195_v40  ;;  %v1185_v59 = vmul.f32 0.5, %v993_v60  ;;  %v1186_v33 = vmul.f32 0.5, %v994_v43  ;;  %v4214_v44 = vld [vmem:[#allocation41_spill] sm:$0xff] }
  0xde   : > { %v2470_v49 = vpop.eup %2469  ;;  %1952 = vst.msk [vmem:[%s3489_s5 + $0x178] sm:$0xff] %vm1905_vm0, %v1759_v4  ;;  %v1557_v34 = vmul.f32 0.5, %v2468_v54  ;;  %v1187_v11 = vmul.f32 0.5, %v995_v22  ;;  %v1188_v24 = vmul.f32 0.5, %v996_v3  ;;  %v1189_v63 = vmul.f32 0.5, %v997_v7 }
  0xdf   : > { %v2472_v12 = vpop.eup %2471  ;;  %v1558_v51 = vmul.f32 0.5, %v2470_v49  ;;  %v1748_v31 = vadd.f32 0.5, %v1556_v29  ;;  %2489 = vtanh.f32 %v1184_v5  ;;  %v1010_v13 = vadd.f32 %v862_v6, %v3276_v58  ;;  %v4213_v58 = vld [vmem:[#allocation40_spill] sm:$0xff] }
  0xe0   : > { %v2474_v57 = vpop.eup %2473  ;;  %v1559_v39 = vmul.f32 0.5, %v2472_v12  ;;  %v1749_v14 = vadd.f32 0.5, %v1557_v34  ;;  %2491 = vtanh.f32 %v1185_v59  ;;  %v1011_v0 = vadd.f32 %v862_v6, %v4211_v15 }
  0xe1   : > { %v2476_v19 = vpop.eup %2475  ;;  %v1560_v40 = vmul.f32 0.5, %v2474_v57  ;;  %v1750_v21 = vadd.f32 0.5, %v1558_v51  ;;  %1941 = vst [vmem:[%s3489_s5 + $0x120] sm:$0xff] %v1748_v31  ;;  %2493 = vtanh.f32 %v1186_v33  ;;  %v1012_v36 = vadd.f32 %v862_v6, %v4212_v28 }
  0xe2   : > { %v2478_v50 = vpop.eup %2477  ;;  %v1561_v2 = vmul.f32 0.5, %v2476_v19  ;;  %v1751_v10 = vadd.f32 0.5, %v1559_v39  ;;  %1942 = vst.msk [vmem:[%s3489_s5 + $0x128] sm:$0xff] %vm1905_vm0, %v1749_v14  ;;  %2495 = vtanh.f32 %v1187_v11  ;;  %v1013_v20 = vadd.f32 %v862_v6, %v4213_v58  ;;  %v4217_v19 = vld [vmem:[#allocation44_spill] sm:$0xff] }
  0xe3   : > { %v2480_v30 = vpop.eup %2479  ;;  %v1752_v52 = vadd.f32 0.5, %v1560_v40  ;;  %1943 = vst [vmem:[%s3489_s5 + $0x130] sm:$0xff] %v1750_v21  ;;  %v1574_v60 = vmul.f32 0.5, %v2478_v50  ;;  %2497 = vtanh.f32 %v1188_v24  ;;  %v1014_v27 = vadd.f32 %v862_v6, %v3292_v17 }
  0xe4   : > { %v2482_v61 = vpop.eup %2481  ;;  %v1753_v35 = vadd.f32 0.5, %v1561_v2  ;;  %1944 = vst.msk [vmem:[%s3489_s5 + $0x138] sm:$0xff] %vm1905_vm0, %v1751_v10  ;;  %v1575_v43 = vmul.f32 0.5, %v2480_v30  ;;  %2499 = vtanh.f32 %v1189_v63  ;;  %v1015_v62 = vadd.f32 %v862_v6, %v4214_v44  ;;  %v4215_v63 = vld [vmem:[#allocation42_spill] sm:$0xff] }
  0xe5   : > { %v2484_v22 = vpop.eup %2483  ;;  %1945 = vst [vmem:[%s3489_s5 + $0x140] sm:$0xff] %v1752_v52  ;;  %v1576_v45 = vmul.f32 0.5, %v2482_v61  ;;  %v1766_v3 = vadd.f32 0.5, %v1574_v60  ;;  %v1202_v41 = vmul.f32 0.5, %v1010_v13  ;;  %v1203_v4 = vmul.f32 0.5, %v1011_v0  ;;  %v4216_v13 = vld [vmem:[#allocation43_spill] sm:$0xff] }
  0xe6   : > { %v2486_v7 = vpop.eup %2485  ;;  %1946 = vst.msk [vmem:[%s3489_s5 + $0x148] sm:$0xff] %vm1905_vm0, %v1753_v35  ;;  %v1577_v17 = vmul.f32 0.5, %v2484_v22  ;;  %v1767_v5 = vadd.f32 0.5, %v1575_v43  ;;  %v1204_v54 = vmul.f32 0.5, %v1012_v36  ;;  %v1205_v29 = vmul.f32 0.5, %v1013_v20  ;;  %v4218_v36 = vld [vmem:[#allocation45_spill] sm:$0xff]  ;;  %v870_v35 = vpop.permute.xlu1 %869 }
  0xe7   : > { %v2488_v59 = vpop.eup %2487  ;;  %v1578_v33 = vmul.f32 0.5, %v2486_v7  ;;  %v1768_v6 = vadd.f32 0.5, %v1576_v45  ;;  %1959 = vst [vmem:[%s3489_s5 + $0x1b0] sm:$0xff] %v1766_v3  ;;  %v1206_v49 = vmul.f32 0.5, %v1014_v27  ;;  %v1207_v34 = vmul.f32 0.5, %v1015_v62  ;;  %v4219_v2 = vld [vmem:[#allocation46_spill] sm:$0xff] }
  0xe8   : > { %v1579_v11 = vmul.f32 0.5, %v2488_v59  ;;  %v1769_v24 = vadd.f32 0.5, %v1577_v17  ;;  %1960 = vst.msk [vmem:[%s3489_s5 + $0x1b8] sm:$0xff] %vm1905_vm0, %v1767_v5  ;;  %2501 = vtanh.f32 %v1202_v41  ;;  %v1004_v12 = vadd.f32 %v858_v42, %v4215_v63  ;;  %v4220_v5 = vld [vmem:[#allocation47_spill] sm:$0xff]  ;;  %v4221_v59 = vld [vmem:[#allocation48_spill] sm:$0xff] }
  0xe9   : > { %v2490_v51 = vpop.eup %2489  ;;  %v1770_v31 = vadd.f32 0.5, %v1578_v33  ;;  %1961 = vst [vmem:[%s3489_s5 + $0x1c0] sm:$0xff] %v1768_v6  ;;  %2503 = vtanh.f32 %v1203_v4  ;;  %v1005_v57 = vadd.f32 %v858_v42, %v4216_v13  ;;  %v1006_v39 = vadd.f32 %v858_v42, %v3307_v16  ;;  %v4222_v6 = vld [vmem:[#allocation49_spill] sm:$0xff] }
  0xea   : > { %v2492_v14 = vpop.eup %2491  ;;  %v1771_v15 = vadd.f32 0.5, %v1579_v11  ;;  %1962 = vst.msk [vmem:[%s3489_s5 + $0x1c8] sm:$0xff] %vm1905_vm0, %v1769_v24  ;;  %v1568_v0 = vmul.f32 0.5, %v2490_v51  ;;  %2505 = vtanh.f32 %v1204_v54  ;;  %v1007_v40 = vadd.f32 %v858_v42, %v4217_v19  ;;  %v4223_v24 = vld [vmem:[#allocation50_spill] sm:$0xff] }
  0xeb   : > { %v2494_v21 = vpop.eup %2493  ;;  %1963 = vst [vmem:[%s3489_s5 + $0x1d0] sm:$0xff] %v1770_v31  ;;  %v1569_v28 = vmul.f32 0.5, %v2492_v14  ;;  %2507 = vtanh.f32 %v1205_v29  ;;  %v1008_v50 = vadd.f32 %v858_v42, %v4218_v36  ;;  %v1009_v10 = vadd.f32 %v858_v42, %v4219_v2  ;;  %v4224_v2 = vld [vmem:[#allocation51_spill] sm:$0xff] }
  0xec   : > { %v2496_v58 = vpop.eup %2495  ;;  %1964 = vst.msk [vmem:[%s3489_s5 + $0x1d8] sm:$0xff] %vm1905_vm0, %v1771_v15  ;;  %v1570_v16 = vmul.f32 0.5, %v2494_v21  ;;  %v1760_v20 = vadd.f32 0.5, %v1568_v0  ;;  %2509 = vtanh.f32 %v1206_v49  ;;  %v1196_v30 = vmul.f32 0.5, %v1004_v12 }
  0xed   : > { %v2498_v52 = vpop.eup %2497  ;;  %v1571_v60 = vmul.f32 0.5, %v2496_v58  ;;  %v1761_v27 = vadd.f32 0.5, %v1569_v28  ;;  %2511 = vtanh.f32 %v1207_v34  ;;  %v1197_v61 = vmul.f32 0.5, %v1005_v57  ;;  %v866_v57 = vpop.permute.xlu0 %865 }
  0xee   : > { %v2500_v43 = vpop.eup %2499  ;;  %v1572_v44 = vmul.f32 0.5, %v2498_v52  ;;  %v1762_v62 = vadd.f32 0.5, %v1570_v16  ;;  %1953 = vst [vmem:[%s3489_s5 + $0x180] sm:$0xff] %v1760_v20  ;;  %v1198_v22 = vmul.f32 0.5, %v1006_v39  ;;  %v1199_v45 = vmul.f32 0.5, %v1007_v40 }
  0xef   : > { %v1573_v3 = vmul.f32 0.5, %v2500_v43  ;;  %v1763_v41 = vadd.f32 0.5, %v1571_v60  ;;  %1954 = vst.msk [vmem:[%s3489_s5 + $0x188] sm:$0xff] %vm1905_vm0, %v1761_v27  ;;  %v1200_v4 = vmul.f32 0.5, %v1008_v50  ;;  %v1201_v42 = vmul.f32 0.5, %v1009_v10  ;;  %v4226_v43 = vld [vmem:[#allocation53_spill] sm:$0xff] }
  0xf0   : > { %v1764_v7 = vadd.f32 0.5, %v1572_v44  ;;  %1955 = vst [vmem:[%s3489_s5 + $0x190] sm:$0xff] %v1762_v62  ;;  %2513 = vtanh.f32 %v1196_v30  ;;  %v1022_v17 = vadd.f32 %v870_v35, %v3322_v26  ;;  %v1023_v54 = vadd.f32 %v870_v35, %v4220_v5  ;;  %v4225_v30 = vld [vmem:[#allocation52_spill] sm:$0xff]  ;;  %v4227_v62 = vld [vmem:[#allocation54_spill] sm:$0xff] }
  0xf1   : > { %v1765_v29 = vadd.f32 0.5, %v1573_v3  ;;  %1956 = vst.msk [vmem:[%s3489_s5 + $0x198] sm:$0xff] %vm1905_vm0, %v1763_v41  ;;  %2515 = vtanh.f32 %v1197_v61  ;;  %v1024_v33 = vadd.f32 %v870_v35, %v4221_v59  ;;  %v1025_v49 = vadd.f32 %v870_v35, %v4222_v6  ;;  %v4228_v41 = vld [vmem:[#allocation55_spill] sm:$0xff] }
  0xf2   : > { %v2502_v34 = vpop.eup %2501  ;;  %1957 = vst [vmem:[%s3489_s5 + $0x1a0] sm:$0xff] %v1764_v7  ;;  %2517 = vtanh.f32 %v1198_v22  ;;  %v1026_v11 = vadd.f32 %v870_v35, %v3337_v38  ;;  %v1027_v63 = vadd.f32 %v870_v35, %v4223_v24  ;;  %v1214_v12 = vmul.f32 0.5, %v1022_v17  ;;  %v878_v7 = vpop.permute.xlu1 %877 }
  0xf3   : > { %v2504_v51 = vpop.eup %2503  ;;  %1958 = vst.msk [vmem:[%s3489_s5 + $0x1a8] sm:$0xff] %vm1905_vm0, %v1765_v29  ;;  %v1586_v26 = vmul.f32 0.5, %v2502_v34  ;;  %2519 = vtanh.f32 %v1199_v45  ;;  %v1215_v31 = vmul.f32 0.5, %v1023_v54  ;;  %v1216_v13 = vmul.f32 0.5, %v1024_v33 }
  0xf4   : > { %v2506_v39 = vpop.eup %2505  ;;  %v1587_v14 = vmul.f32 0.5, %v2504_v51  ;;  %2521 = vtanh.f32 %v1200_v4  ;;  %v1217_v15 = vmul.f32 0.5, %v1025_v49  ;;  %v1218_v0 = vmul.f32 0.5, %v1026_v11 }
  0xf5   : > { %v2508_v19 = vpop.eup %2507  ;;  %v1588_v40 = vmul.f32 0.5, %v2506_v39  ;;  %v1778_v38 = vadd.f32 0.5, %v1586_v26  ;;  %2523 = vtanh.f32 %v1201_v42  ;;  %v1219_v21 = vmul.f32 0.5, %v1027_v63  ;;  %v4229_v63 = vld [vmem:[#allocation56_spill] sm:$0xff] }
  0xf6   : > { %v2510_v28 = vpop.eup %2509  ;;  %v1589_v36 = vmul.f32 0.5, %v2508_v19  ;;  %v1779_v50 = vadd.f32 0.5, %v1587_v14  ;;  %2525 = vtanh.f32 %v1214_v12  ;;  %v1016_v10 = vadd.f32 %v866_v57, %v4224_v2 }
  0xf7   : > { %v2512_v58 = vpop.eup %2511  ;;  %v1590_v16 = vmul.f32 0.5, %v2510_v28  ;;  %v1780_v20 = vadd.f32 0.5, %v1588_v40  ;;  %1971 = vst [vmem:[%s3489_s5 + $0x210] sm:$0xff] %v1778_v38  ;;  %2527 = vtanh.f32 %v1215_v31  ;;  %v1017_v52 = vadd.f32 %v866_v57, %v4225_v30  ;;  %v4232_v28 = vld [vmem:[#allocation59_spill] sm:$0xff] }
  0xf8   : > { %v1591_v60 = vmul.f32 0.5, %v2512_v58  ;;  %v1781_v27 = vadd.f32 0.5, %v1589_v36  ;;  %1972 = vst.msk [vmem:[%s3489_s5 + $0x218] sm:$0xff] %vm1905_vm0, %v1779_v50  ;;  %2529 = vtanh.f32 %v1216_v13  ;;  %v1018_v61 = vadd.f32 %v866_v57, %v3352_v48  ;;  %v4230_v13 = vld [vmem:[#allocation57_spill] sm:$0xff] }
  0xf9   : > { %v1782_v35 = vadd.f32 0.5, %v1590_v16  ;;  %1973 = vst [vmem:[%s3489_s5 + $0x220] sm:$0xff] %v1780_v20  ;;  %2531 = vtanh.f32 %v1217_v15  ;;  %v1019_v44 = vadd.f32 %v866_v57, %v4226_v43  ;;  %v1020_v22 = vadd.f32 %v866_v57, %v4227_v62  ;;  %v874_v62 = vpop.permute.xlu0 %873 }
  0xfa   : > { %v2514_v45 = vpop.eup %2513  ;;  %v1783_v3 = vadd.f32 0.5, %v1591_v60  ;;  %1974 = vst.msk [vmem:[%s3489_s5 + $0x228] sm:$0xff] %vm1905_vm0, %v1781_v27  ;;  %2533 = vtanh.f32 %v1218_v0  ;;  %v1021_v4 = vadd.f32 %v866_v57, %v4228_v41  ;;  %v1208_v42 = vmul.f32 0.5, %v1016_v10  ;;  %v4231_v0 = vld [vmem:[#allocation58_spill] sm:$0xff] }
  0xfb   : > { %v2516_v17 = vpop.eup %2515  ;;  %1975 = vst [vmem:[%s3489_s5 + $0x230] sm:$0xff] %v1782_v35  ;;  %v1580_v48 = vmul.f32 0.5, %v2514_v45  ;;  %2535 = vtanh.f32 %v1219_v21  ;;  %v1209_v5 = vmul.f32 0.5, %v1017_v52  ;;  %v1210_v54 = vmul.f32 0.5, %v1018_v61  ;;  %v4233_v52 = vld [vmem:[#allocation60_spill] sm:$0xff] }
  0xfc   : > { %v2518_v29 = vpop.eup %2517  ;;  %1976 = vst.msk [vmem:[%s3489_s5 + $0x238] sm:$0xff] %vm1905_vm0, %v1783_v3  ;;  %v1581_v59 = vmul.f32 0.5, %v2516_v17  ;;  %v1211_v33 = vmul.f32 0.5, %v1019_v44  ;;  %v1212_v6 = vmul.f32 0.5, %v1020_v22  ;;  %v1213_v49 = vmul.f32 0.5, %v1021_v4 }
  0xfd   : > { %v2520_v34 = vpop.eup %2519  ;;  %v1582_v11 = vmul.f32 0.5, %v2518_v29  ;;  %v1772_v24 = vadd.f32 0.5, %v1580_v48  ;;  %2537 = vtanh.f32 %v1208_v42  ;;  %v1034_v12 = vadd.f32 %v878_v7, %v4229_v63  ;;  %v4234_v29 = vld [vmem:[#allocation61_spill] sm:$0xff] }
  0xfe   : > { %v2522_v51 = vpop.eup %2521  ;;  %v1583_v26 = vmul.f32 0.5, %v2520_v34  ;;  %v1773_v31 = vadd.f32 0.5, %v1581_v59  ;;  %2539 = vtanh.f32 %v1209_v5  ;;  %v1035_v57 = vadd.f32 %v878_v7, %v4230_v13 }
  0xff   : > { %v2524_v39 = vpop.eup %2523  ;;  %v1584_v14 = vmul.f32 0.5, %v2522_v51  ;;  %v1774_v15 = vadd.f32 0.5, %v1582_v11  ;;  %1965 = vst [vmem:[%s3489_s5 + $0x1e0] sm:$0xff] %v1772_v24  ;;  %2541 = vtanh.f32 %v1210_v54  ;;  %v1036_v19 = vadd.f32 %v878_v7, %v4231_v0 }
 0x100   : > { %v2526_v40 = vpop.eup %2525  ;;  %v1585_v38 = vmul.f32 0.5, %v2524_v39  ;;  %v1775_v21 = vadd.f32 0.5, %v1583_v26  ;;  %1966 = vst.msk [vmem:[%s3489_s5 + $0x1e8] sm:$0xff] %vm1905_vm0, %v1773_v31  ;;  %2543 = vtanh.f32 %v1211_v33  ;;  %v1037_v36 = vadd.f32 %v878_v7, %v4232_v28 }
 0x101   : > { %v2528_v50 = vpop.eup %2527  ;;  %v1776_v2 = vadd.f32 0.5, %v1584_v14  ;;  %1967 = vst [vmem:[%s3489_s5 + $0x1f0] sm:$0xff] %v1774_v15  ;;  %v1598_v10 = vmul.f32 0.5, %v2526_v40  ;;  %2545 = vtanh.f32 %v1212_v6  ;;  %v1038_v58 = vadd.f32 %v878_v7, %v3382_v8 }
 0x102   : > { %v2530_v16 = vpop.eup %2529  ;;  %v1777_v20 = vadd.f32 0.5, %v1585_v38  ;;  %1968 = vst.msk [vmem:[%s3489_s5 + $0x1f8] sm:$0xff] %vm1905_vm0, %v1775_v21  ;;  %v1599_v30 = vmul.f32 0.5, %v2528_v50  ;;  %2547 = vtanh.f32 %v1213_v49  ;;  %v1039_v60 = vadd.f32 %v878_v7, %v4233_v52  ;;  %v4235_v49 = vld [vmem:[#allocation62_spill] sm:$0xff]  ;;  %v886_v21 = vpop.permute.xlu1 %885 }
 0x103   : > { %v2532_v27 = vpop.eup %2531  ;;  %1969 = vst [vmem:[%s3489_s5 + $0x200] sm:$0xff] %v1776_v2  ;;  %v1600_v61 = vmul.f32 0.5, %v2530_v16  ;;  %v1790_v35 = vadd.f32 0.5, %v1598_v10  ;;  %v1226_v43 = vmul.f32 0.5, %v1034_v12  ;;  %v1227_v44 = vmul.f32 0.5, %v1035_v57  ;;  %v4236_v57 = vld [vmem:[#allocation63_spill] sm:$0xff] }
 0x104   : > { %v2534_v22 = vpop.eup %2533  ;;  %1970 = vst.msk [vmem:[%s3489_s5 + $0x208] sm:$0xff] %vm1905_vm0, %v1777_v20  ;;  %v1601_v8 = vmul.f32 0.5, %v2532_v27  ;;  %v1791_v45 = vadd.f32 0.5, %v1599_v30  ;;  %v1228_v3 = vmul.f32 0.5, %v1036_v19  ;;  %v1229_v41 = vmul.f32 0.5, %v1037_v36 }
 0x105   : > { %v2536_v4 = vpop.eup %2535  ;;  %v1602_v42 = vmul.f32 0.5, %v2534_v22  ;;  %v1792_v7 = vadd.f32 0.5, %v1600_v61  ;;  %1983 = vst [vmem:[%s3489_s5 + $0x270] sm:$0xff] %v1790_v35  ;;  %v1230_v17 = vmul.f32 0.5, %v1038_v58  ;;  %v1231_v48 = vmul.f32 0.5, %v1039_v60  ;;  %v4237_v60 = vld [vmem:[#allocation64_spill] sm:$0xff] }
 0x106   : > { %v1603_v5 = vmul.f32 0.5, %v2536_v4  ;;  %v1793_v54 = vadd.f32 0.5, %v1601_v8  ;;  %1984 = vst.msk [vmem:[%s3489_s5 + $0x278] sm:$0xff] %vm1905_vm0, %v1791_v45  ;;  %2549 = vtanh.f32 %v1226_v43  ;;  %v1028_v59 = vadd.f32 %v874_v62, %v4234_v29  ;;  %v882_v4 = vpop.permute.xlu0 %881 }
 0x107   : > { %v2538_v33 = vpop.eup %2537  ;;  %v1794_v6 = vadd.f32 0.5, %v1602_v42  ;;  %1985 = vst [vmem:[%s3489_s5 + $0x280] sm:$0xff] %v1792_v7  ;;  %2551 = vtanh.f32 %v1227_v44  ;;  %v1029_v34 = vadd.f32 %v874_v62, %v4235_v49  ;;  %v1030_v11 = vadd.f32 %v874_v62, %v3397_v9 }
 0x108   : > { %v2540_v24 = vpop.eup %2539  ;;  %v1795_v63 = vadd.f32 0.5, %v1603_v5  ;;  %1986 = vst.msk [vmem:[%s3489_s5 + $0x288] sm:$0xff] %vm1905_vm0, %v1793_v54  ;;  %v1592_v12 = vmul.f32 0.5, %v2538_v33  ;;  %2553 = vtanh.f32 %v1228_v3  ;;  %v1031_v51 = vadd.f32 %v874_v62, %v3400_v56 }
 0x109   : > { %v2542_v26 = vpop.eup %2541  ;;  %1987 = vst [vmem:[%s3489_s5 + $0x290] sm:$0xff] %v1794_v6  ;;  %v1593_v31 = vmul.f32 0.5, %v2540_v24  ;;  %2555 = vtanh.f32 %v1229_v41  ;;  %v1032_v13 = vadd.f32 %v874_v62, %v3403_v23  ;;  %v1033_v39 = vadd.f32 %v874_v62, %v4236_v57 }
 0x10a   : > { %v2544_v14 = vpop.eup %2543  ;;  %1988 = vst.msk [vmem:[%s3489_s5 + $0x298] sm:$0xff] %vm1905_vm0, %v1795_v63  ;;  %v1594_v9 = vmul.f32 0.5, %v2542_v26  ;;  %v1784_v15 = vadd.f32 0.5, %v1592_v12  ;;  %2557 = vtanh.f32 %v1230_v17  ;;  %v1220_v0 = vmul.f32 0.5, %v1028_v59 }
 0x10b   : > { %v2546_v19 = vpop.eup %2545  ;;  %v1595_v40 = vmul.f32 0.5, %v2544_v14  ;;  %v1785_v56 = vadd.f32 0.5, %v1593_v31  ;;  %2559 = vtanh.f32 %v1231_v48  ;;  %v1221_v38 = vmul.f32 0.5, %v1029_v34  ;;  %v354_v14 = vld [vmem:[%s2990_s21 + $0x390] sm:$0xff] }
 0x10c   : > { %v2548_v28 = vpop.eup %2547  ;;  %v1596_v23 = vmul.f32 0.5, %v2546_v19  ;;  %v1786_v36 = vadd.f32 0.5, %v1594_v9  ;;  %1977 = vst [vmem:[%s3489_s5 + $0x240] sm:$0xff] %v1784_v15  ;;  %v1222_v50 = vmul.f32 0.5, %v1030_v11  ;;  %v1223_v2 = vmul.f32 0.5, %v1031_v51  ;;  %v4238_v51 = vld [vmem:[#allocation65_spill] sm:$0xff] }
 0x10d   : > { %v1597_v10 = vmul.f32 0.5, %v2548_v28  ;;  %v1787_v58 = vadd.f32 0.5, %v1595_v40  ;;  %1978 = vst.msk [vmem:[%s3489_s5 + $0x248] sm:$0xff] %vm1905_vm0, %v1785_v56  ;;  %v1224_v16 = vmul.f32 0.5, %v1032_v13  ;;  %v1225_v20 = vmul.f32 0.5, %v1033_v39  ;;  %v4239_v13 = vld [vmem:[#allocation66_spill] sm:$0xff] }
 0x10e   : > { %v1788_v30 = vadd.f32 0.5, %v1596_v23  ;;  %1979 = vst [vmem:[%s3489_s5 + $0x250] sm:$0xff] %v1786_v36  ;;  %2561 = vtanh.f32 %v1220_v0  ;;  %v1046_v52 = vadd.f32 %v886_v21, %v3412_v32  ;;  %v1047_v27 = vadd.f32 %v886_v21, %v4237_v60  ;;  %v355_v0 = vld [vmem:[%s2990_s21 + $0x398] sm:$0xff]  ;;  %v356_v28 = vld [vmem:[%s2990_s21 + $0x3a0] sm:$0xff]  ;;  %v3717_v60 = vld [vmem:[%s2995_s28 + $0x8] sm:$0xff] }
 0x10f   : > { %v1789_v61 = vadd.f32 0.5, %v1597_v10  ;;  %1980 = vst.msk [vmem:[%s3489_s5 + $0x258] sm:$0xff] %vm1905_vm0, %v1787_v58  ;;  %2563 = vtanh.f32 %v1221_v38  ;;  %v1048_v35 = vadd.f32 %v886_v21, %v3418_v37  ;;  %v1049_v43 = vadd.f32 %v886_v21, %v3421_v53  ;;  %v3712_v10 = vld [vmem:[%s2995_s28] sm:$0xff] }
 0x110   : > { %v2550_v44 = vpop.eup %2549  ;;  %1981 = vst [vmem:[%s3489_s5 + $0x260] sm:$0xff] %v1788_v30  ;;  %2565 = vtanh.f32 %v1222_v50  ;;  %v1050_v62 = vadd.f32 %v886_v21, %v3424_v46  ;;  %v1051_v22 = vadd.f32 %v886_v21, %v3427_v47  ;;  %v1238_v8 = vmul.f32 0.5, %v1046_v52  ;;  %v358_v52 = vld [vmem:[%s2990_s21 + $0x3b0] sm:$0xff] }
 0x111   : > { %v2552_v45 = vpop.eup %2551  ;;  %1982 = vst.msk [vmem:[%s3489_s5 + $0x268] sm:$0xff] %vm1905_vm0, %v1789_v61  ;;  %v1610_v32 = vmul.f32 0.5, %v2550_v44  ;;  %2567 = vtanh.f32 %v1223_v2  ;;  %v1239_v3 = vmul.f32 0.5, %v1047_v27  ;;  %v1240_v41 = vmul.f32 0.5, %v1048_v35  ;;  %v357_v2 = vld [vmem:[%s2990_s21 + $0x3a8] sm:$0xff]  ;;  %v359_v44 = vld [vmem:[%s2990_s21 + $0x3b8] sm:$0xff] }
 0x112   : > { %v2554_v42 = vpop.eup %2553  ;;  %v1611_v37 = vmul.f32 0.5, %v2552_v45  ;;  %2569 = vtanh.f32 %v1224_v16  ;;  %v1241_v53 = vmul.f32 0.5, %v1049_v43  ;;  %v1242_v7 = vmul.f32 0.5, %v1050_v62  ;;  %v3723_v62 = vld [vmem:[%s2995_s28 + $0x10] sm:$0xff] }
 0x113   : > { %v2556_v17 = vpop.eup %2555  ;;  %v1612_v48 = vmul.f32 0.5, %v2554_v42  ;;  %v1802_v46 = vadd.f32 0.5, %v1610_v32  ;;  %2571 = vtanh.f32 %v1225_v20  ;;  %v1243_v47 = vmul.f32 0.5, %v1051_v22 }
 0x114   : > { %v2558_v5 = vpop.eup %2557  ;;  %v1613_v54 = vmul.f32 0.5, %v2556_v17  ;;  %v1803_v29 = vadd.f32 0.5, %v1611_v37  ;;  %2573 = vtanh.f32 %v1238_v8  ;;  %v1040_v59 = vadd.f32 %v882_v4, %v3430_v25 }
 0x115   : > { %v2560_v33 = vpop.eup %2559  ;;  %v1614_v6 = vmul.f32 0.5, %v2558_v5  ;;  %v1804_v49 = vadd.f32 0.5, %v1612_v48  ;;  %1995 = vst [vmem:[%s3489_s5 + $0x2d0] sm:$0xff] %v1802_v46  ;;  %2575 = vtanh.f32 %v1239_v3  ;;  %v1041_v34 = vadd.f32 %v882_v4, %v3433_v1  ;;  %v894_v3 = vpop.permute.xlu1 %893  ;;  %v3740_v5 = vld [vmem:[%s2995_s28 + $0x28] sm:$0xff] }
 0x116   : > { %v1615_v11 = vmul.f32 0.5, %v2560_v33  ;;  %v1805_v24 = vadd.f32 0.5, %v1613_v54  ;;  %1996 = vst.msk [vmem:[%s3489_s5 + $0x2d8] sm:$0xff] %vm1905_vm0, %v1803_v29  ;;  %2577 = vtanh.f32 %v1240_v41  ;;  %v1042_v63 = vadd.f32 %v882_v4, %v3436_v55  ;;  %v3729_v41 = vld [vmem:[%s2995_s28 + $0x18] sm:$0xff] }
 0x117   : > { %v1806_v12 = vadd.f32 0.5, %v1614_v6  ;;  %1997 = vst [vmem:[%s3489_s5 + $0x2e0] sm:$0xff] %v1804_v49  ;;  %2579 = vtanh.f32 %v1241_v53  ;;  %v1043_v25 = vadd.f32 %v882_v4, %v3439_v18  ;;  %v1044_v26 = vadd.f32 %v882_v4, %v4238_v51 }
 0x118   : > { %v2562_v31 = vpop.eup %2561  ;;  %v1807_v1 = vadd.f32 0.5, %v1615_v11  ;;  %1998 = vst.msk [vmem:[%s3489_s5 + $0x2e8] sm:$0xff] %vm1905_vm0, %v1805_v24  ;;  %2581 = vtanh.f32 %v1242_v7  ;;  %v1045_v57 = vadd.f32 %v882_v4, %v4239_v13  ;;  %v1232_v39 = vmul.f32 0.5, %v1040_v59  ;;  %v3734_v7 = vld [vmem:[%s2995_s28 + $0x20] sm:$0xff] }
 0x119   : > { %v2564_v55 = vpop.eup %2563  ;;  %1999 = vst [vmem:[%s3489_s5 + $0x2f0] sm:$0xff] %v1806_v12  ;;  %v1604_v9 = vmul.f32 0.5, %v2562_v31  ;;  %2583 = vtanh.f32 %v1243_v47  ;;  %v1233_v18 = vmul.f32 0.5, %v1041_v34  ;;  %v1234_v15 = vmul.f32 0.5, %v1042_v63 }
 0x11a   : > { %v2566_v19 = vpop.eup %2565  ;;  %2000 = vst.msk [vmem:[%s3489_s5 + $0x2f8] sm:$0xff] %vm1905_vm0, %v1807_v1  ;;  %v1605_v40 = vmul.f32 0.5, %v2564_v55  ;;  %v1235_v56 = vmul.f32 0.5, %v1043_v25  ;;  %v1236_v38 = vmul.f32 0.5, %v1044_v26  ;;  %v1237_v21 = vmul.f32 0.5, %v1045_v57  ;;  %v348_v55 = vld [vmem:[%s2990_s21 + $0x360] sm:$0xff] }
 0x11b   : > { %v2568_v23 = vpop.eup %2567  ;;  %v1606_v36 = vmul.f32 0.5, %v2566_v19  ;;  %v1796_v50 = vadd.f32 0.5, %v1604_v9  ;;  %2585 = vtanh.f32 %v1232_v39  ;;  %v546_v58 = vmul.f32 %v3712_v10, %v354_v14  ;;  %v349_v9 = vld [vmem:[%s2990_s21 + $0x368] sm:$0xff] }
 0x11c   : > { %v2570_v16 = vpop.eup %2569  ;;  %v1607_v20 = vmul.f32 0.5, %v2568_v23  ;;  %v1797_v30 = vadd.f32 0.5, %v1605_v40  ;;  %2587 = vtanh.f32 %v1233_v18  ;;  %v547_v27 = vmul.f32 %v3717_v60, %v355_v0 }
 0x11d   : > { %v2572_v61 = vpop.eup %2571  ;;  %v1608_v35 = vmul.f32 0.5, %v2570_v16  ;;  %v1798_v43 = vadd.f32 0.5, %v1606_v36  ;;  %1989 = vst [vmem:[%s3489_s5 + $0x2a0] sm:$0xff] %v1796_v50  ;;  %2589 = vtanh.f32 %v1234_v15  ;;  %v548_v22 = vmul.f32 %v3723_v62, %v356_v28  ;;  %v351_v36 = vld [vmem:[%s2990_s21 + $0x378] sm:$0xff] }
 0x11e   : > { %v2574_v8 = vpop.eup %2573  ;;  %v1609_v45 = vmul.f32 0.5, %v2572_v61  ;;  %v1799_v32 = vadd.f32 0.5, %v1607_v20  ;;  %1990 = vst.msk [vmem:[%s3489_s5 + $0x2a8] sm:$0xff] %vm1905_vm0, %v1797_v30  ;;  %2591 = vtanh.f32 %v1235_v56  ;;  %v549_v4 = vmul.f32 %v3729_v41, %v357_v2  ;;  %v350_v56 = vld [vmem:[%s2990_s21 + $0x370] sm:$0xff]  ;;  %v353_v61 = vld [vmem:[%s2990_s21 + $0x388] sm:$0xff] }
 0x11f   : > { %v2576_v42 = vpop.eup %2575  ;;  %v1800_v37 = vadd.f32 0.5, %v1608_v35  ;;  %1991 = vst [vmem:[%s3489_s5 + $0x2b0] sm:$0xff] %v1798_v43  ;;  %v1622_v53 = vmul.f32 0.5, %v2574_v8  ;;  %2593 = vtanh.f32 %v1236_v38  ;;  %v550_v17 = vmul.f32 %v3734_v7, %v358_v52  ;;  %v890_v8 = vpop.permute.xlu0 %889 }
 0x120   : > { %v2578_v48 = vpop.eup %2577  ;;  %v1801_v46 = vadd.f32 0.5, %v1609_v45  ;;  %1992 = vst.msk [vmem:[%s3489_s5 + $0x2b8] sm:$0xff] %vm1905_vm0, %v1799_v32  ;;  %v1623_v47 = vmul.f32 0.5, %v2576_v42  ;;  %2595 = vtanh.f32 %v1237_v21  ;;  %v551_v54 = vmul.f32 %v3740_v5, %v359_v44 }
 0x121   : > { %v2580_v29 = vpop.eup %2579  ;;  %1993 = vst [vmem:[%s3489_s5 + $0x2c0] sm:$0xff] %v1800_v37  ;;  %v1624_v59 = vmul.f32 0.5, %v2578_v48  ;;  %v1814_v33 = vadd.f32 0.5, %v1622_v53  ;;  %v1058_v6 = vadd.f32 %v894_v3, %v546_v58  ;;  %v1059_v49 = vadd.f32 %v894_v3, %v547_v27  ;;  %v352_v58 = vld [vmem:[%s2990_s21 + $0x380] sm:$0xff]  ;;  %v366_v48 = vld [vmem:[%s2990_s21 + $0x3f0] sm:$0xff] }
 0x122   : > { %v2582_v34 = vpop.eup %2581  ;;  %1994 = vst.msk [vmem:[%s3489_s5 + $0x2c8] sm:$0xff] %vm1905_vm0, %v1801_v46  ;;  %v1625_v11 = vmul.f32 0.5, %v2580_v29  ;;  %v1815_v24 = vadd.f32 0.5, %v1623_v47  ;;  %v1060_v63 = vadd.f32 %v894_v3, %v548_v22  ;;  %v1061_v12 = vadd.f32 %v894_v3, %v549_v4 }
 0x123   : > { %v2584_v25 = vpop.eup %2583  ;;  %v1626_v51 = vmul.f32 0.5, %v2582_v34  ;;  %v1816_v26 = vadd.f32 0.5, %v1624_v59  ;;  %2007 = vst [vmem:[%s3489_s5 + $0x330] sm:$0xff] %v1814_v33  ;;  %v1062_v31 = vadd.f32 %v894_v3, %v550_v17  ;;  %v1063_v1 = vadd.f32 %v894_v3, %v551_v54  ;;  %v367_v59 = vld [vmem:[%s2990_s21 + $0x3f8] sm:$0xff] }
 0x124   : > { %v1627_v13 = vmul.f32 0.5, %v2584_v25  ;;  %v1817_v57 = vadd.f32 0.5, %v1625_v11  ;;  %2008 = vst.msk [vmem:[%s3489_s5 + $0x338] sm:$0xff] %vm1905_vm0, %v1815_v24  ;;  %v1250_v39 = vmul.f32 0.5, %v1058_v6  ;;  %v1251_v14 = vmul.f32 0.5, %v1059_v49  ;;  %v368_v11 = vld [vmem:[%s2990_s21 + $0x400] sm:$0xff] }
 0x125   : > { %v2586_v18 = vpop.eup %2585  ;;  %v1818_v15 = vadd.f32 0.5, %v1626_v51  ;;  %2009 = vst [vmem:[%s3489_s5 + $0x340] sm:$0xff] %v1816_v26  ;;  %v1252_v0 = vmul.f32 0.5, %v1060_v63  ;;  %v1253_v19 = vmul.f32 0.5, %v1061_v12  ;;  %v1254_v40 = vmul.f32 0.5, %v1062_v31  ;;  %v369_v24 = vld [vmem:[%s2990_s21 + $0x408] sm:$0xff]  ;;  %v902_v26 = vpop.permute.xlu1 %901 }
 0x126   : > { %v2588_v38 = vpop.eup %2587  ;;  %v1819_v21 = vadd.f32 0.5, %v1627_v13  ;;  %2010 = vst.msk [vmem:[%s3489_s5 + $0x348] sm:$0xff] %vm1905_vm0, %v1817_v57  ;;  %v1616_v28 = vmul.f32 0.5, %v2586_v18  ;;  %v1255_v23 = vmul.f32 0.5, %v1063_v1  ;;  %2597 = vtanh.f32 %v1250_v39  ;;  %v370_v63 = vld [vmem:[%s2990_s21 + $0x410] sm:$0xff]  ;;  %v371_v31 = vld [vmem:[%s2990_s21 + $0x418] sm:$0xff] }
 0x127   : > { %v2590_v50 = vpop.eup %2589  ;;  %2011 = vst [vmem:[%s3489_s5 + $0x350] sm:$0xff] %v1818_v15  ;;  %v1617_v2 = vmul.f32 0.5, %v2588_v38  ;;  %2599 = vtanh.f32 %v1251_v14  ;;  %v540_v16 = vmul.f32 %v3712_v10, %v348_v55  ;;  %v541_v20 = vmul.f32 %v3717_v60, %v349_v9 }
 0x128   : > { %v2592_v30 = vpop.eup %2591  ;;  %2012 = vst.msk [vmem:[%s3489_s5 + $0x358] sm:$0xff] %vm1905_vm0, %v1819_v21  ;;  %v1618_v52 = vmul.f32 0.5, %v2590_v50  ;;  %v1808_v27 = vadd.f32 0.5, %v1616_v28  ;;  %2601 = vtanh.f32 %v1252_v0  ;;  %v542_v35 = vmul.f32 %v3723_v62, %v350_v56 }
 0x129   : > { %v2594_v43 = vpop.eup %2593  ;;  %v1619_v44 = vmul.f32 0.5, %v2592_v30  ;;  %v1809_v22 = vadd.f32 0.5, %v1617_v2  ;;  %2603 = vtanh.f32 %v1253_v19  ;;  %v543_v45 = vmul.f32 %v3729_v41, %v351_v36 }
 0x12a   : > { %v2596_v32 = vpop.eup %2595  ;;  %v1620_v3 = vmul.f32 0.5, %v2594_v43  ;;  %v1810_v4 = vadd.f32 0.5, %v1618_v52  ;;  %2001 = vst [vmem:[%s3489_s5 + $0x300] sm:$0xff] %v1808_v27  ;;  %2605 = vtanh.f32 %v1254_v40  ;;  %v544_v42 = vmul.f32 %v3734_v7, %v352_v58 }
 0x12b   : > { %v1621_v37 = vmul.f32 0.5, %v2596_v32  ;;  %v1811_v53 = vadd.f32 0.5, %v1619_v44  ;;  %2002 = vst.msk [vmem:[%s3489_s5 + $0x308] sm:$0xff] %vm1905_vm0, %v1809_v22  ;;  %2607 = vtanh.f32 %v1255_v23  ;;  %v545_v17 = vmul.f32 %v3740_v5, %v353_v61  ;;  %v360_v44 = vld [vmem:[%s2990_s21 + $0x3c0] sm:$0xff]  ;;  %v361_v22 = vld [vmem:[%s2990_s21 + $0x3c8] sm:$0xff] }
 0x12c   : > { %v1812_v46 = vadd.f32 0.5, %v1620_v3  ;;  %2003 = vst [vmem:[%s3489_s5 + $0x310] sm:$0xff] %v1810_v4  ;;  %v1052_v47 = vadd.f32 %v890_v8, %v540_v16  ;;  %v1053_v54 = vadd.f32 %v890_v8, %v541_v20  ;;  %v1054_v29 = vadd.f32 %v890_v8, %v542_v35  ;;  %v362_v4 = vld [vmem:[%s2990_s21 + $0x3d0] sm:$0xff] }
 0x12d   : > { %v1813_v33 = vadd.f32 0.5, %v1621_v37  ;;  %2004 = vst.msk [vmem:[%s3489_s5 + $0x318] sm:$0xff] %vm1905_vm0, %v1811_v53  ;;  %v1055_v6 = vadd.f32 %v890_v8, %v543_v45  ;;  %v1056_v49 = vadd.f32 %v890_v8, %v544_v42  ;;  %v1057_v34 = vadd.f32 %v890_v8, %v545_v17  ;;  %v363_v42 = vld [vmem:[%s2990_s21 + $0x3d8] sm:$0xff] }
 0x12e   : > { %2005 = vst [vmem:[%s3489_s5 + $0x320] sm:$0xff] %v1812_v46  ;;  %v1244_v12 = vmul.f32 0.5, %v1052_v47  ;;  %v1245_v25 = vmul.f32 0.5, %v1053_v54  ;;  %v1246_v51 = vmul.f32 0.5, %v1054_v29  ;;  %v558_v1 = vmul.f32 %v3712_v10, %v366_v48  ;;  %v898_v46 = vpop.permute.xlu0 %897  ;;  %v364_v47 = vld [vmem:[%s2990_s21 + $0x3e0] sm:$0xff]  ;;  %v365_v54 = vld [vmem:[%s2990_s21 + $0x3e8] sm:$0xff] }
 0x12f   : > { %2006 = vst.msk [vmem:[%s3489_s5 + $0x328] sm:$0xff] %vm1905_vm0, %v1813_v33  ;;  %v1247_v13 = vmul.f32 0.5, %v1055_v6  ;;  %v1248_v57 = vmul.f32 0.5, %v1056_v49  ;;  %v1249_v39 = vmul.f32 0.5, %v1057_v34  ;;  %v559_v14 = vmul.f32 %v3717_v60, %v367_v59 }
 0x130   : > { %v2598_v55 = vpop.eup %2597  ;;  %2609 = vtanh.f32 %v1244_v12  ;;  %v560_v9 = vmul.f32 %v3723_v62, %v368_v11  ;;  %v561_v18 = vmul.f32 %v3729_v41, %v369_v24  ;;  %v562_v15 = vmul.f32 %v3734_v7, %v370_v63 }
 0x131   : > { %v2600_v0 = vpop.eup %2599  ;;  %v1634_v19 = vmul.f32 0.5, %v2598_v55  ;;  %2611 = vtanh.f32 %v1245_v25  ;;  %v563_v40 = vmul.f32 %v3740_v5, %v371_v31  ;;  %v1070_v56 = vadd.f32 %v902_v26, %v558_v1 }
 0x132   : > { %v2602_v38 = vpop.eup %2601  ;;  %v1635_v21 = vmul.f32 0.5, %v2600_v0  ;;  %2613 = vtanh.f32 %v1246_v51  ;;  %v1071_v28 = vadd.f32 %v902_v26, %v559_v14  ;;  %v1072_v23 = vadd.f32 %v902_v26, %v560_v9 }
 0x133   : > { %v2604_v36 = vpop.eup %2603  ;;  %v1636_v50 = vmul.f32 0.5, %v2602_v38  ;;  %v1826_v2 = vadd.f32 0.5, %v1634_v19  ;;  %2615 = vtanh.f32 %v1247_v13  ;;  %v1073_v58 = vadd.f32 %v902_v26, %v561_v18  ;;  %v378_v38 = vld [vmem:[%s2990_s21 + $0x450] sm:$0xff] }
 0x134   : > { %v2606_v16 = vpop.eup %2605  ;;  %v1637_v20 = vmul.f32 0.5, %v2604_v36  ;;  %v1827_v30 = vadd.f32 0.5, %v1635_v21  ;;  %2617 = vtanh.f32 %v1248_v57  ;;  %v1074_v52 = vadd.f32 %v902_v26, %v562_v15  ;;  %v379_v21 = vld [vmem:[%s2990_s21 + $0x458] sm:$0xff] }
 0x135   : > { %v2608_v27 = vpop.eup %2607  ;;  %v1638_v61 = vmul.f32 0.5, %v2606_v16  ;;  %v1828_v35 = vadd.f32 0.5, %v1636_v50  ;;  %2019 = vst [vmem:[%s3489_s5 + $0x390] sm:$0xff] %v1826_v2  ;;  %2619 = vtanh.f32 %v1249_v39  ;;  %v1075_v43 = vadd.f32 %v902_v26, %v563_v40  ;;  %v381_v16 = vld [vmem:[%s2990_s21 + $0x468] sm:$0xff] }
 0x136   : > { %v1639_v8 = vmul.f32 0.5, %v2608_v27  ;;  %v1829_v45 = vadd.f32 0.5, %v1637_v20  ;;  %2020 = vst.msk [vmem:[%s3489_s5 + $0x398] sm:$0xff] %vm1905_vm0, %v1827_v30  ;;  %v1262_v32 = vmul.f32 0.5, %v1070_v56  ;;  %v1263_v3 = vmul.f32 0.5, %v1071_v28 }
 0x137   : > { %v1830_v37 = vadd.f32 0.5, %v1638_v61  ;;  %2021 = vst [vmem:[%s3489_s5 + $0x3a0] sm:$0xff] %v1828_v35  ;;  %v1264_v53 = vmul.f32 0.5, %v1072_v23  ;;  %v1265_v17 = vmul.f32 0.5, %v1073_v58  ;;  %v1266_v48 = vmul.f32 0.5, %v1074_v52  ;;  %v380_v58 = vld [vmem:[%s2990_s21 + $0x460] sm:$0xff] }
 0x138   : > { %v1831_v29 = vadd.f32 0.5, %v1639_v8  ;;  %2022 = vst.msk [vmem:[%s3489_s5 + $0x3a8] sm:$0xff] %vm1905_vm0, %v1829_v45  ;;  %v1267_v59 = vmul.f32 0.5, %v1075_v43  ;;  %2621 = vtanh.f32 %v1262_v32  ;;  %v552_v33 = vmul.f32 %v3712_v10, %v360_v44  ;;  %v382_v61 = vld [vmem:[%s2990_s21 + $0x470] sm:$0xff]  ;;  %v383_v35 = vld [vmem:[%s2990_s21 + $0x478] sm:$0xff]  ;;  %v910_v44 = vpop.permute.xlu1 %909 }
 0x139   : > { %2023 = vst [vmem:[%s3489_s5 + $0x3b0] sm:$0xff] %v1830_v37  ;;  %2623 = vtanh.f32 %v1263_v3  ;;  %v553_v6 = vmul.f32 %v3717_v60, %v361_v22  ;;  %v554_v49 = vmul.f32 %v3723_v62, %v362_v4  ;;  %v555_v34 = vmul.f32 %v3729_v41, %v363_v42 }
 0x13a   : > { %v2610_v11 = vpop.eup %2609  ;;  %2024 = vst.msk [vmem:[%s3489_s5 + $0x3b8] sm:$0xff] %vm1905_vm0, %v1831_v29  ;;  %2625 = vtanh.f32 %v1264_v53  ;;  %v556_v24 = vmul.f32 %v3734_v7, %v364_v47  ;;  %v557_v63 = vmul.f32 %v3740_v5, %v365_v54  ;;  %v1064_v12 = vadd.f32 %v898_v46, %v552_v33 }
 0x13b   : > { %v2612_v25 = vpop.eup %2611  ;;  %v1628_v51 = vmul.f32 0.5, %v2610_v11  ;;  %2627 = vtanh.f32 %v1265_v17  ;;  %v1065_v26 = vadd.f32 %v898_v46, %v553_v6  ;;  %v1066_v31 = vadd.f32 %v898_v46, %v554_v49 }
 0x13c   : > { %v2614_v1 = vpop.eup %2613  ;;  %v1629_v13 = vmul.f32 0.5, %v2612_v25  ;;  %2629 = vtanh.f32 %v1266_v48  ;;  %v1067_v57 = vadd.f32 %v898_v46, %v555_v34  ;;  %v1068_v39 = vadd.f32 %v898_v46, %v556_v24 }
 0x13d   : > { %v2616_v14 = vpop.eup %2615  ;;  %v1630_v55 = vmul.f32 0.5, %v2614_v1  ;;  %v1820_v9 = vadd.f32 0.5, %v1628_v51  ;;  %2631 = vtanh.f32 %v1267_v59  ;;  %v1069_v18 = vadd.f32 %v898_v46, %v557_v63  ;;  %v373_v1 = vld [vmem:[%s2990_s21 + $0x428] sm:$0xff] }
 0x13e   : > { %v2618_v15 = vpop.eup %2617  ;;  %v1631_v0 = vmul.f32 0.5, %v2616_v14  ;;  %v1821_v19 = vadd.f32 0.5, %v1629_v13  ;;  %v1256_v40 = vmul.f32 0.5, %v1064_v12  ;;  %v1257_v56 = vmul.f32 0.5, %v1065_v26 }
 0x13f   : > { %v2620_v28 = vpop.eup %2619  ;;  %v1632_v23 = vmul.f32 0.5, %v2618_v15  ;;  %v1822_v36 = vadd.f32 0.5, %v1630_v55  ;;  %2013 = vst [vmem:[%s3489_s5 + $0x360] sm:$0xff] %v1820_v9  ;;  %v1258_v50 = vmul.f32 0.5, %v1066_v31  ;;  %v1259_v2 = vmul.f32 0.5, %v1067_v57  ;;  %v372_v31 = vld [vmem:[%s2990_s21 + $0x420] sm:$0xff] }
 0x140   : > { %v1633_v20 = vmul.f32 0.5, %v2620_v28  ;;  %v1823_v30 = vadd.f32 0.5, %v1631_v0  ;;  %2014 = vst.msk [vmem:[%s3489_s5 + $0x368] sm:$0xff] %vm1905_vm0, %v1821_v19  ;;  %v1260_v52 = vmul.f32 0.5, %v1068_v39  ;;  %v1261_v27 = vmul.f32 0.5, %v1069_v18  ;;  %v374_v55 = vld [vmem:[%s2990_s21 + $0x430] sm:$0xff]  ;;  %v906_v28 = vpop.permute.xlu0 %905 }
 0x141   : > { %v1824_v43 = vadd.f32 0.5, %v1632_v23  ;;  %2015 = vst [vmem:[%s3489_s5 + $0x370] sm:$0xff] %v1822_v36  ;;  %2633 = vtanh.f32 %v1256_v40  ;;  %v570_v22 = vmul.f32 %v3712_v10, %v378_v38  ;;  %v571_v8 = vmul.f32 %v3717_v60, %v379_v21  ;;  %v375_v9 = vld [vmem:[%s2990_s21 + $0x438] sm:$0xff]  ;;  %v376_v40 = vld [vmem:[%s2990_s21 + $0x440] sm:$0xff] }
 0x142   : > { %v2622_v45 = vpop.eup %2621  ;;  %v1825_v32 = vadd.f32 0.5, %v1633_v20  ;;  %2016 = vst.msk [vmem:[%s3489_s5 + $0x378] sm:$0xff] %vm1905_vm0, %v1823_v30  ;;  %2635 = vtanh.f32 %v1257_v56  ;;  %v572_v3 = vmul.f32 %v3723_v62, %v380_v58  ;;  %v573_v4 = vmul.f32 %v3729_v41, %v381_v16  ;;  %v377_v56 = vld [vmem:[%s2990_s21 + $0x448] sm:$0xff] }
 0x143   : > { %v2624_v42 = vpop.eup %2623  ;;  %2017 = vst [vmem:[%s3489_s5 + $0x380] sm:$0xff] %v1824_v43  ;;  %v1646_v37 = vmul.f32 0.5, %v2622_v45  ;;  %2637 = vtanh.f32 %v1258_v50  ;;  %v574_v53 = vmul.f32 %v3734_v7, %v382_v61  ;;  %v575_v17 = vmul.f32 %v3740_v5, %v383_v35 }
 0x144   : > { %v2626_v48 = vpop.eup %2625  ;;  %2018 = vst.msk [vmem:[%s3489_s5 + $0x388] sm:$0xff] %vm1905_vm0, %v1825_v32  ;;  %v1647_v46 = vmul.f32 0.5, %v2624_v42  ;;  %2639 = vtanh.f32 %v1259_v2  ;;  %v1082_v47 = vadd.f32 %v910_v44, %v570_v22  ;;  %v1083_v54 = vadd.f32 %v910_v44, %v571_v8 }
 0x145   : > { %v2628_v29 = vpop.eup %2627  ;;  %v1648_v59 = vmul.f32 0.5, %v2626_v48  ;;  %v1838_v33 = vadd.f32 0.5, %v1646_v37  ;;  %2641 = vtanh.f32 %v1260_v52  ;;  %v1084_v6 = vadd.f32 %v910_v44, %v572_v3 }
 0x146   : > { %v2630_v49 = vpop.eup %2629  ;;  %v1649_v34 = vmul.f32 0.5, %v2628_v29  ;;  %v1839_v11 = vadd.f32 0.5, %v1647_v46  ;;  %2643 = vtanh.f32 %v1261_v27  ;;  %v1085_v24 = vadd.f32 %v910_v44, %v573_v4 }
 0x147   : > { %v2632_v63 = vpop.eup %2631  ;;  %v1650_v12 = vmul.f32 0.5, %v2630_v49  ;;  %v1840_v25 = vadd.f32 0.5, %v1648_v59  ;;  %2031 = vst [vmem:[%s3489_s5 + $0x3f0] sm:$0xff] %v1838_v33  ;;  %v1086_v51 = vadd.f32 %v910_v44, %v574_v53  ;;  %v1087_v26 = vadd.f32 %v910_v44, %v575_v17  ;;  %v392_v49 = vld [vmem:[%s2990_s21 + $0x4c0] sm:$0xff] }
 0x148   : > { %v1651_v13 = vmul.f32 0.5, %v2632_v63  ;;  %v1841_v57 = vadd.f32 0.5, %v1649_v34  ;;  %2032 = vst.msk [vmem:[%s3489_s5 + $0x3f8] sm:$0xff] %vm1905_vm0, %v1839_v11  ;;  %v1274_v39 = vmul.f32 0.5, %v1082_v47  ;;  %v1275_v14 = vmul.f32 0.5, %v1083_v54  ;;  %v390_v47 = vld [vmem:[%s2990_s21 + $0x4b0] sm:$0xff] }
 0x149   : > { %v1842_v18 = vadd.f32 0.5, %v1650_v12  ;;  %2033 = vst [vmem:[%s3489_s5 + $0x400] sm:$0xff] %v1840_v25  ;;  %v1276_v15 = vmul.f32 0.5, %v1084_v6  ;;  %v1277_v0 = vmul.f32 0.5, %v1085_v24  ;;  %v1278_v19 = vmul.f32 0.5, %v1086_v51  ;;  %v391_v54 = vld [vmem:[%s2990_s21 + $0x4b8] sm:$0xff] }
 0x14a   : > { %v1843_v38 = vadd.f32 0.5, %v1651_v13  ;;  %2034 = vst.msk [vmem:[%s3489_s5 + $0x408] sm:$0xff] %vm1905_vm0, %v1841_v57  ;;  %v1279_v21 = vmul.f32 0.5, %v1087_v26  ;;  %2645 = vtanh.f32 %v1274_v39  ;;  %v564_v23 = vmul.f32 %v3712_v10, %v372_v31  ;;  %v393_v34 = vld [vmem:[%s2990_s21 + $0x4c8] sm:$0xff]  ;;  %v394_v25 = vld [vmem:[%s2990_s21 + $0x4d0] sm:$0xff]  ;;  %v395_v51 = vld [vmem:[%s2990_s21 + $0x4d8] sm:$0xff] }
 0x14b   : > { %v2634_v36 = vpop.eup %2633  ;;  %2035 = vst [vmem:[%s3489_s5 + $0x410] sm:$0xff] %v1842_v18  ;;  %2647 = vtanh.f32 %v1275_v14  ;;  %v565_v50 = vmul.f32 %v3717_v60, %v373_v1  ;;  %v566_v2 = vmul.f32 %v3723_v62, %v374_v55  ;;  %v567_v58 = vmul.f32 %v3729_v41, %v375_v9  ;;  %v918_v1 = vpop.permute.xlu1 %917 }
 0x14c   : > { %v2636_v16 = vpop.eup %2635  ;;  %2036 = vst.msk [vmem:[%s3489_s5 + $0x418] sm:$0xff] %vm1905_vm0, %v1843_v38  ;;  %v1640_v20 = vmul.f32 0.5, %v2634_v36  ;;  %2649 = vtanh.f32 %v1276_v15  ;;  %v568_v30 = vmul.f32 %v3734_v7, %v376_v40  ;;  %v569_v52 = vmul.f32 %v3740_v5, %v377_v56 }
 0x14d   : > { %v2638_v27 = vpop.eup %2637  ;;  %v1641_v61 = vmul.f32 0.5, %v2636_v16  ;;  %2651 = vtanh.f32 %v1277_v0  ;;  %v1076_v35 = vadd.f32 %v906_v28, %v564_v23  ;;  %v1077_v43 = vadd.f32 %v906_v28, %v565_v50 }
 0x14e   : > { %v2640_v44 = vpop.eup %2639  ;;  %v1642_v22 = vmul.f32 0.5, %v2638_v27  ;;  %v1832_v8 = vadd.f32 0.5, %v1640_v20  ;;  %2653 = vtanh.f32 %v1278_v19  ;;  %v1078_v45 = vadd.f32 %v906_v28, %v566_v2 }
 0x14f   : > { %v2642_v32 = vpop.eup %2641  ;;  %v1643_v3 = vmul.f32 0.5, %v2640_v44  ;;  %v1833_v4 = vadd.f32 0.5, %v1641_v61  ;;  %2655 = vtanh.f32 %v1279_v21  ;;  %v1079_v42 = vadd.f32 %v906_v28, %v567_v58 }
 0x150   : > { %v2644_v37 = vpop.eup %2643  ;;  %v1644_v53 = vmul.f32 0.5, %v2642_v32  ;;  %v1834_v17 = vadd.f32 0.5, %v1642_v22  ;;  %2025 = vst [vmem:[%s3489_s5 + $0x3c0] sm:$0xff] %v1832_v8  ;;  %v1080_v48 = vadd.f32 %v906_v28, %v568_v30  ;;  %v1081_v46 = vadd.f32 %v906_v28, %v569_v52  ;;  %v386_v32 = vld [vmem:[%s2990_s21 + $0x490] sm:$0xff] }
 0x151   : > { %v1645_v29 = vmul.f32 0.5, %v2644_v37  ;;  %v1835_v59 = vadd.f32 0.5, %v1643_v3  ;;  %2026 = vst.msk [vmem:[%s3489_s5 + $0x3c8] sm:$0xff] %vm1905_vm0, %v1833_v4  ;;  %v1268_v33 = vmul.f32 0.5, %v1076_v35  ;;  %v1269_v6 = vmul.f32 0.5, %v1077_v43  ;;  %v384_v35 = vld [vmem:[%s2990_s21 + $0x480] sm:$0xff] }
 0x152   : > { %v1836_v11 = vadd.f32 0.5, %v1644_v53  ;;  %2027 = vst [vmem:[%s3489_s5 + $0x3d0] sm:$0xff] %v1834_v17  ;;  %v1270_v24 = vmul.f32 0.5, %v1078_v45  ;;  %v1271_v63 = vmul.f32 0.5, %v1079_v42  ;;  %v1272_v12 = vmul.f32 0.5, %v1080_v48  ;;  %v385_v43 = vld [vmem:[%s2990_s21 + $0x488] sm:$0xff] }
 0x153   : > { %v1837_v26 = vadd.f32 0.5, %v1645_v29  ;;  %2028 = vst.msk [vmem:[%s3489_s5 + $0x3d8] sm:$0xff] %vm1905_vm0, %v1835_v59  ;;  %v1273_v31 = vmul.f32 0.5, %v1081_v46  ;;  %2657 = vtanh.f32 %v1268_v33  ;;  %v582_v13 = vmul.f32 %v3712_v10, %v390_v47  ;;  %v387_v3 = vld [vmem:[%s2990_s21 + $0x498] sm:$0xff]  ;;  %v388_v17 = vld [vmem:[%s2990_s21 + $0x4a0] sm:$0xff]  ;;  %v389_v48 = vld [vmem:[%s2990_s21 + $0x4a8] sm:$0xff] }
 0x154   : > { %v2646_v57 = vpop.eup %2645  ;;  %2029 = vst [vmem:[%s3489_s5 + $0x3e0] sm:$0xff] %v1836_v11  ;;  %2659 = vtanh.f32 %v1269_v6  ;;  %v583_v39 = vmul.f32 %v3717_v60, %v391_v54  ;;  %v584_v14 = vmul.f32 %v3723_v62, %v392_v49  ;;  %v585_v55 = vmul.f32 %v3729_v41, %v393_v34  ;;  %v914_v54 = vpop.permute.xlu0 %913 }
 0x155   : > { %v2648_v9 = vpop.eup %2647  ;;  %2030 = vst.msk [vmem:[%s3489_s5 + $0x3e8] sm:$0xff] %vm1905_vm0, %v1837_v26  ;;  %v1658_v18 = vmul.f32 0.5, %v2646_v57  ;;  %2661 = vtanh.f32 %v1270_v24  ;;  %v586_v15 = vmul.f32 %v3734_v7, %v394_v25  ;;  %v587_v0 = vmul.f32 %v3740_v5, %v395_v51 }
 0x156   : > { %v2650_v19 = vpop.eup %2649  ;;  %v1659_v40 = vmul.f32 0.5, %v2648_v9  ;;  %2663 = vtanh.f32 %v1271_v63  ;;  %v1094_v56 = vadd.f32 %v918_v1, %v582_v13  ;;  %v1095_v38 = vadd.f32 %v918_v1, %v583_v39 }
 0x157   : > { %v2652_v21 = vpop.eup %2651  ;;  %v1660_v28 = vmul.f32 0.5, %v2650_v19  ;;  %v1850_v23 = vadd.f32 0.5, %v1658_v18  ;;  %2665 = vtanh.f32 %v1272_v12  ;;  %v1096_v36 = vadd.f32 %v918_v1, %v584_v14 }
 0x158   : > { %v2654_v50 = vpop.eup %2653  ;;  %v1661_v2 = vmul.f32 0.5, %v2652_v21  ;;  %v1851_v58 = vadd.f32 0.5, %v1659_v40  ;;  %2667 = vtanh.f32 %v1273_v31  ;;  %v1097_v16 = vadd.f32 %v918_v1, %v585_v55 }
 0x159   : > { %v2656_v20 = vpop.eup %2655  ;;  %v1662_v30 = vmul.f32 0.5, %v2654_v50  ;;  %v1852_v52 = vadd.f32 0.5, %v1660_v28  ;;  %2043 = vst [vmem:[%s3489_s5 + $0x450] sm:$0xff] %v1850_v23  ;;  %v1098_v27 = vadd.f32 %v918_v1, %v586_v15  ;;  %v1099_v61 = vadd.f32 %v918_v1, %v587_v0  ;;  %v404_v50 = vld [vmem:[%s2990_s21 + $0x520] sm:$0xff] }
 0x15a   : > { %v1663_v44 = vmul.f32 0.5, %v2656_v20  ;;  %v1853_v22 = vadd.f32 0.5, %v1661_v2  ;;  %2044 = vst.msk [vmem:[%s3489_s5 + $0x458] sm:$0xff] %vm1905_vm0, %v1851_v58  ;;  %v1286_v8 = vmul.f32 0.5, %v1094_v56  ;;  %v1287_v45 = vmul.f32 0.5, %v1095_v38  ;;  %v402_v56 = vld [vmem:[%s2990_s21 + $0x510] sm:$0xff] }
 0x15b   : > { %v1854_v4 = vadd.f32 0.5, %v1662_v30  ;;  %2045 = vst [vmem:[%s3489_s5 + $0x460] sm:$0xff] %v1852_v52  ;;  %v1288_v42 = vmul.f32 0.5, %v1096_v36  ;;  %v1289_v37 = vmul.f32 0.5, %v1097_v16  ;;  %v1290_v53 = vmul.f32 0.5, %v1098_v27  ;;  %v403_v38 = vld [vmem:[%s2990_s21 + $0x518] sm:$0xff] }
 0x15c   : > { %v1855_v46 = vadd.f32 0.5, %v1663_v44  ;;  %2046 = vst.msk [vmem:[%s3489_s5 + $0x468] sm:$0xff] %vm1905_vm0, %v1853_v22  ;;  %v1291_v47 = vmul.f32 0.5, %v1099_v61  ;;  %2669 = vtanh.f32 %v1286_v8  ;;  %v576_v29 = vmul.f32 %v3712_v10, %v384_v35  ;;  %v405_v2 = vld [vmem:[%s2990_s21 + $0x528] sm:$0xff]  ;;  %v406_v52 = vld [vmem:[%s2990_s21 + $0x530] sm:$0xff]  ;;  %v407_v27 = vld [vmem:[%s2990_s21 + $0x538] sm:$0xff] }
 0x15d   : > { %v2658_v59 = vpop.eup %2657  ;;  %2047 = vst [vmem:[%s3489_s5 + $0x470] sm:$0xff] %v1854_v4  ;;  %2671 = vtanh.f32 %v1287_v45  ;;  %v577_v33 = vmul.f32 %v3717_v60, %v385_v43  ;;  %v578_v6 = vmul.f32 %v3723_v62, %v386_v32  ;;  %v579_v49 = vmul.f32 %v3729_v41, %v387_v3  ;;  %v926_v43 = vpop.permute.xlu1 %925 }
 0x15e   : > { %v2660_v34 = vpop.eup %2659  ;;  %2048 = vst.msk [vmem:[%s3489_s5 + $0x478] sm:$0xff] %vm1905_vm0, %v1855_v46  ;;  %v1652_v11 = vmul.f32 0.5, %v2658_v59  ;;  %2673 = vtanh.f32 %v1288_v42  ;;  %v580_v24 = vmul.f32 %v3734_v7, %v388_v17  ;;  %v581_v63 = vmul.f32 %v3740_v5, %v389_v48 }
 0x15f   : > { %v2662_v12 = vpop.eup %2661  ;;  %v1653_v25 = vmul.f32 0.5, %v2660_v34  ;;  %2675 = vtanh.f32 %v1289_v37  ;;  %v1088_v51 = vadd.f32 %v914_v54, %v576_v29  ;;  %v1089_v26 = vadd.f32 %v914_v54, %v577_v33 }
 0x160   : > { %v2664_v31 = vpop.eup %2663  ;;  %v1654_v1 = vmul.f32 0.5, %v2662_v12  ;;  %v1844_v13 = vadd.f32 0.5, %v1652_v11  ;;  %2677 = vtanh.f32 %v1290_v53  ;;  %v1090_v57 = vadd.f32 %v914_v54, %v578_v6 }
 0x161   : > { %v2666_v39 = vpop.eup %2665  ;;  %v1655_v14 = vmul.f32 0.5, %v2664_v31  ;;  %v1845_v55 = vadd.f32 0.5, %v1653_v25  ;;  %2679 = vtanh.f32 %v1291_v47  ;;  %v1091_v9 = vadd.f32 %v914_v54, %v579_v49  ;;  %v396_v25 = vld [vmem:[%s2990_s21 + $0x4e0] sm:$0xff] }
 0x162   : > { %v2668_v18 = vpop.eup %2667  ;;  %v1656_v15 = vmul.f32 0.5, %v2666_v39  ;;  %v1846_v0 = vadd.f32 0.5, %v1654_v1  ;;  %2037 = vst [vmem:[%s3489_s5 + $0x420] sm:$0xff] %v1844_v13  ;;  %v1092_v19 = vadd.f32 %v914_v54, %v580_v24  ;;  %v1093_v40 = vadd.f32 %v914_v54, %v581_v63  ;;  %v399_v39 = vld [vmem:[%s2990_s21 + $0x4f8] sm:$0xff] }
 0x163   : > { %v1657_v21 = vmul.f32 0.5, %v2668_v18  ;;  %v1847_v28 = vadd.f32 0.5, %v1655_v14  ;;  %2038 = vst.msk [vmem:[%s3489_s5 + $0x428] sm:$0xff] %vm1905_vm0, %v1845_v55  ;;  %v1280_v23 = vmul.f32 0.5, %v1088_v51  ;;  %v1281_v36 = vmul.f32 0.5, %v1089_v26  ;;  %v397_v51 = vld [vmem:[%s2990_s21 + $0x4e8] sm:$0xff] }
 0x164   : > { %v1848_v58 = vadd.f32 0.5, %v1656_v15  ;;  %2039 = vst [vmem:[%s3489_s5 + $0x430] sm:$0xff] %v1846_v0  ;;  %v1282_v16 = vmul.f32 0.5, %v1090_v57  ;;  %v1283_v20 = vmul.f32 0.5, %v1091_v9  ;;  %v1284_v30 = vmul.f32 0.5, %v1092_v19  ;;  %v398_v57 = vld [vmem:[%s2990_s21 + $0x4f0] sm:$0xff] }
 0x165   : > { %v1849_v61 = vadd.f32 0.5, %v1657_v21  ;;  %2040 = vst.msk [vmem:[%s3489_s5 + $0x438] sm:$0xff] %vm1905_vm0, %v1847_v28  ;;  %v1285_v35 = vmul.f32 0.5, %v1093_v40  ;;  %2681 = vtanh.f32 %v1280_v23  ;;  %v594_v44 = vmul.f32 %v3712_v10, %v402_v56  ;;  %v400_v15 = vld [vmem:[%s2990_s21 + $0x500] sm:$0xff]  ;;  %v401_v0 = vld [vmem:[%s2990_s21 + $0x508] sm:$0xff]  ;;  %v922_v56 = vpop.permute.xlu0 %921 }
 0x166   : > { %v2670_v22 = vpop.eup %2669  ;;  %2041 = vst [vmem:[%s3489_s5 + $0x440] sm:$0xff] %v1848_v58  ;;  %2683 = vtanh.f32 %v1281_v36  ;;  %v595_v8 = vmul.f32 %v3717_v60, %v403_v38  ;;  %v596_v45 = vmul.f32 %v3723_v62, %v404_v50  ;;  %v597_v32 = vmul.f32 %v3729_v41, %v405_v2  ;;  %v3927_v38 = vld [vmem:[%s2995_s28] sm:$0xff] }
 0x167   : > { %v2672_v3 = vpop.eup %2671  ;;  %2042 = vst.msk [vmem:[%s3489_s5 + $0x448] sm:$0xff] %vm1905_vm0, %v1849_v61  ;;  %v1670_v4 = vmul.f32 0.5, %v2670_v22  ;;  %2685 = vtanh.f32 %v1282_v16  ;;  %v598_v42 = vmul.f32 %v3734_v7, %v406_v52  ;;  %v599_v37 = vmul.f32 %v3740_v5, %v407_v27 }
 0x168   : > { %v2674_v53 = vpop.eup %2673  ;;  %v1671_v10 = vmul.f32 0.5, %v2672_v3  ;;  %2687 = vtanh.f32 %v1283_v20  ;;  %v1106_v17 = vadd.f32 %v926_v43, %v594_v44  ;;  %v1107_v48 = vadd.f32 %v926_v43, %v595_v8 }
 0x169   : > { %v2676_v46 = vpop.eup %2675  ;;  %v1672_v47 = vmul.f32 0.5, %v2674_v53  ;;  %v1862_v54 = vadd.f32 0.5, %v1670_v4  ;;  %2689 = vtanh.f32 %v1284_v30  ;;  %v1108_v29 = vadd.f32 %v926_v43, %v596_v45  ;;  %v414_v4 = vld [vmem:[%s2990_s21 + $0x570] sm:$0xff] }
 0x16a   : > { %v2678_v59 = vpop.eup %2677  ;;  %v1673_v33 = vmul.f32 0.5, %v2676_v46  ;;  %v1863_v6 = vadd.f32 0.5, %v1671_v10  ;;  %2691 = vtanh.f32 %v1285_v35  ;;  %v1109_v49 = vadd.f32 %v926_v43, %v597_v32  ;;  %v417_v46 = vld [vmem:[%s2990_s21 + $0x588] sm:$0xff] }
 0x16b   : > { %v2680_v34 = vpop.eup %2679  ;;  %v1674_v11 = vmul.f32 0.5, %v2678_v59  ;;  %v1864_v24 = vadd.f32 0.5, %v1672_v47  ;;  %2055 = vst [vmem:[%s3489_s5 + $0x4b0] sm:$0xff] %v1862_v54  ;;  %v1110_v63 = vadd.f32 %v926_v43, %v598_v42  ;;  %v1111_v12 = vadd.f32 %v926_v43, %v599_v37  ;;  %v415_v42 = vld [vmem:[%s2990_s21 + $0x578] sm:$0xff] }
 0x16c   : > { %v1675_v26 = vmul.f32 0.5, %v2680_v34  ;;  %v1865_v31 = vadd.f32 0.5, %v1673_v33  ;;  %2056 = vst.msk [vmem:[%s3489_s5 + $0x4b8] sm:$0xff] %vm1905_vm0, %v1863_v6  ;;  %v1298_v1 = vmul.f32 0.5, %v1106_v17  ;;  %v1299_v13 = vmul.f32 0.5, %v1107_v48  ;;  %v416_v48 = vld [vmem:[%s2990_s21 + $0x580] sm:$0xff] }
 0x16d   : > { %v1866_v14 = vadd.f32 0.5, %v1674_v11  ;;  %2057 = vst [vmem:[%s3489_s5 + $0x4c0] sm:$0xff] %v1864_v24  ;;  %v1300_v55 = vmul.f32 0.5, %v1108_v29  ;;  %v1301_v9 = vmul.f32 0.5, %v1109_v49  ;;  %v1302_v18 = vmul.f32 0.5, %v1110_v63  ;;  %v418_v33 = vld [vmem:[%s2990_s21 + $0x590] sm:$0xff]  ;;  %v934_v11 = vpop.permute.xlu1 %933 }
 0x16e   : > { %v1867_v19 = vadd.f32 0.5, %v1675_v26  ;;  %2058 = vst.msk [vmem:[%s3489_s5 + $0x4c8] sm:$0xff] %vm1905_vm0, %v1865_v31  ;;  %v1303_v40 = vmul.f32 0.5, %v1111_v12  ;;  %2693 = vtanh.f32 %v1298_v1  ;;  %v588_v21 = vmul.f32 %v3927_v38, %v396_v25  ;;  %v419_v6 = vld [vmem:[%s2990_s21 + $0x598] sm:$0xff]  ;;  %v3953_v12 = vld [vmem:[%s2995_s28 + $0x8] sm:$0xff] }
 0x16f   : > { %v2682_v28 = vpop.eup %2681  ;;  %2059 = vst [vmem:[%s3489_s5 + $0x4d0] sm:$0xff] %v1866_v14  ;;  %2695 = vtanh.f32 %v1299_v13  ;;  %v589_v23 = vmul.f32 %v3717_v60, %v397_v51  ;;  %v590_v36 = vmul.f32 %v3723_v62, %v398_v57  ;;  %v591_v50 = vmul.f32 %v3729_v41, %v399_v39  ;;  %v3957_v51 = vld [vmem:[%s2995_s28 + $0x10] sm:$0xff]  ;;  %v3961_v31 = vld [vmem:[%s2995_s28 + $0x18] sm:$0xff]  ;;  %v3967_v39 = vld [vmem:[%s2995_s28 + $0x20] sm:$0xff] }
 0x170   : > { %v2684_v2 = vpop.eup %2683  ;;  %2060 = vst.msk [vmem:[%s3489_s5 + $0x4d8] sm:$0xff] %vm1905_vm0, %v1867_v19  ;;  %v1664_v58 = vmul.f32 0.5, %v2682_v28  ;;  %2697 = vtanh.f32 %v1300_v55  ;;  %v592_v16 = vmul.f32 %v3734_v7, %v400_v15  ;;  %v593_v20 = vmul.f32 %v3740_v5, %v401_v0  ;;  %v3971_v55 = vld [vmem:[%s2995_s28 + $0x28] sm:$0xff] }
 0x171   : > { %v2686_v30 = vpop.eup %2685  ;;  %v1665_v52 = vmul.f32 0.5, %v2684_v2  ;;  %2699 = vtanh.f32 %v1301_v9  ;;  %v1100_v27 = vadd.f32 %v922_v56, %v588_v21  ;;  %v1101_v61 = vadd.f32 %v922_v56, %v589_v23 }
 0x172   : > { %v2688_v60 = vpop.eup %2687  ;;  %v1666_v62 = vmul.f32 0.5, %v2686_v30  ;;  %v1856_v41 = vadd.f32 0.5, %v1664_v58  ;;  %2701 = vtanh.f32 %v1302_v18  ;;  %v1102_v35 = vadd.f32 %v922_v56, %v590_v36 }
 0x173   : > { %v2690_v43 = vpop.eup %2689  ;;  %v1667_v44 = vmul.f32 0.5, %v2688_v60  ;;  %v1857_v22 = vadd.f32 0.5, %v1665_v52  ;;  %2703 = vtanh.f32 %v1303_v40  ;;  %v1103_v7 = vadd.f32 %v922_v56, %v591_v50 }
 0x174   : > { %v2692_v5 = vpop.eup %2691  ;;  %v1668_v8 = vmul.f32 0.5, %v2690_v43  ;;  %v1858_v45 = vadd.f32 0.5, %v1666_v62  ;;  %2049 = vst [vmem:[%s3489_s5 + $0x480] sm:$0xff] %v1856_v41  ;;  %v1104_v32 = vadd.f32 %v922_v56, %v592_v16  ;;  %v1105_v3 = vadd.f32 %v922_v56, %v593_v20  ;;  %v410_v43 = vld [vmem:[%s2990_s21 + $0x550] sm:$0xff] }
 0x175   : > { %v1669_v37 = vmul.f32 0.5, %v2692_v5  ;;  %v1859_v53 = vadd.f32 0.5, %v1667_v44  ;;  %2050 = vst.msk [vmem:[%s3489_s5 + $0x488] sm:$0xff] %vm1905_vm0, %v1857_v22  ;;  %v1292_v10 = vmul.f32 0.5, %v1100_v27  ;;  %v1293_v17 = vmul.f32 0.5, %v1101_v61  ;;  %v408_v27 = vld [vmem:[%s2990_s21 + $0x540] sm:$0xff] }
 0x176   : > { %v1860_v47 = vadd.f32 0.5, %v1668_v8  ;;  %2051 = vst [vmem:[%s3489_s5 + $0x490] sm:$0xff] %v1858_v45  ;;  %v1294_v54 = vmul.f32 0.5, %v1102_v35  ;;  %v1295_v29 = vmul.f32 0.5, %v1103_v7  ;;  %v1296_v59 = vmul.f32 0.5, %v1104_v32  ;;  %v409_v61 = vld [vmem:[%s2990_s21 + $0x548] sm:$0xff] }
 0x177   : > { %v1861_v49 = vadd.f32 0.5, %v1669_v37  ;;  %2052 = vst.msk [vmem:[%s3489_s5 + $0x498] sm:$0xff] %vm1905_vm0, %v1859_v53  ;;  %v1297_v34 = vmul.f32 0.5, %v1105_v3  ;;  %2705 = vtanh.f32 %v1292_v10  ;;  %v606_v24 = vmul.f32 %v3927_v38, %v414_v4  ;;  %v411_v44 = vld [vmem:[%s2990_s21 + $0x558] sm:$0xff]  ;;  %v412_v45 = vld [vmem:[%s2990_s21 + $0x560] sm:$0xff]  ;;  %v413_v32 = vld [vmem:[%s2990_s21 + $0x568] sm:$0xff] }
 0x178   : > { %v2694_v63 = vpop.eup %2693  ;;  %2053 = vst [vmem:[%s3489_s5 + $0x4a0] sm:$0xff] %v1860_v47  ;;  %2707 = vtanh.f32 %v1293_v17  ;;  %v607_v25 = vmul.f32 %v3953_v12, %v415_v42  ;;  %v608_v26 = vmul.f32 %v3957_v51, %v416_v48  ;;  %v609_v1 = vmul.f32 %v3961_v31, %v417_v46  ;;  %v930_v42 = vpop.permute.xlu0 %929 }
 0x179   : > { %v2696_v13 = vpop.eup %2695  ;;  %2054 = vst.msk [vmem:[%s3489_s5 + $0x4a8] sm:$0xff] %vm1905_vm0, %v1861_v49  ;;  %v1682_v57 = vmul.f32 0.5, %v2694_v63  ;;  %2709 = vtanh.f32 %v1294_v54  ;;  %v610_v14 = vmul.f32 %v3967_v39, %v418_v33  ;;  %v611_v9 = vmul.f32 %v3971_v55, %v419_v6 }
 0x17a   : > { %v2698_v18 = vpop.eup %2697  ;;  %v1683_v15 = vmul.f32 0.5, %v2696_v13  ;;  %2711 = vtanh.f32 %v1295_v29  ;;  %v1118_v0 = vadd.f32 %v934_v11, %v606_v24  ;;  %v1119_v19 = vadd.f32 %v934_v11, %v607_v25 }
 0x17b   : > { %v2700_v40 = vpop.eup %2699  ;;  %v1684_v56 = vmul.f32 0.5, %v2698_v18  ;;  %v1874_v21 = vadd.f32 0.5, %v1682_v57  ;;  %2713 = vtanh.f32 %v1296_v59  ;;  %v1120_v28 = vadd.f32 %v934_v11, %v608_v26 }
 0x17c   : > { %v2702_v23 = vpop.eup %2701  ;;  %v1685_v36 = vmul.f32 0.5, %v2700_v40  ;;  %v1875_v50 = vadd.f32 0.5, %v1683_v15  ;;  %2715 = vtanh.f32 %v1297_v34  ;;  %v1121_v2 = vadd.f32 %v934_v11, %v609_v1 }
 0x17d   : > { %v2704_v58 = vpop.eup %2703  ;;  %v1686_v16 = vmul.f32 0.5, %v2702_v23  ;;  %v1876_v20 = vadd.f32 0.5, %v1684_v56  ;;  %2067 = vst [vmem:[%s3489_s5 + $0x510] sm:$0xff] %v1874_v21  ;;  %v1122_v30 = vadd.f32 %v934_v11, %v610_v14  ;;  %v1123_v52 = vadd.f32 %v934_v11, %v611_v9  ;;  %v428_v23 = vld [vmem:[%s2990_s21 + $0x5e0] sm:$0xff] }
 0x17e   : > { %v1687_v60 = vmul.f32 0.5, %v2704_v58  ;;  %v1877_v62 = vadd.f32 0.5, %v1685_v36  ;;  %2068 = vst.msk [vmem:[%s3489_s5 + $0x518] sm:$0xff] %vm1905_vm0, %v1875_v50  ;;  %v1310_v41 = vmul.f32 0.5, %v1118_v0  ;;  %v1311_v35 = vmul.f32 0.5, %v1119_v19  ;;  %v426_v0 = vld [vmem:[%s2990_s21 + $0x5d0] sm:$0xff] }
 0x17f   : > { %v1878_v22 = vadd.f32 0.5, %v1686_v16  ;;  %2069 = vst [vmem:[%s3489_s5 + $0x520] sm:$0xff] %v1876_v20  ;;  %v1312_v7 = vmul.f32 0.5, %v1120_v28  ;;  %v1313_v5 = vmul.f32 0.5, %v1121_v2  ;;  %v1314_v8 = vmul.f32 0.5, %v1122_v30  ;;  %v427_v19 = vld [vmem:[%s2990_s21 + $0x5d8] sm:$0xff] }
 0x180   : > { %v1879_v3 = vadd.f32 0.5, %v1687_v60  ;;  %2070 = vst.msk [vmem:[%s3489_s5 + $0x528] sm:$0xff] %vm1905_vm0, %v1877_v62  ;;  %v1315_v4 = vmul.f32 0.5, %v1123_v52  ;;  %2717 = vtanh.f32 %v1310_v41  ;;  %v600_v37 = vmul.f32 %v3927_v38, %v408_v27  ;;  %v429_v36 = vld [vmem:[%s2990_s21 + $0x5e8] sm:$0xff]  ;;  %v430_v20 = vld [vmem:[%s2990_s21 + $0x5f0] sm:$0xff]  ;;  %v431_v30 = vld [vmem:[%s2990_s21 + $0x5f8] sm:$0xff] }
 0x181   : > { %v2706_v53 = vpop.eup %2705  ;;  %2071 = vst [vmem:[%s3489_s5 + $0x530] sm:$0xff] %v1878_v22  ;;  %2719 = vtanh.f32 %v1311_v35  ;;  %v601_v10 = vmul.f32 %v3953_v12, %v409_v61  ;;  %v602_v17 = vmul.f32 %v3957_v51, %v410_v43  ;;  %v603_v48 = vmul.f32 %v3961_v31, %v411_v44  ;;  %v942_v61 = vpop.permute.xlu1 %941 }
 0x182   : > { %v2708_v46 = vpop.eup %2707  ;;  %2072 = vst.msk [vmem:[%s3489_s5 + $0x538] sm:$0xff] %vm1905_vm0, %v1879_v3  ;;  %v1676_v47 = vmul.f32 0.5, %v2706_v53  ;;  %2721 = vtanh.f32 %v1312_v7  ;;  %v604_v54 = vmul.f32 %v3967_v39, %v412_v45  ;;  %v605_v29 = vmul.f32 %v3971_v55, %v413_v32 }
 0x183   : > { %v2710_v59 = vpop.eup %2709  ;;  %v1677_v33 = vmul.f32 0.5, %v2708_v46  ;;  %2723 = vtanh.f32 %v1313_v5  ;;  %v1112_v6 = vadd.f32 %v930_v42, %v600_v37  ;;  %v1113_v49 = vadd.f32 %v930_v42, %v601_v10 }
 0x184   : > { %v2712_v34 = vpop.eup %2711  ;;  %v1678_v11 = vmul.f32 0.5, %v2710_v59  ;;  %v1868_v24 = vadd.f32 0.5, %v1676_v47  ;;  %2725 = vtanh.f32 %v1314_v8  ;;  %v1114_v63 = vadd.f32 %v930_v42, %v602_v17 }
 0x185   : > { %v2714_v25 = vpop.eup %2713  ;;  %v1679_v26 = vmul.f32 0.5, %v2712_v34  ;;  %v1869_v1 = vadd.f32 0.5, %v1677_v33  ;;  %2727 = vtanh.f32 %v1315_v4  ;;  %v1115_v13 = vadd.f32 %v930_v42, %v603_v48 }
 0x186   : > { %v2716_v57 = vpop.eup %2715  ;;  %v1680_v14 = vmul.f32 0.5, %v2714_v25  ;;  %v1870_v9 = vadd.f32 0.5, %v1678_v11  ;;  %2061 = vst [vmem:[%s3489_s5 + $0x4e0] sm:$0xff] %v1868_v24  ;;  %v1116_v18 = vadd.f32 %v930_v42, %v604_v54  ;;  %v1117_v15 = vadd.f32 %v930_v42, %v605_v29  ;;  %v422_v25 = vld [vmem:[%s2990_s21 + $0x5b0] sm:$0xff] }
 0x187   : > { %v1681_v40 = vmul.f32 0.5, %v2716_v57  ;;  %v1871_v56 = vadd.f32 0.5, %v1679_v26  ;;  %2062 = vst.msk [vmem:[%s3489_s5 + $0x4e8] sm:$0xff] %vm1905_vm0, %v1869_v1  ;;  %v1304_v21 = vmul.f32 0.5, %v1112_v6  ;;  %v1305_v28 = vmul.f32 0.5, %v1113_v49  ;;  %v420_v6 = vld [vmem:[%s2990_s21 + $0x5a0] sm:$0xff] }
 0x188   : > { %v1872_v50 = vadd.f32 0.5, %v1680_v14  ;;  %2063 = vst [vmem:[%s3489_s5 + $0x4f0] sm:$0xff] %v1870_v9  ;;  %v1306_v2 = vmul.f32 0.5, %v1114_v63  ;;  %v1307_v58 = vmul.f32 0.5, %v1115_v13  ;;  %v1308_v16 = vmul.f32 0.5, %v1116_v18  ;;  %v421_v49 = vld [vmem:[%s2990_s21 + $0x5a8] sm:$0xff] }
 0x189   : > { %v1873_v52 = vadd.f32 0.5, %v1681_v40  ;;  %2064 = vst.msk [vmem:[%s3489_s5 + $0x4f8] sm:$0xff] %vm1905_vm0, %v1871_v56  ;;  %v1309_v27 = vmul.f32 0.5, %v1117_v15  ;;  %2729 = vtanh.f32 %v1304_v21  ;;  %v618_v60 = vmul.f32 %v3927_v38, %v426_v0  ;;  %v423_v26 = vld [vmem:[%s2990_s21 + $0x5b8] sm:$0xff]  ;;  %v424_v9 = vld [vmem:[%s2990_s21 + $0x5c0] sm:$0xff]  ;;  %v425_v18 = vld [vmem:[%s2990_s21 + $0x5c8] sm:$0xff] }
 0x18a   : > { %v2718_v62 = vpop.eup %2717  ;;  %2065 = vst [vmem:[%s3489_s5 + $0x500] sm:$0xff] %v1872_v50  ;;  %2731 = vtanh.f32 %v1305_v28  ;;  %v619_v41 = vmul.f32 %v3953_v12, %v427_v19  ;;  %v620_v35 = vmul.f32 %v3957_v51, %v428_v23  ;;  %v621_v43 = vmul.f32 %v3961_v31, %v429_v36  ;;  %v938_v19 = vpop.permute.xlu0 %937 }
 0x18b   : > { %v2720_v44 = vpop.eup %2719  ;;  %2066 = vst.msk [vmem:[%s3489_s5 + $0x508] sm:$0xff] %vm1905_vm0, %v1873_v52  ;;  %v1694_v22 = vmul.f32 0.5, %v2718_v62  ;;  %2733 = vtanh.f32 %v1306_v2  ;;  %v622_v7 = vmul.f32 %v3967_v39, %v430_v20  ;;  %v623_v5 = vmul.f32 %v3971_v55, %v431_v30 }
 0x18c   : > { %v2722_v8 = vpop.eup %2721  ;;  %v1695_v45 = vmul.f32 0.5, %v2720_v44  ;;  %2735 = vtanh.f32 %v1307_v58  ;;  %v1130_v32 = vadd.f32 %v942_v61, %v618_v60  ;;  %v1131_v3 = vadd.f32 %v942_v61, %v619_v41 }
 0x18d   : > { %v2724_v4 = vpop.eup %2723  ;;  %v1696_v42 = vmul.f32 0.5, %v2722_v8  ;;  %v1886_v37 = vadd.f32 0.5, %v1694_v22  ;;  %2737 = vtanh.f32 %v1308_v16  ;;  %v1132_v53 = vadd.f32 %v942_v61, %v620_v35 }
 0x18e   : > { %v2726_v10 = vpop.eup %2725  ;;  %v1697_v17 = vmul.f32 0.5, %v2724_v4  ;;  %v1887_v48 = vadd.f32 0.5, %v1695_v45  ;;  %2739 = vtanh.f32 %v1309_v27  ;;  %v1133_v46 = vadd.f32 %v942_v61, %v621_v43 }
 0x18f   : > { %v2728_v47 = vpop.eup %2727  ;;  %v1698_v54 = vmul.f32 0.5, %v2726_v10  ;;  %v1888_v29 = vadd.f32 0.5, %v1696_v42  ;;  %2079 = vst [vmem:[%s3489_s5 + $0x570] sm:$0xff] %v1886_v37  ;;  %v1134_v59 = vadd.f32 %v942_v61, %v622_v7  ;;  %v1135_v33 = vadd.f32 %v942_v61, %v623_v5 }
 0x190   : > { %v1699_v34 = vmul.f32 0.5, %v2728_v47  ;;  %v1889_v11 = vadd.f32 0.5, %v1697_v17  ;;  %2080 = vst.msk [vmem:[%s3489_s5 + $0x578] sm:$0xff] %vm1905_vm0, %v1887_v48  ;;  %v1322_v24 = vmul.f32 0.5, %v1130_v32  ;;  %v1323_v63 = vmul.f32 0.5, %v1131_v3 }
 0x191   : > { %v1890_v1 = vadd.f32 0.5, %v1698_v54  ;;  %2081 = vst [vmem:[%s3489_s5 + $0x580] sm:$0xff] %v1888_v29  ;;  %v1324_v13 = vmul.f32 0.5, %v1132_v53  ;;  %v1325_v57 = vmul.f32 0.5, %v1133_v46  ;;  %v1326_v14 = vmul.f32 0.5, %v1134_v59 }
 0x192   : > { %v1891_v15 = vadd.f32 0.5, %v1699_v34  ;;  %2082 = vst.msk [vmem:[%s3489_s5 + $0x588] sm:$0xff] %vm1905_vm0, %v1889_v11  ;;  %v1327_v0 = vmul.f32 0.5, %v1135_v33  ;;  %2741 = vtanh.f32 %v1322_v24  ;;  %v612_v40 = vmul.f32 %v3927_v38, %v420_v6 }
 0x193   : > { %v2730_v56 = vpop.eup %2729  ;;  %2083 = vst [vmem:[%s3489_s5 + $0x590] sm:$0xff] %v1890_v1  ;;  %2743 = vtanh.f32 %v1323_v63  ;;  %v613_v21 = vmul.f32 %v3953_v12, %v421_v49  ;;  %v614_v28 = vmul.f32 %v3957_v51, %v422_v25  ;;  %v615_v23 = vmul.f32 %v3961_v31, %v423_v26 }
 0x194   : > { %v2732_v36 = vpop.eup %2731  ;;  %2084 = vst.msk [vmem:[%s3489_s5 + $0x598] sm:$0xff] %vm1905_vm0, %v1891_v15  ;;  %v1688_v50 = vmul.f32 0.5, %v2730_v56  ;;  %2745 = vtanh.f32 %v1324_v13  ;;  %v616_v2 = vmul.f32 %v3967_v39, %v424_v9  ;;  %v617_v58 = vmul.f32 %v3971_v55, %v425_v18 }
 0x195   : > { %v2734_v16 = vpop.eup %2733  ;;  %v1689_v38 = vmul.f32 0.5, %v2732_v36  ;;  %2747 = vtanh.f32 %v1325_v57  ;;  %v1124_v20 = vadd.f32 %v938_v19, %v612_v40  ;;  %v1125_v30 = vadd.f32 %v938_v19, %v613_v21 }
 0x196   : > { %v2736_v12 = vpop.eup %2735  ;;  %v1690_v52 = vmul.f32 0.5, %v2734_v16  ;;  %v1880_v51 = vadd.f32 0.5, %v1688_v50  ;;  %2749 = vtanh.f32 %v1326_v14  ;;  %v1126_v31 = vadd.f32 %v938_v19, %v614_v28 }
 0x197   : > { %v2738_v27 = vpop.eup %2737  ;;  %v1691_v61 = vmul.f32 0.5, %v2736_v12  ;;  %v1881_v60 = vadd.f32 0.5, %v1689_v38  ;;  %2751 = vtanh.f32 %v1327_v0  ;;  %v1127_v39 = vadd.f32 %v938_v19, %v615_v23 }
 0x198   : > { %v2740_v62 = vpop.eup %2739  ;;  %v1692_v55 = vmul.f32 0.5, %v2738_v27  ;;  %v1882_v41 = vadd.f32 0.5, %v1690_v52  ;;  %2073 = vst [vmem:[%s3489_s5 + $0x540] sm:$0xff] %v1880_v51  ;;  %v1128_v35 = vadd.f32 %v938_v19, %v616_v2  ;;  %v1129_v43 = vadd.f32 %v938_v19, %v617_v58 }
 0x199   : > { %v1693_v44 = vmul.f32 0.5, %v2740_v62  ;;  %v1883_v22 = vadd.f32 0.5, %v1691_v61  ;;  %2074 = vst.msk [vmem:[%s3489_s5 + $0x548] sm:$0xff] %vm1905_vm0, %v1881_v60  ;;  %v1316_v7 = vmul.f32 0.5, %v1124_v20  ;;  %v1317_v5 = vmul.f32 0.5, %v1125_v30 }
 0x19a   : > { %v1884_v8 = vadd.f32 0.5, %v1692_v55  ;;  %2075 = vst [vmem:[%s3489_s5 + $0x550] sm:$0xff] %v1882_v41  ;;  %v1318_v45 = vmul.f32 0.5, %v1126_v31  ;;  %v1319_v32 = vmul.f32 0.5, %v1127_v39  ;;  %v1320_v4 = vmul.f32 0.5, %v1128_v35 }
 0x19b   : > { %v1885_v3 = vadd.f32 0.5, %v1693_v44  ;;  %2076 = vst.msk [vmem:[%s3489_s5 + $0x558] sm:$0xff] %vm1905_vm0, %v1883_v22  ;;  %2753 = vtanh.f32 %v1316_v7  ;;  %v1321_v37 = vmul.f32 0.5, %v1129_v43 }
 0x19c   : > { %v2742_v42 = vpop.eup %2741  ;;  %2077 = vst [vmem:[%s3489_s5 + $0x560] sm:$0xff] %v1884_v8  ;;  %2755 = vtanh.f32 %v1317_v5 }
 0x19d   : > { %v2744_v53 = vpop.eup %2743  ;;  %2078 = vst.msk [vmem:[%s3489_s5 + $0x568] sm:$0xff] %vm1905_vm0, %v1885_v3  ;;  %v1706_v10 = vmul.f32 0.5, %v2742_v42  ;;  %2757 = vtanh.f32 %v1318_v45 }
 0x19e   : > { %v2746_v17 = vpop.eup %2745  ;;  %v1707_v48 = vmul.f32 0.5, %v2744_v53  ;;  %2759 = vtanh.f32 %v1319_v32 }
 0x19f   : > { %v2748_v46 = vpop.eup %2747  ;;  %v1708_v47 = vmul.f32 0.5, %v2746_v17  ;;  %v1898_v54 = vadd.f32 0.5, %v1706_v10  ;;  %2761 = vtanh.f32 %v1320_v4 }
 0x1a0   : > { %v2750_v29 = vpop.eup %2749  ;;  %v1709_v59 = vmul.f32 0.5, %v2748_v46  ;;  %v1899_v33 = vadd.f32 0.5, %v1707_v48  ;;  %2763 = vtanh.f32 %v1321_v37 }
 0x1a1   : > { %v2752_v6 = vpop.eup %2751  ;;  %v1710_v49 = vmul.f32 0.5, %v2750_v29  ;;  %v1900_v34 = vadd.f32 0.5, %v1708_v47  ;;  %2091 = vst [vmem:[%s3489_s5 + $0x5d0] sm:$0xff] %v1898_v54 }
 0x1a2   : > { %v1711_v11 = vmul.f32 0.5, %v2752_v6  ;;  %v1901_v24 = vadd.f32 0.5, %v1709_v59  ;;  %2092 = vst.msk [vmem:[%s3489_s5 + $0x5d8] sm:$0xff] %vm1905_vm0, %v1899_v33 }
 0x1a3   : > { %v1902_v63 = vadd.f32 0.5, %v1710_v49  ;;  %2093 = vst [vmem:[%s3489_s5 + $0x5e0] sm:$0xff] %v1900_v34 }
 0x1a4   : > { %v1903_v25 = vadd.f32 0.5, %v1711_v11  ;;  %2094 = vst.msk [vmem:[%s3489_s5 + $0x5e8] sm:$0xff] %vm1905_vm0, %v1901_v24 }
 0x1a5   : > { %v2754_v26 = vpop.eup %2753  ;;  %2095 = vst [vmem:[%s3489_s5 + $0x5f0] sm:$0xff] %v1902_v63 }
 0x1a6   : > { %v2756_v1 = vpop.eup %2755  ;;  %2096 = vst.msk [vmem:[%s3489_s5 + $0x5f8] sm:$0xff] %vm1905_vm0, %v1903_v25  ;;  %v1700_v13 = vmul.f32 0.5, %v2754_v26 }
 0x1a7   : > { %v2758_v57 = vpop.eup %2757  ;;  %v1701_v14 = vmul.f32 0.5, %v2756_v1 }
 0x1a8   : > { %v2760_v9 = vpop.eup %2759  ;;  %v1702_v18 = vmul.f32 0.5, %v2758_v57  ;;  %v1892_v15 = vadd.f32 0.5, %v1700_v13 }
 0x1a9   : > { %v2762_v0 = vpop.eup %2761  ;;  %v1703_v19 = vmul.f32 0.5, %v2760_v9  ;;  %v1893_v40 = vadd.f32 0.5, %v1701_v14 }
 0x1aa   : > { %v2764_v56 = vpop.eup %2763  ;;  %v1704_v21 = vmul.f32 0.5, %v2762_v0  ;;  %v1894_v28 = vadd.f32 0.5, %v1702_v18  ;;  %2085 = vst [vmem:[%s3489_s5 + $0x5a0] sm:$0xff] %v1892_v15 }
 0x1ab   : > { %v1705_v23 = vmul.f32 0.5, %v2764_v56  ;;  %v1895_v36 = vadd.f32 0.5, %v1703_v19  ;;  %2086 = vst.msk [vmem:[%s3489_s5 + $0x5a8] sm:$0xff] %vm1905_vm0, %v1893_v40 }
 0x1ac   : > { %v1896_v50 = vadd.f32 0.5, %v1704_v21  ;;  %2087 = vst [vmem:[%s3489_s5 + $0x5b0] sm:$0xff] %v1894_v28 }
 0x1ad   : > { %v1897_v2 = vadd.f32 0.5, %v1705_v23  ;;  %2088 = vst.msk [vmem:[%s3489_s5 + $0x5b8] sm:$0xff] %vm1905_vm0, %v1895_v36 }
 0x1ae   : > { %2089 = vst [vmem:[%s3489_s5 + $0x5c0] sm:$0xff] %v1896_v50 }
 0x1af   : > { %2090 = vst.msk [vmem:[%s3489_s5 + $0x5c8] sm:$0xff] %vm1905_vm0, %v1897_v2 }
 0x1b0   : > { %s2290_s7 = smul.u32 6, %s2827_s15  ;;  %s2131_s8 = sshll.u32 %s3489_s5, 4  ;;  %s2132_s8 = int_to_ptr.vmem [resolvable:$true] %s2131_s8 }
 0x1b1   : > { %s2293_s9 = smul.u32 1536, %s2831_s16  ;;  %s2846_s11 = smov 768  }
 0x1b2   : > { %2294 = sst [smem:[#allocation5]] (%p2924_p3), %s2846_s11  ;;  %s2847_s21 = smov 6144  }
 0x1b3   : > { %s2112_s10 = sadd.s32 %s2293_s9, %s2290_s7  ;;  %2295 = sst [smem:[#allocation5 + $0x1]] (%p2924_p3), %s2847_s21 }
 0x1b4   : > { %s2286_s20 = sshll.u32 %s2112_s10, 7  ;;  %s2848_s29 = smov 3  }
 0x1b5   : > { %s2114_s28 = scalar_lea.hbm %s4117_s3, %s2286_s20  ;;  %2296 = sst [smem:[#allocation5 + $0x2]] (%p2924_p3), %s2848_s29 }
 0x1b6   : > { %s2849_s15 = smov 256   ;;  %s2850_s16 = smov 16  }
 0x1b7   : > { %2297 = sst [smem:[#allocation5 + $0x3]] (%p2924_p3), %s2849_s15  ;;  %s2851_s4 = smov [#allocation4]  }
 0x1b8   : > { %2298 = sst [smem:[#allocation5 + $0x4]] (%p2924_p3), %s2849_s15  ;;  %s2852_s5 = smov 0  }
 0x1b9   : > { %2299 = sst [smem:[#allocation5 + $0x5]] (%p2924_p3), %s2850_s16 }
 0x1ba   : > { %2300 = dma.general (%p2924_p3), %s2132_s8, 24576, %s2114_s28, %s2098_s6, %s2851_s4, [#allocation5], %s2852_s5, 0  }
 0x1bb PF: > { %p2306_p0 = scmp.ge.s32.totalorder %s2843_s19, 2  ;;  %s2159_s7 = sand.u32 1, %s2815_s12  }
 0x1bc   : > { %s2160_s9 = scalar_lea.sflag [#allocation3], %s2159_s7 }
 0x1bd   : > { %p2303_p1 = pnand %p2306_p0, %p2933_p8 }
 0x1bf   : > { %2810 = dma.done.wait (!%p2303_p1), %s2160_s9, 24576  }
 0x1c0   : > { %2812 = vsyncadd (!%p2303_p1), %s2160_s9, 4294942720  ;;  %s16_s19 = sadd.s32 1, %s2843_s19   ;;  %s4240_s12 = smov %s2819_s13 }
 0x1c1   : > { %p13_p2 = scmp.ge.s32.totalorder %s16_s19, 66   ;;  %s4241_s13 = smov %s2823_s14 }
 0x1c2   : > { %s4242_s14 = smov %s2942_s30  ;;  %s4243_s15 = smov %s2835_s17 }
 0x1c3   : > { %s4244_s16 = smov %s2839_s18  ;;  %s4245_s17 = smov %s4248_s22 }
 0x1c4   : > { %s4246_s18 = smov %s4252_s23  ;;  %15 = sbr.rel (!%p13_p2) target bundleno = 5 (0x5), region = 78 }
 0x1cb   :  { %2165 = vsyncpa [#allocation3], 1 }
 0x1cc   :  { %2167 = vsyncpa [#allocation3 + $0x1], 1 }

</bundles_post_ra>
